<compile_context>
chip_gen: v6e
topology: v6e:2x2x1
jax: 0.10.0
libtpu: 0.0.40
codegen_flags: <defaults>
</compile_context>

<pallas_src>
import functools

import jax
import jax.numpy as jnp
import numpy as np
from jax.experimental import pallas as pl
from jax.experimental.pallas import tpu as pltpu

DIM = 8
HIDDEN = 32
NUM_BLOCKS = 4
NUM_LAYERS = 2 * NUM_BLOCKS
INIT_WEIGHT_SCALE = 1e-4
NEG_SLOPE = 0.01  # nn.LeakyReLU default negative_slope


def _leaky_relu(x):
    # max form: mul + max (2 VPU ops) instead of cmp + mul + select (3 ops).
    return jnp.maximum(x, NEG_SLOPE * x)


def rnvp_forward_kernel(x_ref, masks_ref,
                        w1_ref, b1_ref, w2_ref, b2_ref, w3_ref, b3_ref,
                        z_out_ref, logdet_out_ref):
    # Transposed, lane-dense layout: features on sublanes, batch on lanes.
    z = x_ref[...]                                         # (D, T) f32
    D = z.shape[0]
    T = z.shape[1]
    num_layers = masks_ref.shape[0]
    logdet = jnp.zeros((1, T), jnp.float32)

    # forward_flatten: iterate layers in reversed order (fully unrolled).
    for i in reversed(range(num_layers)):
        m = masks_ref[i]                                   # (D, 1)
        keep = m > 0.0                                     # broadcast select mask
        z_ = m * z                                         # masked net input (D, T)

        # Fused s/t networks (3 matmuls instead of 6):
        #   h  = LeakyReLU([sW1;tW1] @ z_ + [sb1;tb1])          (2H, T)
        #   h  = LeakyReLU(blockdiag(sW2,tW2) @ h + [sb2;tb2])  (2H, T)
        #   st = blockdiag(sW3,tW3) @ h + [sb3;tb3]             (2D, T)
        # (1 - mask) is pre-baked into the rows of w3/b3, so masked rows of
        # st are exactly zero -> tanh gives zero there too.
        h = jnp.dot(w1_ref[i], z_, preferred_element_type=jnp.float32) + b1_ref[i]
        h = _leaky_relu(h)
        h = jnp.dot(w2_ref[i], h, preferred_element_type=jnp.float32) + b2_ref[i]
        h = _leaky_relu(h)
        st = jnp.dot(w3_ref[i], h, preferred_element_type=jnp.float32) + b3_ref[i]

        s = jnp.tanh(st[:D, :])                            # == tanh(.) * (1-m)
        t = st[D:, :]                                      # == (.) * (1-m)

        # affine coupling (inverse direction = "forward" in the torch module):
        # where mask==1 z is unchanged, elsewhere (z - t) * exp(-s).
        z = jnp.where(keep, z, (z - t) * jnp.exp(-s))
        logdet = logdet - jnp.sum(s, axis=0, keepdims=True)

    z_out_ref[...] = z
    logdet_out_ref[...] = logdet


def make_params(key, dim=DIM, hidden=HIDDEN, num_layers=NUM_LAYERS,
                init_weight_scale=INIT_WEIGHT_SCALE):
    """Deterministic parameter init mimicking the torch module's shapes.

    Weights ~ sparse-ish normal (std=init_weight_scale, ~30% zeroed),
    biases ~ default torch Linear init U(-1/sqrt(fan_in), 1/sqrt(fan_in)).
    Weights stored in torch Linear layout (num_layers, out_features, in_features).
    """
    def linear(k, fan_in, fan_out):
        kw, km, kb = jax.random.split(k, 3)
        w = jax.random.normal(kw, (num_layers, fan_out, fan_in), jnp.float32) * init_weight_scale
        keep = (jax.random.uniform(km, (num_layers, fan_out, fan_in)) > 0.3).astype(jnp.float32)
        w = w * keep
        bound = 1.0 / np.sqrt(fan_in)
        b = jax.random.uniform(kb, (num_layers, fan_out), jnp.float32, -bound, bound)
        return w, b

    ks = jax.random.split(key, 6)
    sW1, sb1 = linear(ks[0], dim, hidden)
    sW2, sb2 = linear(ks[1], hidden, hidden)
    sW3, sb3 = linear(ks[2], hidden, dim)
    tW1, tb1 = linear(ks[3], dim, hidden)
    tW2, tb2 = linear(ks[4], hidden, hidden)
    tW3, tb3 = linear(ks[5], hidden, dim)
    return (sW1, sb1, sW2, sb2, sW3, sb3, tW1, tb1, tW2, tb2, tW3, tb3)


def make_masks(dim=DIM, num_blocks=NUM_BLOCKS):
    rows = num_blocks * [[i % 2 for i in range(dim)],
                         [(i + 1) % 2 for i in range(dim)]]
    return jnp.asarray(rows, dtype=jnp.float32)


def pack_params(params, masks):
    """Fuse per-layer s/t nets into stacked, mask-baked weight tensors.

    Returns:
      w1: (L, 2H, D)    b1: (L, 2H, 1)
      w2: (L, 2H, 2H)   b2: (L, 2H, 1)   block-diag [sW2 0; 0 tW2]
      w3: (L, 2D, 2H)   b3: (L, 2D, 1)   block-diag, rows scaled by (1 - mask)
    """
    sW1, sb1, sW2, sb2, sW3, sb3, tW1, tb1, tW2, tb2, tW3, tb3 = params
    L, H, D = sW1.shape
    one_m = 1.0 - masks                                    # (L, D)

    w1 = jnp.concatenate([sW1, tW1], axis=1)               # (L, 2H, D)
    b1 = jnp.concatenate([sb1, tb1], axis=1)[..., None]    # (L, 2H, 1)

    zH = jnp.zeros((L, H, H), jnp.float32)
    w2 = jnp.concatenate([jnp.concatenate([sW2, zH], axis=2),
                          jnp.concatenate([zH, tW2], axis=2)], axis=1)
    b2 = jnp.concatenate([sb2, tb2], axis=1)[..., None]

    sW3m = sW3 * one_m[:, :, None]
    tW3m = tW3 * one_m[:, :, None]
    sb3m = sb3 * one_m
    tb3m = tb3 * one_m
    zD = jnp.zeros((L, D, H), jnp.float32)
    w3 = jnp.concatenate([jnp.concatenate([sW3m, zD], axis=2),
                          jnp.concatenate([zD, tW3m], axis=2)], axis=1)
    b3 = jnp.concatenate([sb3m, tb3m], axis=1)[..., None]
    return w1, b1, w2, b2, w3, b3


def _choose_batch_tile(n, max_tile):
    """Static tile choice (n is known at trace time from the shape).

    * multiple of 256 (works on all generations; also a multiple of 128)
    * clamped to the batch for small calls (less padded/wasted work)
    * capped so the grid has >= 2 steps when there is enough work, so the
      single "parallel" axis can be sharded across v7x's 2 TensorCores.
    """
    granule = 256
    n_ceil = max(granule, ((n + granule - 1) // granule) * granule)
    tile = min(max_tile, n_ceil)
    if n_ceil >= 2 * granule:
        half = (((n_ceil // 2) + granule - 1) // granule) * granule
        tile = min(tile, half)
    return tile


@functools.partial(jax.jit, static_argnames=("batch_tile",))
def rnvp_forward(x, masks, params, batch_tile=2048):
    """Pallas equivalent of MinimalRNVP.forward: returns (z, log_det_J)."""
    dim = x.shape[-1]
    first_dims = x.shape[:-1]
    xf = x.reshape(-1, dim).astype(jnp.float32)
    n = xf.shape[0]
    tile = _choose_batch_tile(n, batch_tile)
    grid = (pl.cdiv(n, tile),)

    # Lane-dense layout: features on sublanes, batch on lanes.  No explicit
    # padding: Pallas clips the ragged last block (garbage pad columns are
    # batch-independent and their writes are discarded).
    xt = xf.T                                              # (D, N)

    packed = pack_params(params, masks)
    masks_col = masks[:, :, None]                          # (L, D, 1)

    def const_spec(a):
        nd = a.ndim
        return pl.BlockSpec(a.shape, lambda b, _nd=nd: (0,) * _nd)

    in_specs = ([pl.BlockSpec((dim, tile), lambda b: (0, b)),
                 const_spec(masks_col)]
                + [const_spec(p) for p in packed])
    out_specs = [pl.BlockSpec((dim, tile), lambda b: (0, b)),
                 pl.BlockSpec((1, tile), lambda b: (0, b))]

    z_t, logdet = pl.pallas_call(
        rnvp_forward_kernel,
        grid=grid,
        in_specs=in_specs,
        out_specs=out_specs,
        out_shape=(jax.ShapeDtypeStruct((dim, n), jnp.float32),
                   jax.ShapeDtypeStruct((1, n), jnp.float32)),
        compiler_params=pltpu.CompilerParams(
            dimension_semantics=("parallel",),
            vmem_limit_bytes=64 * 1024 * 1024),
    )(xt, masks_col, *packed)

    # TODO(synk): for HBM-bandwidth-critical deployments expose a (D, N)
    # transposed-I/O entry point so these two XLA transposes disappear.
    z = z_t.T.reshape(x.shape)
    log_det_J = logdet[0].reshape(first_dims)
    return z, log_det_J


def rnvp_forward_ref(x, masks, params):
    """Pure-JAX reference for correctness checking (torch-layout weights)."""
    sW1, sb1, sW2, sb2, sW3, sb3, tW1, tb1, tW2, tb2, tW3, tb3 = params
    dim = x.shape[-1]
    first_dims = x.shape[:-1]
    z = x.reshape(-1, dim).astype(jnp.float32)
    logdet = jnp.zeros((z.shape[0],), jnp.float32)
    for i in reversed(range(masks.shape[0])):
        m = masks[i]
        z_ = m * z
        h = _leaky_relu(z_ @ sW1[i].T + sb1[i])
        h = _leaky_relu(h @ sW2[i].T + sb2[i])
        s = jnp.tanh(h @ sW3[i].T + sb3[i]) * (1 - m)
        g = _leaky_relu(z_ @ tW1[i].T + tb1[i])
        g = _leaky_relu(g @ tW2[i].T + tb2[i])
        t = (g @ tW3[i].T + tb3[i]) * (1 - m)
        z = (1 - m) * (z - t) * jnp.exp(-s) + z_
        logdet = logdet - s.sum(axis=1)
    return z.reshape(x.shape), logdet.reshape(first_dims)


if __name__ == "__main__":
    key = jax.random.PRNGKey(0)
    k_param, k_x, k_x2 = jax.random.split(key, 3)

    params = make_params(k_param)
    masks = make_masks()

    # Small example consistent with the module: x (..., dim), first_dims (2, 8).
    x = jax.random.normal(k_x, (2, 8, DIM), dtype=jnp.float32)
    z, log_det_J = rnvp_forward(x, masks, params)
    z = jax.block_until_ready(z)
    log_det_J = jax.block_until_ready(log_det_J)

    z_ref, logdet_ref = rnvp_forward_ref(x, masks, params)
    np.testing.assert_allclose(np.asarray(z), np.asarray(z_ref), rtol=1e-5, atol=1e-5)
    np.testing.assert_allclose(np.asarray(log_det_J), np.asarray(logdet_ref),
                               rtol=1e-5, atol=1e-5)
    assert z.shape == x.shape and log_det_J.shape == x.shape[:-1]

    # Second check: exercises a multi-step grid with a ragged last block
    # (N = 519 -> tile 512, grid of 2 parallel steps).
    x2 = jax.random.normal(k_x2, (3, 173, DIM), dtype=jnp.float32)
    z2, ld2 = rnvp_forward(x2, masks, params)
    z2 = jax.block_until_ready(z2)
    ld2 = jax.block_until_ready(ld2)
    z2_ref, ld2_ref = rnvp_forward_ref(x2, masks, params)
    np.testing.assert_allclose(np.asarray(z2), np.asarray(z2_ref), rtol=1e-5, atol=1e-5)
    np.testing.assert_allclose(np.asarray(ld2), np.asarray(ld2_ref), rtol=1e-5, atol=1e-5)
    assert z2.shape == x2.shape and ld2.shape == x2.shape[:-1]

    print("KERNEL_OK")
</pallas_src>

<mosaic_0001>
module attributes {stable_mosaic.version = 11 : i64} {
  func.func @rnvp_forward_kernel(%arg0: i32, %arg1: memref<8x256xf32, #tpu.memory_space<vmem>>, %arg2: memref<8x8x1xf32, #tpu.memory_space<vmem>>, %arg3: memref<8x64x8xf32, #tpu.memory_space<vmem>>, %arg4: memref<8x64x1xf32, #tpu.memory_space<vmem>>, %arg5: memref<8x64x64xf32, #tpu.memory_space<vmem>>, %arg6: memref<8x64x1xf32, #tpu.memory_space<vmem>>, %arg7: memref<8x16x64xf32, #tpu.memory_space<vmem>>, %arg8: memref<8x16x1xf32, #tpu.memory_space<vmem>>, %arg9: memref<8x256xf32, #tpu.memory_space<vmem>>, %arg10: memref<1x256xf32, #tpu.memory_space<vmem>>) attributes {dimension_semantics = [#tpu.dimension_semantics<parallel>], iteration_bounds = array<i64: 1>, scalar_prefetch = 0 : i64, scratch_operands = 0 : i64, tpu.core_type = #tpu.core_type<tc>, window_params = [{transform_indices = @transform_0, window_bounds = array<i64: 8, 256>}, {pipeline_mode = #tpu.pipeline_mode<synchronous>, transform_indices = @transform_1, window_bounds = array<i64: 8, 8, 1>}, {pipeline_mode = #tpu.pipeline_mode<synchronous>, transform_indices = @transform_2, window_bounds = array<i64: 8, 64, 8>}, {pipeline_mode = #tpu.pipeline_mode<synchronous>, transform_indices = @transform_3, window_bounds = array<i64: 8, 64, 1>}, {pipeline_mode = #tpu.pipeline_mode<synchronous>, transform_indices = @transform_4, window_bounds = array<i64: 8, 64, 64>}, {pipeline_mode = #tpu.pipeline_mode<synchronous>, transform_indices = @transform_5, window_bounds = array<i64: 8, 64, 1>}, {pipeline_mode = #tpu.pipeline_mode<synchronous>, transform_indices = @transform_6, window_bounds = array<i64: 8, 16, 64>}, {pipeline_mode = #tpu.pipeline_mode<synchronous>, transform_indices = @transform_7, window_bounds = array<i64: 8, 16, 1>}, {transform_indices = @transform_8, window_bounds = array<i64: 8, 256>}, {transform_indices = @transform_9, window_bounds = array<i64: 1, 256>}]} {
    %c0 = arith.constant 0 : index
    %c0_0 = arith.constant 0 : index
    %0 = vector.load %arg1[%c0, %c0_0] : memref<8x256xf32, #tpu.memory_space<vmem>>, vector<8x256xf32>
    %cst = arith.constant 0.000000e+00 : f32
    %1 = vector.broadcast %cst : f32 to vector<1x256xf32>
    %c7 = arith.constant 7 : index
    %c0_1 = arith.constant 0 : index
    %c0_2 = arith.constant 0 : index
    %2 = vector.load %arg2[%c7, %c0_1, %c0_2] : memref<8x8x1xf32, #tpu.memory_space<vmem>>, vector<1x8x1xf32>
    %3 = vector.shape_cast %2 : vector<1x8x1xf32> to vector<8x1xf32>
    %cst_3 = arith.constant 0.000000e+00 : f32
    %4 = vector.broadcast %cst_3 : f32 to vector<8x1xf32>
    %5 = arith.cmpf ogt, %3, %4 : vector<8x1xf32>
    %6 = vector.broadcast %3 : vector<8x1xf32> to vector<8x256xf32>
    %7 = arith.mulf %6, %0 : vector<8x256xf32>
    %c7_4 = arith.constant 7 : index
    %c0_5 = arith.constant 0 : index
    %c0_6 = arith.constant 0 : index
    %8 = vector.load %arg3[%c7_4, %c0_5, %c0_6] : memref<8x64x8xf32, #tpu.memory_space<vmem>>, vector<1x64x8xf32>
    %9 = vector.shape_cast %8 : vector<1x64x8xf32> to vector<64x8xf32>
    %cst_7 = arith.constant dense<0.000000e+00> : vector<64x256xf32>
    %10 = tpu.matmul %9, %7, %cst_7 {dimension_numbers = #tpu.dot_dimension_numbers<[1], [0], [0], [1], [0, 0, 1, 1], [], []>} : vector<64x8xf32>, vector<8x256xf32>, vector<64x256xf32> -> vector<64x256xf32>
    %c7_8 = arith.constant 7 : index
    %c0_9 = arith.constant 0 : index
    %c0_10 = arith.constant 0 : index
    %11 = vector.load %arg4[%c7_8, %c0_9, %c0_10] : memref<8x64x1xf32, #tpu.memory_space<vmem>>, vector<1x64x1xf32>
    %12 = vector.shape_cast %11 : vector<1x64x1xf32> to vector<64x1xf32>
    %13 = vector.broadcast %12 : vector<64x1xf32> to vector<64x256xf32>
    %14 = arith.addf %10, %13 : vector<64x256xf32>
    %cst_11 = arith.constant 0.00999999977 : f32
    %15 = vector.broadcast %cst_11 : f32 to vector<64x256xf32>
    %16 = arith.mulf %15, %14 : vector<64x256xf32>
    %17 = arith.maximumf %14, %16 : vector<64x256xf32>
    %c7_12 = arith.constant 7 : index
    %c0_13 = arith.constant 0 : index
    %c0_14 = arith.constant 0 : index
    %18 = vector.load %arg5[%c7_12, %c0_13, %c0_14] : memref<8x64x64xf32, #tpu.memory_space<vmem>>, vector<1x64x64xf32>
    %19 = vector.shape_cast %18 : vector<1x64x64xf32> to vector<64x64xf32>
    %cst_15 = arith.constant dense<0.000000e+00> : vector<64x256xf32>
    %20 = tpu.matmul %19, %17, %cst_15 {dimension_numbers = #tpu.dot_dimension_numbers<[1], [0], [0], [1], [0, 0, 1, 1], [], []>} : vector<64x64xf32>, vector<64x256xf32>, vector<64x256xf32> -> vector<64x256xf32>
    %c7_16 = arith.constant 7 : index
    %c0_17 = arith.constant 0 : index
    %c0_18 = arith.constant 0 : index
    %21 = vector.load %arg6[%c7_16, %c0_17, %c0_18] : memref<8x64x1xf32, #tpu.memory_space<vmem>>, vector<1x64x1xf32>
    %22 = vector.shape_cast %21 : vector<1x64x1xf32> to vector<64x1xf32>
    %23 = vector.broadcast %22 : vector<64x1xf32> to vector<64x256xf32>
    %24 = arith.addf %20, %23 : vector<64x256xf32>
    %cst_19 = arith.constant 0.00999999977 : f32
    %25 = vector.broadcast %cst_19 : f32 to vector<64x256xf32>
    %26 = arith.mulf %25, %24 : vector<64x256xf32>
    %27 = arith.maximumf %24, %26 : vector<64x256xf32>
    %c7_20 = arith.constant 7 : index
    %c0_21 = arith.constant 0 : index
    %c0_22 = arith.constant 0 : index
    %28 = vector.load %arg7[%c7_20, %c0_21, %c0_22] : memref<8x16x64xf32, #tpu.memory_space<vmem>>, vector<1x16x64xf32>
    %29 = vector.shape_cast %28 : vector<1x16x64xf32> to vector<16x64xf32>
    %cst_23 = arith.constant dense<0.000000e+00> : vector<16x256xf32>
    %30 = tpu.matmul %29, %27, %cst_23 {dimension_numbers = #tpu.dot_dimension_numbers<[1], [0], [0], [1], [0, 0, 1, 1], [], []>} : vector<16x64xf32>, vector<64x256xf32>, vector<16x256xf32> -> vector<16x256xf32>
    %c7_24 = arith.constant 7 : index
    %c0_25 = arith.constant 0 : index
    %c0_26 = arith.constant 0 : index
    %31 = vector.load %arg8[%c7_24, %c0_25, %c0_26] : memref<8x16x1xf32, #tpu.memory_space<vmem>>, vector<1x16x1xf32>
    %32 = vector.shape_cast %31 : vector<1x16x1xf32> to vector<16x1xf32>
    %33 = vector.broadcast %32 : vector<16x1xf32> to vector<16x256xf32>
    %34 = arith.addf %30, %33 : vector<16x256xf32>
    %35 = vector.extract_strided_slice %34 {offsets = [0, 0], sizes = [8, 256], strides = [1, 1]} : vector<16x256xf32> to vector<8x256xf32>
    %36 = math.tanh %35 : vector<8x256xf32>
    %37 = vector.extract_strided_slice %34 {offsets = [8, 0], sizes = [8, 256], strides = [1, 1]} : vector<16x256xf32> to vector<8x256xf32>
    %38 = arith.subf %0, %37 : vector<8x256xf32>
    %cst_27 = arith.constant 0.000000e+00 : f32
    %39 = vector.broadcast %cst_27 : f32 to vector<8x256xf32>
    %40 = arith.subf %39, %36 : vector<8x256xf32>
    %41 = math.exp %40 : vector<8x256xf32>
    %42 = arith.mulf %38, %41 : vector<8x256xf32>
    %43 = vector.shape_cast %5 : vector<8x1xi1> to vector<8x1xi1>
    %44 = vector.broadcast %43 : vector<8x1xi1> to vector<8x256xi1>
    %45 = arith.select %44, %0, %42 : vector<8x256xi1>, vector<8x256xf32>
    %cst_28 = arith.constant dense<0.000000e+00> : vector<256xf32>
    %46 = vector.multi_reduction <add>, %36, %cst_28 [0] : vector<8x256xf32> to vector<256xf32>
    %47 = vector.shape_cast %46 : vector<256xf32> to vector<1x256xf32>
    %48 = arith.subf %1, %47 : vector<1x256xf32>
    %c6 = arith.constant 6 : index
    %c0_29 = arith.constant 0 : index
    %c0_30 = arith.constant 0 : index
    %49 = vector.load %arg2[%c6, %c0_29, %c0_30] : memref<8x8x1xf32, #tpu.memory_space<vmem>>, vector<1x8x1xf32>
    %50 = vector.shape_cast %49 : vector<1x8x1xf32> to vector<8x1xf32>
    %cst_31 = arith.constant 0.000000e+00 : f32
    %51 = vector.broadcast %cst_31 : f32 to vector<8x1xf32>
    %52 = arith.cmpf ogt, %50, %51 : vector<8x1xf32>
    %53 = vector.broadcast %50 : vector<8x1xf32> to vector<8x256xf32>
    %54 = arith.mulf %53, %45 : vector<8x256xf32>
    %c6_32 = arith.constant 6 : index
    %c0_33 = arith.constant 0 : index
    %c0_34 = arith.constant 0 : index
    %55 = vector.load %arg3[%c6_32, %c0_33, %c0_34] : memref<8x64x8xf32, #tpu.memory_space<vmem>>, vector<1x64x8xf32>
    %56 = vector.shape_cast %55 : vector<1x64x8xf32> to vector<64x8xf32>
    %cst_35 = arith.constant dense<0.000000e+00> : vector<64x256xf32>
    %57 = tpu.matmul %56, %54, %cst_35 {dimension_numbers = #tpu.dot_dimension_numbers<[1], [0], [0], [1], [0, 0, 1, 1], [], []>} : vector<64x8xf32>, vector<8x256xf32>, vector<64x256xf32> -> vector<64x256xf32>
    %c6_36 = arith.constant 6 : index
    %c0_37 = arith.constant 0 : index
    %c0_38 = arith.constant 0 : index
    %58 = vector.load %arg4[%c6_36, %c0_37, %c0_38] : memref<8x64x1xf32, #tpu.memory_space<vmem>>, vector<1x64x1xf32>
    %59 = vector.shape_cast %58 : vector<1x64x1xf32> to vector<64x1xf32>
    %60 = vector.broadcast %59 : vector<64x1xf32> to vector<64x256xf32>
    %61 = arith.addf %57, %60 : vector<64x256xf32>
    %cst_39 = arith.constant 0.00999999977 : f32
    %62 = vector.broadcast %cst_39 : f32 to vector<64x256xf32>
    %63 = arith.mulf %62, %61 : vector<64x256xf32>
    %64 = arith.maximumf %61, %63 : vector<64x256xf32>
    %c6_40 = arith.constant 6 : index
    %c0_41 = arith.constant 0 : index
    %c0_42 = arith.constant 0 : index
    %65 = vector.load %arg5[%c6_40, %c0_41, %c0_42] : memref<8x64x64xf32, #tpu.memory_space<vmem>>, vector<1x64x64xf32>
    %66 = vector.shape_cast %65 : vector<1x64x64xf32> to vector<64x64xf32>
    %cst_43 = arith.constant dense<0.000000e+00> : vector<64x256xf32>
    %67 = tpu.matmul %66, %64, %cst_43 {dimension_numbers = #tpu.dot_dimension_numbers<[1], [0], [0], [1], [0, 0, 1, 1], [], []>} : vector<64x64xf32>, vector<64x256xf32>, vector<64x256xf32> -> vector<64x256xf32>
    %c6_44 = arith.constant 6 : index
    %c0_45 = arith.constant 0 : index
    %c0_46 = arith.constant 0 : index
    %68 = vector.load %arg6[%c6_44, %c0_45, %c0_46] : memref<8x64x1xf32, #tpu.memory_space<vmem>>, vector<1x64x1xf32>
    %69 = vector.shape_cast %68 : vector<1x64x1xf32> to vector<64x1xf32>
    %70 = vector.broadcast %69 : vector<64x1xf32> to vector<64x256xf32>
    %71 = arith.addf %67, %70 : vector<64x256xf32>
    %cst_47 = arith.constant 0.00999999977 : f32
    %72 = vector.broadcast %cst_47 : f32 to vector<64x256xf32>
    %73 = arith.mulf %72, %71 : vector<64x256xf32>
    %74 = arith.maximumf %71, %73 : vector<64x256xf32>
    %c6_48 = arith.constant 6 : index
    %c0_49 = arith.constant 0 : index
    %c0_50 = arith.constant 0 : index
    %75 = vector.load %arg7[%c6_48, %c0_49, %c0_50] : memref<8x16x64xf32, #tpu.memory_space<vmem>>, vector<1x16x64xf32>
    %76 = vector.shape_cast %75 : vector<1x16x64xf32> to vector<16x64xf32>
    %cst_51 = arith.constant dense<0.000000e+00> : vector<16x256xf32>
    %77 = tpu.matmul %76, %74, %cst_51 {dimension_numbers = #tpu.dot_dimension_numbers<[1], [0], [0], [1], [0, 0, 1, 1], [], []>} : vector<16x64xf32>, vector<64x256xf32>, vector<16x256xf32> -> vector<16x256xf32>
    %c6_52 = arith.constant 6 : index
    %c0_53 = arith.constant 0 : index
    %c0_54 = arith.constant 0 : index
    %78 = vector.load %arg8[%c6_52, %c0_53, %c0_54] : memref<8x16x1xf32, #tpu.memory_space<vmem>>, vector<1x16x1xf32>
    %79 = vector.shape_cast %78 : vector<1x16x1xf32> to vector<16x1xf32>
    %80 = vector.broadcast %79 : vector<16x1xf32> to vector<16x256xf32>
    %81 = arith.addf %77, %80 : vector<16x256xf32>
    %82 = vector.extract_strided_slice %81 {offsets = [0, 0], sizes = [8, 256], strides = [1, 1]} : vector<16x256xf32> to vector<8x256xf32>
    %83 = math.tanh %82 : vector<8x256xf32>
    %84 = vector.extract_strided_slice %81 {offsets = [8, 0], sizes = [8, 256], strides = [1, 1]} : vector<16x256xf32> to vector<8x256xf32>
    %85 = arith.subf %45, %84 : vector<8x256xf32>
    %cst_55 = arith.constant 0.000000e+00 : f32
    %86 = vector.broadcast %cst_55 : f32 to vector<8x256xf32>
    %87 = arith.subf %86, %83 : vector<8x256xf32>
    %88 = math.exp %87 : vector<8x256xf32>
    %89 = arith.mulf %85, %88 : vector<8x256xf32>
    %90 = vector.shape_cast %52 : vector<8x1xi1> to vector<8x1xi1>
    %91 = vector.broadcast %90 : vector<8x1xi1> to vector<8x256xi1>
    %92 = arith.select %91, %45, %89 : vector<8x256xi1>, vector<8x256xf32>
    %cst_56 = arith.constant dense<0.000000e+00> : vector<256xf32>
    %93 = vector.multi_reduction <add>, %83, %cst_56 [0] : vector<8x256xf32> to vector<256xf32>
    %94 = vector.shape_cast %93 : vector<256xf32> to vector<1x256xf32>
    %95 = arith.subf %48, %94 : vector<1x256xf32>
    %c5 = arith.constant 5 : index
    %c0_57 = arith.constant 0 : index
    %c0_58 = arith.constant 0 : index
    %96 = vector.load %arg2[%c5, %c0_57, %c0_58] : memref<8x8x1xf32, #tpu.memory_space<vmem>>, vector<1x8x1xf32>
    %97 = vector.shape_cast %96 : vector<1x8x1xf32> to vector<8x1xf32>
    %cst_59 = arith.constant 0.000000e+00 : f32
    %98 = vector.broadcast %cst_59 : f32 to vector<8x1xf32>
    %99 = arith.cmpf ogt, %97, %98 : vector<8x1xf32>
    %100 = vector.broadcast %97 : vector<8x1xf32> to vector<8x256xf32>
    %101 = arith.mulf %100, %92 : vector<8x256xf32>
    %c5_60 = arith.constant 5 : index
    %c0_61 = arith.constant 0 : index
    %c0_62 = arith.constant 0 : index
    %102 = vector.load %arg3[%c5_60, %c0_61, %c0_62] : memref<8x64x8xf32, #tpu.memory_space<vmem>>, vector<1x64x8xf32>
    %103 = vector.shape_cast %102 : vector<1x64x8xf32> to vector<64x8xf32>
    %cst_63 = arith.constant dense<0.000000e+00> : vector<64x256xf32>
    %104 = tpu.matmul %103, %101, %cst_63 {dimension_numbers = #tpu.dot_dimension_numbers<[1], [0], [0], [1], [0, 0, 1, 1], [], []>} : vector<64x8xf32>, vector<8x256xf32>, vector<64x256xf32> -> vector<64x256xf32>
    %c5_64 = arith.constant 5 : index
    %c0_65 = arith.constant 0 : index
    %c0_66 = arith.constant 0 : index
    %105 = vector.load %arg4[%c5_64, %c0_65, %c0_66] : memref<8x64x1xf32, #tpu.memory_space<vmem>>, vector<1x64x1xf32>
    %106 = vector.shape_cast %105 : vector<1x64x1xf32> to vector<64x1xf32>
    %107 = vector.broadcast %106 : vector<64x1xf32> to vector<64x256xf32>
    %108 = arith.addf %104, %107 : vector<64x256xf32>
    %cst_67 = arith.constant 0.00999999977 : f32
    %109 = vector.broadcast %cst_67 : f32 to vector<64x256xf32>
    %110 = arith.mulf %109, %108 : vector<64x256xf32>
    %111 = arith.maximumf %108, %110 : vector<64x256xf32>
    %c5_68 = arith.constant 5 : index
    %c0_69 = arith.constant 0 : index
    %c0_70 = arith.constant 0 : index
    %112 = vector.load %arg5[%c5_68, %c0_69, %c0_70] : memref<8x64x64xf32, #tpu.memory_space<vmem>>, vector<1x64x64xf32>
    %113 = vector.shape_cast %112 : vector<1x64x64xf32> to vector<64x64xf32>
    %cst_71 = arith.constant dense<0.000000e+00> : vector<64x256xf32>
    %114 = tpu.matmul %113, %111, %cst_71 {dimension_numbers = #tpu.dot_dimension_numbers<[1], [0], [0], [1], [0, 0, 1, 1], [], []>} : vector<64x64xf32>, vector<64x256xf32>, vector<64x256xf32> -> vector<64x256xf32>
    %c5_72 = arith.constant 5 : index
    %c0_73 = arith.constant 0 : index
    %c0_74 = arith.constant 0 : index
    %115 = vector.load %arg6[%c5_72, %c0_73, %c0_74] : memref<8x64x1xf32, #tpu.memory_space<vmem>>, vector<1x64x1xf32>
    %116 = vector.shape_cast %115 : vector<1x64x1xf32> to vector<64x1xf32>
    %117 = vector.broadcast %116 : vector<64x1xf32> to vector<64x256xf32>
    %118 = arith.addf %114, %117 : vector<64x256xf32>
    %cst_75 = arith.constant 0.00999999977 : f32
    %119 = vector.broadcast %cst_75 : f32 to vector<64x256xf32>
    %120 = arith.mulf %119, %118 : vector<64x256xf32>
    %121 = arith.maximumf %118, %120 : vector<64x256xf32>
    %c5_76 = arith.constant 5 : index
    %c0_77 = arith.constant 0 : index
    %c0_78 = arith.constant 0 : index
    %122 = vector.load %arg7[%c5_76, %c0_77, %c0_78] : memref<8x16x64xf32, #tpu.memory_space<vmem>>, vector<1x16x64xf32>
    %123 = vector.shape_cast %122 : vector<1x16x64xf32> to vector<16x64xf32>
    %cst_79 = arith.constant dense<0.000000e+00> : vector<16x256xf32>
    %124 = tpu.matmul %123, %121, %cst_79 {dimension_numbers = #tpu.dot_dimension_numbers<[1], [0], [0], [1], [0, 0, 1, 1], [], []>} : vector<16x64xf32>, vector<64x256xf32>, vector<16x256xf32> -> vector<16x256xf32>
    %c5_80 = arith.constant 5 : index
    %c0_81 = arith.constant 0 : index
    %c0_82 = arith.constant 0 : index
    %125 = vector.load %arg8[%c5_80, %c0_81, %c0_82] : memref<8x16x1xf32, #tpu.memory_space<vmem>>, vector<1x16x1xf32>
    %126 = vector.shape_cast %125 : vector<1x16x1xf32> to vector<16x1xf32>
    %127 = vector.broadcast %126 : vector<16x1xf32> to vector<16x256xf32>
    %128 = arith.addf %124, %127 : vector<16x256xf32>
    %129 = vector.extract_strided_slice %128 {offsets = [0, 0], sizes = [8, 256], strides = [1, 1]} : vector<16x256xf32> to vector<8x256xf32>
    %130 = math.tanh %129 : vector<8x256xf32>
    %131 = vector.extract_strided_slice %128 {offsets = [8, 0], sizes = [8, 256], strides = [1, 1]} : vector<16x256xf32> to vector<8x256xf32>
    %132 = arith.subf %92, %131 : vector<8x256xf32>
    %cst_83 = arith.constant 0.000000e+00 : f32
    %133 = vector.broadcast %cst_83 : f32 to vector<8x256xf32>
    %134 = arith.subf %133, %130 : vector<8x256xf32>
    %135 = math.exp %134 : vector<8x256xf32>
    %136 = arith.mulf %132, %135 : vector<8x256xf32>
    %137 = vector.shape_cast %99 : vector<8x1xi1> to vector<8x1xi1>
    %138 = vector.broadcast %137 : vector<8x1xi1> to vector<8x256xi1>
    %139 = arith.select %138, %92, %136 : vector<8x256xi1>, vector<8x256xf32>
    %cst_84 = arith.constant dense<0.000000e+00> : vector<256xf32>
    %140 = vector.multi_reduction <add>, %130, %cst_84 [0] : vector<8x256xf32> to vector<256xf32>
    %141 = vector.shape_cast %140 : vector<256xf32> to vector<1x256xf32>
    %142 = arith.subf %95, %141 : vector<1x256xf32>
    %c4 = arith.constant 4 : index
    %c0_85 = arith.constant 0 : index
    %c0_86 = arith.constant 0 : index
    %143 = vector.load %arg2[%c4, %c0_85, %c0_86] : memref<8x8x1xf32, #tpu.memory_space<vmem>>, vector<1x8x1xf32>
    %144 = vector.shape_cast %143 : vector<1x8x1xf32> to vector<8x1xf32>
    %cst_87 = arith.constant 0.000000e+00 : f32
    %145 = vector.broadcast %cst_87 : f32 to vector<8x1xf32>
    %146 = arith.cmpf ogt, %144, %145 : vector<8x1xf32>
    %147 = vector.broadcast %144 : vector<8x1xf32> to vector<8x256xf32>
    %148 = arith.mulf %147, %139 : vector<8x256xf32>
    %c4_88 = arith.constant 4 : index
    %c0_89 = arith.constant 0 : index
    %c0_90 = arith.constant 0 : index
    %149 = vector.load %arg3[%c4_88, %c0_89, %c0_90] : memref<8x64x8xf32, #tpu.memory_space<vmem>>, vector<1x64x8xf32>
    %150 = vector.shape_cast %149 : vector<1x64x8xf32> to vector<64x8xf32>
    %cst_91 = arith.constant dense<0.000000e+00> : vector<64x256xf32>
    %151 = tpu.matmul %150, %148, %cst_91 {dimension_numbers = #tpu.dot_dimension_numbers<[1], [0], [0], [1], [0, 0, 1, 1], [], []>} : vector<64x8xf32>, vector<8x256xf32>, vector<64x256xf32> -> vector<64x256xf32>
    %c4_92 = arith.constant 4 : index
    %c0_93 = arith.constant 0 : index
    %c0_94 = arith.constant 0 : index
    %152 = vector.load %arg4[%c4_92, %c0_93, %c0_94] : memref<8x64x1xf32, #tpu.memory_space<vmem>>, vector<1x64x1xf32>
    %153 = vector.shape_cast %152 : vector<1x64x1xf32> to vector<64x1xf32>
    %154 = vector.broadcast %153 : vector<64x1xf32> to vector<64x256xf32>
    %155 = arith.addf %151, %154 : vector<64x256xf32>
    %cst_95 = arith.constant 0.00999999977 : f32
    %156 = vector.broadcast %cst_95 : f32 to vector<64x256xf32>
    %157 = arith.mulf %156, %155 : vector<64x256xf32>
    %158 = arith.maximumf %155, %157 : vector<64x256xf32>
    %c4_96 = arith.constant 4 : index
    %c0_97 = arith.constant 0 : index
    %c0_98 = arith.constant 0 : index
    %159 = vector.load %arg5[%c4_96, %c0_97, %c0_98] : memref<8x64x64xf32, #tpu.memory_space<vmem>>, vector<1x64x64xf32>
    %160 = vector.shape_cast %159 : vector<1x64x64xf32> to vector<64x64xf32>
    %cst_99 = arith.constant dense<0.000000e+00> : vector<64x256xf32>
    %161 = tpu.matmul %160, %158, %cst_99 {dimension_numbers = #tpu.dot_dimension_numbers<[1], [0], [0], [1], [0, 0, 1, 1], [], []>} : vector<64x64xf32>, vector<64x256xf32>, vector<64x256xf32> -> vector<64x256xf32>
    %c4_100 = arith.constant 4 : index
    %c0_101 = arith.constant 0 : index
    %c0_102 = arith.constant 0 : index
    %162 = vector.load %arg6[%c4_100, %c0_101, %c0_102] : memref<8x64x1xf32, #tpu.memory_space<vmem>>, vector<1x64x1xf32>
    %163 = vector.shape_cast %162 : vector<1x64x1xf32> to vector<64x1xf32>
    %164 = vector.broadcast %163 : vector<64x1xf32> to vector<64x256xf32>
    %165 = arith.addf %161, %164 : vector<64x256xf32>
    %cst_103 = arith.constant 0.00999999977 : f32
    %166 = vector.broadcast %cst_103 : f32 to vector<64x256xf32>
    %167 = arith.mulf %166, %165 : vector<64x256xf32>
    %168 = arith.maximumf %165, %167 : vector<64x256xf32>
    %c4_104 = arith.constant 4 : index
    %c0_105 = arith.constant 0 : index
    %c0_106 = arith.constant 0 : index
    %169 = vector.load %arg7[%c4_104, %c0_105, %c0_106] : memref<8x16x64xf32, #tpu.memory_space<vmem>>, vector<1x16x64xf32>
    %170 = vector.shape_cast %169 : vector<1x16x64xf32> to vector<16x64xf32>
    %cst_107 = arith.constant dense<0.000000e+00> : vector<16x256xf32>
    %171 = tpu.matmul %170, %168, %cst_107 {dimension_numbers = #tpu.dot_dimension_numbers<[1], [0], [0], [1], [0, 0, 1, 1], [], []>} : vector<16x64xf32>, vector<64x256xf32>, vector<16x256xf32> -> vector<16x256xf32>
    %c4_108 = arith.constant 4 : index
    %c0_109 = arith.constant 0 : index
    %c0_110 = arith.constant 0 : index
    %172 = vector.load %arg8[%c4_108, %c0_109, %c0_110] : memref<8x16x1xf32, #tpu.memory_space<vmem>>, vector<1x16x1xf32>
    %173 = vector.shape_cast %172 : vector<1x16x1xf32> to vector<16x1xf32>
    %174 = vector.broadcast %173 : vector<16x1xf32> to vector<16x256xf32>
    %175 = arith.addf %171, %174 : vector<16x256xf32>
    %176 = vector.extract_strided_slice %175 {offsets = [0, 0], sizes = [8, 256], strides = [1, 1]} : vector<16x256xf32> to vector<8x256xf32>
    %177 = math.tanh %176 : vector<8x256xf32>
    %178 = vector.extract_strided_slice %175 {offsets = [8, 0], sizes = [8, 256], strides = [1, 1]} : vector<16x256xf32> to vector<8x256xf32>
    %179 = arith.subf %139, %178 : vector<8x256xf32>
    %cst_111 = arith.constant 0.000000e+00 : f32
    %180 = vector.broadcast %cst_111 : f32 to vector<8x256xf32>
    %181 = arith.subf %180, %177 : vector<8x256xf32>
    %182 = math.exp %181 : vector<8x256xf32>
    %183 = arith.mulf %179, %182 : vector<8x256xf32>
    %184 = vector.shape_cast %146 : vector<8x1xi1> to vector<8x1xi1>
    %185 = vector.broadcast %184 : vector<8x1xi1> to vector<8x256xi1>
    %186 = arith.select %185, %139, %183 : vector<8x256xi1>, vector<8x256xf32>
    %cst_112 = arith.constant dense<0.000000e+00> : vector<256xf32>
    %187 = vector.multi_reduction <add>, %177, %cst_112 [0] : vector<8x256xf32> to vector<256xf32>
    %188 = vector.shape_cast %187 : vector<256xf32> to vector<1x256xf32>
    %189 = arith.subf %142, %188 : vector<1x256xf32>
    %c3 = arith.constant 3 : index
    %c0_113 = arith.constant 0 : index
    %c0_114 = arith.constant 0 : index
    %190 = vector.load %arg2[%c3, %c0_113, %c0_114] : memref<8x8x1xf32, #tpu.memory_space<vmem>>, vector<1x8x1xf32>
    %191 = vector.shape_cast %190 : vector<1x8x1xf32> to vector<8x1xf32>
    %cst_115 = arith.constant 0.000000e+00 : f32
    %192 = vector.broadcast %cst_115 : f32 to vector<8x1xf32>
    %193 = arith.cmpf ogt, %191, %192 : vector<8x1xf32>
    %194 = vector.broadcast %191 : vector<8x1xf32> to vector<8x256xf32>
    %195 = arith.mulf %194, %186 : vector<8x256xf32>
    %c3_116 = arith.constant 3 : index
    %c0_117 = arith.constant 0 : index
    %c0_118 = arith.constant 0 : index
    %196 = vector.load %arg3[%c3_116, %c0_117, %c0_118] : memref<8x64x8xf32, #tpu.memory_space<vmem>>, vector<1x64x8xf32>
    %197 = vector.shape_cast %196 : vector<1x64x8xf32> to vector<64x8xf32>
    %cst_119 = arith.constant dense<0.000000e+00> : vector<64x256xf32>
    %198 = tpu.matmul %197, %195, %cst_119 {dimension_numbers = #tpu.dot_dimension_numbers<[1], [0], [0], [1], [0, 0, 1, 1], [], []>} : vector<64x8xf32>, vector<8x256xf32>, vector<64x256xf32> -> vector<64x256xf32>
    %c3_120 = arith.constant 3 : index
    %c0_121 = arith.constant 0 : index
    %c0_122 = arith.constant 0 : index
    %199 = vector.load %arg4[%c3_120, %c0_121, %c0_122] : memref<8x64x1xf32, #tpu.memory_space<vmem>>, vector<1x64x1xf32>
    %200 = vector.shape_cast %199 : vector<1x64x1xf32> to vector<64x1xf32>
    %201 = vector.broadcast %200 : vector<64x1xf32> to vector<64x256xf32>
    %202 = arith.addf %198, %201 : vector<64x256xf32>
    %cst_123 = arith.constant 0.00999999977 : f32
    %203 = vector.broadcast %cst_123 : f32 to vector<64x256xf32>
    %204 = arith.mulf %203, %202 : vector<64x256xf32>
    %205 = arith.maximumf %202, %204 : vector<64x256xf32>
    %c3_124 = arith.constant 3 : index
    %c0_125 = arith.constant 0 : index
    %c0_126 = arith.constant 0 : index
    %206 = vector.load %arg5[%c3_124, %c0_125, %c0_126] : memref<8x64x64xf32, #tpu.memory_space<vmem>>, vector<1x64x64xf32>
    %207 = vector.shape_cast %206 : vector<1x64x64xf32> to vector<64x64xf32>
    %cst_127 = arith.constant dense<0.000000e+00> : vector<64x256xf32>
    %208 = tpu.matmul %207, %205, %cst_127 {dimension_numbers = #tpu.dot_dimension_numbers<[1], [0], [0], [1], [0, 0, 1, 1], [], []>} : vector<64x64xf32>, vector<64x256xf32>, vector<64x256xf32> -> vector<64x256xf32>
    %c3_128 = arith.constant 3 : index
    %c0_129 = arith.constant 0 : index
    %c0_130 = arith.constant 0 : index
    %209 = vector.load %arg6[%c3_128, %c0_129, %c0_130] : memref<8x64x1xf32, #tpu.memory_space<vmem>>, vector<1x64x1xf32>
    %210 = vector.shape_cast %209 : vector<1x64x1xf32> to vector<64x1xf32>
    %211 = vector.broadcast %210 : vector<64x1xf32> to vector<64x256xf32>
    %212 = arith.addf %208, %211 : vector<64x256xf32>
    %cst_131 = arith.constant 0.00999999977 : f32
    %213 = vector.broadcast %cst_131 : f32 to vector<64x256xf32>
    %214 = arith.mulf %213, %212 : vector<64x256xf32>
    %215 = arith.maximumf %212, %214 : vector<64x256xf32>
    %c3_132 = arith.constant 3 : index
    %c0_133 = arith.constant 0 : index
    %c0_134 = arith.constant 0 : index
    %216 = vector.load %arg7[%c3_132, %c0_133, %c0_134] : memref<8x16x64xf32, #tpu.memory_space<vmem>>, vector<1x16x64xf32>
    %217 = vector.shape_cast %216 : vector<1x16x64xf32> to vector<16x64xf32>
    %cst_135 = arith.constant dense<0.000000e+00> : vector<16x256xf32>
    %218 = tpu.matmul %217, %215, %cst_135 {dimension_numbers = #tpu.dot_dimension_numbers<[1], [0], [0], [1], [0, 0, 1, 1], [], []>} : vector<16x64xf32>, vector<64x256xf32>, vector<16x256xf32> -> vector<16x256xf32>
    %c3_136 = arith.constant 3 : index
    %c0_137 = arith.constant 0 : index
    %c0_138 = arith.constant 0 : index
    %219 = vector.load %arg8[%c3_136, %c0_137, %c0_138] : memref<8x16x1xf32, #tpu.memory_space<vmem>>, vector<1x16x1xf32>
    %220 = vector.shape_cast %219 : vector<1x16x1xf32> to vector<16x1xf32>
    %221 = vector.broadcast %220 : vector<16x1xf32> to vector<16x256xf32>
    %222 = arith.addf %218, %221 : vector<16x256xf32>
    %223 = vector.extract_strided_slice %222 {offsets = [0, 0], sizes = [8, 256], strides = [1, 1]} : vector<16x256xf32> to vector<8x256xf32>
    %224 = math.tanh %223 : vector<8x256xf32>
    %225 = vector.extract_strided_slice %222 {offsets = [8, 0], sizes = [8, 256], strides = [1, 1]} : vector<16x256xf32> to vector<8x256xf32>
    %226 = arith.subf %186, %225 : vector<8x256xf32>
    %cst_139 = arith.constant 0.000000e+00 : f32
    %227 = vector.broadcast %cst_139 : f32 to vector<8x256xf32>
    %228 = arith.subf %227, %224 : vector<8x256xf32>
    %229 = math.exp %228 : vector<8x256xf32>
    %230 = arith.mulf %226, %229 : vector<8x256xf32>
    %231 = vector.shape_cast %193 : vector<8x1xi1> to vector<8x1xi1>
    %232 = vector.broadcast %231 : vector<8x1xi1> to vector<8x256xi1>
    %233 = arith.select %232, %186, %230 : vector<8x256xi1>, vector<8x256xf32>
    %cst_140 = arith.constant dense<0.000000e+00> : vector<256xf32>
    %234 = vector.multi_reduction <add>, %224, %cst_140 [0] : vector<8x256xf32> to vector<256xf32>
    %235 = vector.shape_cast %234 : vector<256xf32> to vector<1x256xf32>
    %236 = arith.subf %189, %235 : vector<1x256xf32>
    %c2 = arith.constant 2 : index
    %c0_141 = arith.constant 0 : index
    %c0_142 = arith.constant 0 : index
    %237 = vector.load %arg2[%c2, %c0_141, %c0_142] : memref<8x8x1xf32, #tpu.memory_space<vmem>>, vector<1x8x1xf32>
    %238 = vector.shape_cast %237 : vector<1x8x1xf32> to vector<8x1xf32>
    %cst_143 = arith.constant 0.000000e+00 : f32
    %239 = vector.broadcast %cst_143 : f32 to vector<8x1xf32>
    %240 = arith.cmpf ogt, %238, %239 : vector<8x1xf32>
    %241 = vector.broadcast %238 : vector<8x1xf32> to vector<8x256xf32>
    %242 = arith.mulf %241, %233 : vector<8x256xf32>
    %c2_144 = arith.constant 2 : index
    %c0_145 = arith.constant 0 : index
    %c0_146 = arith.constant 0 : index
    %243 = vector.load %arg3[%c2_144, %c0_145, %c0_146] : memref<8x64x8xf32, #tpu.memory_space<vmem>>, vector<1x64x8xf32>
    %244 = vector.shape_cast %243 : vector<1x64x8xf32> to vector<64x8xf32>
    %cst_147 = arith.constant dense<0.000000e+00> : vector<64x256xf32>
    %245 = tpu.matmul %244, %242, %cst_147 {dimension_numbers = #tpu.dot_dimension_numbers<[1], [0], [0], [1], [0, 0, 1, 1], [], []>} : vector<64x8xf32>, vector<8x256xf32>, vector<64x256xf32> -> vector<64x256xf32>
    %c2_148 = arith.constant 2 : index
    %c0_149 = arith.constant 0 : index
    %c0_150 = arith.constant 0 : index
    %246 = vector.load %arg4[%c2_148, %c0_149, %c0_150] : memref<8x64x1xf32, #tpu.memory_space<vmem>>, vector<1x64x1xf32>
    %247 = vector.shape_cast %246 : vector<1x64x1xf32> to vector<64x1xf32>
    %248 = vector.broadcast %247 : vector<64x1xf32> to vector<64x256xf32>
    %249 = arith.addf %245, %248 : vector<64x256xf32>
    %cst_151 = arith.constant 0.00999999977 : f32
    %250 = vector.broadcast %cst_151 : f32 to vector<64x256xf32>
    %251 = arith.mulf %250, %249 : vector<64x256xf32>
    %252 = arith.maximumf %249, %251 : vector<64x256xf32>
    %c2_152 = arith.constant 2 : index
    %c0_153 = arith.constant 0 : index
    %c0_154 = arith.constant 0 : index
    %253 = vector.load %arg5[%c2_152, %c0_153, %c0_154] : memref<8x64x64xf32, #tpu.memory_space<vmem>>, vector<1x64x64xf32>
    %254 = vector.shape_cast %253 : vector<1x64x64xf32> to vector<64x64xf32>
    %cst_155 = arith.constant dense<0.000000e+00> : vector<64x256xf32>
    %255 = tpu.matmul %254, %252, %cst_155 {dimension_numbers = #tpu.dot_dimension_numbers<[1], [0], [0], [1], [0, 0, 1, 1], [], []>} : vector<64x64xf32>, vector<64x256xf32>, vector<64x256xf32> -> vector<64x256xf32>
    %c2_156 = arith.constant 2 : index
    %c0_157 = arith.constant 0 : index
    %c0_158 = arith.constant 0 : index
    %256 = vector.load %arg6[%c2_156, %c0_157, %c0_158] : memref<8x64x1xf32, #tpu.memory_space<vmem>>, vector<1x64x1xf32>
    %257 = vector.shape_cast %256 : vector<1x64x1xf32> to vector<64x1xf32>
    %258 = vector.broadcast %257 : vector<64x1xf32> to vector<64x256xf32>
    %259 = arith.addf %255, %258 : vector<64x256xf32>
    %cst_159 = arith.constant 0.00999999977 : f32
    %260 = vector.broadcast %cst_159 : f32 to vector<64x256xf32>
    %261 = arith.mulf %260, %259 : vector<64x256xf32>
    %262 = arith.maximumf %259, %261 : vector<64x256xf32>
    %c2_160 = arith.constant 2 : index
    %c0_161 = arith.constant 0 : index
    %c0_162 = arith.constant 0 : index
    %263 = vector.load %arg7[%c2_160, %c0_161, %c0_162] : memref<8x16x64xf32, #tpu.memory_space<vmem>>, vector<1x16x64xf32>
    %264 = vector.shape_cast %263 : vector<1x16x64xf32> to vector<16x64xf32>
    %cst_163 = arith.constant dense<0.000000e+00> : vector<16x256xf32>
    %265 = tpu.matmul %264, %262, %cst_163 {dimension_numbers = #tpu.dot_dimension_numbers<[1], [0], [0], [1], [0, 0, 1, 1], [], []>} : vector<16x64xf32>, vector<64x256xf32>, vector<16x256xf32> -> vector<16x256xf32>
    %c2_164 = arith.constant 2 : index
    %c0_165 = arith.constant 0 : index
    %c0_166 = arith.constant 0 : index
    %266 = vector.load %arg8[%c2_164, %c0_165, %c0_166] : memref<8x16x1xf32, #tpu.memory_space<vmem>>, vector<1x16x1xf32>
    %267 = vector.shape_cast %266 : vector<1x16x1xf32> to vector<16x1xf32>
    %268 = vector.broadcast %267 : vector<16x1xf32> to vector<16x256xf32>
    %269 = arith.addf %265, %268 : vector<16x256xf32>
    %270 = vector.extract_strided_slice %269 {offsets = [0, 0], sizes = [8, 256], strides = [1, 1]} : vector<16x256xf32> to vector<8x256xf32>
    %271 = math.tanh %270 : vector<8x256xf32>
    %272 = vector.extract_strided_slice %269 {offsets = [8, 0], sizes = [8, 256], strides = [1, 1]} : vector<16x256xf32> to vector<8x256xf32>
    %273 = arith.subf %233, %272 : vector<8x256xf32>
    %cst_167 = arith.constant 0.000000e+00 : f32
    %274 = vector.broadcast %cst_167 : f32 to vector<8x256xf32>
    %275 = arith.subf %274, %271 : vector<8x256xf32>
    %276 = math.exp %275 : vector<8x256xf32>
    %277 = arith.mulf %273, %276 : vector<8x256xf32>
    %278 = vector.shape_cast %240 : vector<8x1xi1> to vector<8x1xi1>
    %279 = vector.broadcast %278 : vector<8x1xi1> to vector<8x256xi1>
    %280 = arith.select %279, %233, %277 : vector<8x256xi1>, vector<8x256xf32>
    %cst_168 = arith.constant dense<0.000000e+00> : vector<256xf32>
    %281 = vector.multi_reduction <add>, %271, %cst_168 [0] : vector<8x256xf32> to vector<256xf32>
    %282 = vector.shape_cast %281 : vector<256xf32> to vector<1x256xf32>
    %283 = arith.subf %236, %282 : vector<1x256xf32>
    %c1 = arith.constant 1 : index
    %c0_169 = arith.constant 0 : index
    %c0_170 = arith.constant 0 : index
    %284 = vector.load %arg2[%c1, %c0_169, %c0_170] : memref<8x8x1xf32, #tpu.memory_space<vmem>>, vector<1x8x1xf32>
    %285 = vector.shape_cast %284 : vector<1x8x1xf32> to vector<8x1xf32>
    %cst_171 = arith.constant 0.000000e+00 : f32
    %286 = vector.broadcast %cst_171 : f32 to vector<8x1xf32>
    %287 = arith.cmpf ogt, %285, %286 : vector<8x1xf32>
    %288 = vector.broadcast %285 : vector<8x1xf32> to vector<8x256xf32>
    %289 = arith.mulf %288, %280 : vector<8x256xf32>
    %c1_172 = arith.constant 1 : index
    %c0_173 = arith.constant 0 : index
    %c0_174 = arith.constant 0 : index
    %290 = vector.load %arg3[%c1_172, %c0_173, %c0_174] : memref<8x64x8xf32, #tpu.memory_space<vmem>>, vector<1x64x8xf32>
    %291 = vector.shape_cast %290 : vector<1x64x8xf32> to vector<64x8xf32>
    %cst_175 = arith.constant dense<0.000000e+00> : vector<64x256xf32>
    %292 = tpu.matmul %291, %289, %cst_175 {dimension_numbers = #tpu.dot_dimension_numbers<[1], [0], [0], [1], [0, 0, 1, 1], [], []>} : vector<64x8xf32>, vector<8x256xf32>, vector<64x256xf32> -> vector<64x256xf32>
    %c1_176 = arith.constant 1 : index
    %c0_177 = arith.constant 0 : index
    %c0_178 = arith.constant 0 : index
    %293 = vector.load %arg4[%c1_176, %c0_177, %c0_178] : memref<8x64x1xf32, #tpu.memory_space<vmem>>, vector<1x64x1xf32>
    %294 = vector.shape_cast %293 : vector<1x64x1xf32> to vector<64x1xf32>
    %295 = vector.broadcast %294 : vector<64x1xf32> to vector<64x256xf32>
    %296 = arith.addf %292, %295 : vector<64x256xf32>
    %cst_179 = arith.constant 0.00999999977 : f32
    %297 = vector.broadcast %cst_179 : f32 to vector<64x256xf32>
    %298 = arith.mulf %297, %296 : vector<64x256xf32>
    %299 = arith.maximumf %296, %298 : vector<64x256xf32>
    %c1_180 = arith.constant 1 : index
    %c0_181 = arith.constant 0 : index
    %c0_182 = arith.constant 0 : index
    %300 = vector.load %arg5[%c1_180, %c0_181, %c0_182] : memref<8x64x64xf32, #tpu.memory_space<vmem>>, vector<1x64x64xf32>
    %301 = vector.shape_cast %300 : vector<1x64x64xf32> to vector<64x64xf32>
    %cst_183 = arith.constant dense<0.000000e+00> : vector<64x256xf32>
    %302 = tpu.matmul %301, %299, %cst_183 {dimension_numbers = #tpu.dot_dimension_numbers<[1], [0], [0], [1], [0, 0, 1, 1], [], []>} : vector<64x64xf32>, vector<64x256xf32>, vector<64x256xf32> -> vector<64x256xf32>
    %c1_184 = arith.constant 1 : index
    %c0_185 = arith.constant 0 : index
    %c0_186 = arith.constant 0 : index
    %303 = vector.load %arg6[%c1_184, %c0_185, %c0_186] : memref<8x64x1xf32, #tpu.memory_space<vmem>>, vector<1x64x1xf32>
    %304 = vector.shape_cast %303 : vector<1x64x1xf32> to vector<64x1xf32>
    %305 = vector.broadcast %304 : vector<64x1xf32> to vector<64x256xf32>
    %306 = arith.addf %302, %305 : vector<64x256xf32>
    %cst_187 = arith.constant 0.00999999977 : f32
    %307 = vector.broadcast %cst_187 : f32 to vector<64x256xf32>
    %308 = arith.mulf %307, %306 : vector<64x256xf32>
    %309 = arith.maximumf %306, %308 : vector<64x256xf32>
    %c1_188 = arith.constant 1 : index
    %c0_189 = arith.constant 0 : index
    %c0_190 = arith.constant 0 : index
    %310 = vector.load %arg7[%c1_188, %c0_189, %c0_190] : memref<8x16x64xf32, #tpu.memory_space<vmem>>, vector<1x16x64xf32>
    %311 = vector.shape_cast %310 : vector<1x16x64xf32> to vector<16x64xf32>
    %cst_191 = arith.constant dense<0.000000e+00> : vector<16x256xf32>
    %312 = tpu.matmul %311, %309, %cst_191 {dimension_numbers = #tpu.dot_dimension_numbers<[1], [0], [0], [1], [0, 0, 1, 1], [], []>} : vector<16x64xf32>, vector<64x256xf32>, vector<16x256xf32> -> vector<16x256xf32>
    %c1_192 = arith.constant 1 : index
    %c0_193 = arith.constant 0 : index
    %c0_194 = arith.constant 0 : index
    %313 = vector.load %arg8[%c1_192, %c0_193, %c0_194] : memref<8x16x1xf32, #tpu.memory_space<vmem>>, vector<1x16x1xf32>
    %314 = vector.shape_cast %313 : vector<1x16x1xf32> to vector<16x1xf32>
    %315 = vector.broadcast %314 : vector<16x1xf32> to vector<16x256xf32>
    %316 = arith.addf %312, %315 : vector<16x256xf32>
    %317 = vector.extract_strided_slice %316 {offsets = [0, 0], sizes = [8, 256], strides = [1, 1]} : vector<16x256xf32> to vector<8x256xf32>
    %318 = math.tanh %317 : vector<8x256xf32>
    %319 = vector.extract_strided_slice %316 {offsets = [8, 0], sizes = [8, 256], strides = [1, 1]} : vector<16x256xf32> to vector<8x256xf32>
    %320 = arith.subf %280, %319 : vector<8x256xf32>
    %cst_195 = arith.constant 0.000000e+00 : f32
    %321 = vector.broadcast %cst_195 : f32 to vector<8x256xf32>
    %322 = arith.subf %321, %318 : vector<8x256xf32>
    %323 = math.exp %322 : vector<8x256xf32>
    %324 = arith.mulf %320, %323 : vector<8x256xf32>
    %325 = vector.shape_cast %287 : vector<8x1xi1> to vector<8x1xi1>
    %326 = vector.broadcast %325 : vector<8x1xi1> to vector<8x256xi1>
    %327 = arith.select %326, %280, %324 : vector<8x256xi1>, vector<8x256xf32>
    %cst_196 = arith.constant dense<0.000000e+00> : vector<256xf32>
    %328 = vector.multi_reduction <add>, %318, %cst_196 [0] : vector<8x256xf32> to vector<256xf32>
    %329 = vector.shape_cast %328 : vector<256xf32> to vector<1x256xf32>
    %330 = arith.subf %283, %329 : vector<1x256xf32>
    %c0_197 = arith.constant 0 : index
    %c0_198 = arith.constant 0 : index
    %c0_199 = arith.constant 0 : index
    %331 = vector.load %arg2[%c0_197, %c0_198, %c0_199] : memref<8x8x1xf32, #tpu.memory_space<vmem>>, vector<1x8x1xf32>
    %332 = vector.shape_cast %331 : vector<1x8x1xf32> to vector<8x1xf32>
    %cst_200 = arith.constant 0.000000e+00 : f32
    %333 = vector.broadcast %cst_200 : f32 to vector<8x1xf32>
    %334 = arith.cmpf ogt, %332, %333 : vector<8x1xf32>
    %335 = vector.broadcast %332 : vector<8x1xf32> to vector<8x256xf32>
    %336 = arith.mulf %335, %327 : vector<8x256xf32>
    %c0_201 = arith.constant 0 : index
    %c0_202 = arith.constant 0 : index
    %c0_203 = arith.constant 0 : index
    %337 = vector.load %arg3[%c0_201, %c0_202, %c0_203] : memref<8x64x8xf32, #tpu.memory_space<vmem>>, vector<1x64x8xf32>
    %338 = vector.shape_cast %337 : vector<1x64x8xf32> to vector<64x8xf32>
    %cst_204 = arith.constant dense<0.000000e+00> : vector<64x256xf32>
    %339 = tpu.matmul %338, %336, %cst_204 {dimension_numbers = #tpu.dot_dimension_numbers<[1], [0], [0], [1], [0, 0, 1, 1], [], []>} : vector<64x8xf32>, vector<8x256xf32>, vector<64x256xf32> -> vector<64x256xf32>
    %c0_205 = arith.constant 0 : index
    %c0_206 = arith.constant 0 : index
    %c0_207 = arith.constant 0 : index
    %340 = vector.load %arg4[%c0_205, %c0_206, %c0_207] : memref<8x64x1xf32, #tpu.memory_space<vmem>>, vector<1x64x1xf32>
    %341 = vector.shape_cast %340 : vector<1x64x1xf32> to vector<64x1xf32>
    %342 = vector.broadcast %341 : vector<64x1xf32> to vector<64x256xf32>
    %343 = arith.addf %339, %342 : vector<64x256xf32>
    %cst_208 = arith.constant 0.00999999977 : f32
    %344 = vector.broadcast %cst_208 : f32 to vector<64x256xf32>
    %345 = arith.mulf %344, %343 : vector<64x256xf32>
    %346 = arith.maximumf %343, %345 : vector<64x256xf32>
    %c0_209 = arith.constant 0 : index
    %c0_210 = arith.constant 0 : index
    %c0_211 = arith.constant 0 : index
    %347 = vector.load %arg5[%c0_209, %c0_210, %c0_211] : memref<8x64x64xf32, #tpu.memory_space<vmem>>, vector<1x64x64xf32>
    %348 = vector.shape_cast %347 : vector<1x64x64xf32> to vector<64x64xf32>
    %cst_212 = arith.constant dense<0.000000e+00> : vector<64x256xf32>
    %349 = tpu.matmul %348, %346, %cst_212 {dimension_numbers = #tpu.dot_dimension_numbers<[1], [0], [0], [1], [0, 0, 1, 1], [], []>} : vector<64x64xf32>, vector<64x256xf32>, vector<64x256xf32> -> vector<64x256xf32>
    %c0_213 = arith.constant 0 : index
    %c0_214 = arith.constant 0 : index
    %c0_215 = arith.constant 0 : index
    %350 = vector.load %arg6[%c0_213, %c0_214, %c0_215] : memref<8x64x1xf32, #tpu.memory_space<vmem>>, vector<1x64x1xf32>
    %351 = vector.shape_cast %350 : vector<1x64x1xf32> to vector<64x1xf32>
    %352 = vector.broadcast %351 : vector<64x1xf32> to vector<64x256xf32>
    %353 = arith.addf %349, %352 : vector<64x256xf32>
    %cst_216 = arith.constant 0.00999999977 : f32
    %354 = vector.broadcast %cst_216 : f32 to vector<64x256xf32>
    %355 = arith.mulf %354, %353 : vector<64x256xf32>
    %356 = arith.maximumf %353, %355 : vector<64x256xf32>
    %c0_217 = arith.constant 0 : index
    %c0_218 = arith.constant 0 : index
    %c0_219 = arith.constant 0 : index
    %357 = vector.load %arg7[%c0_217, %c0_218, %c0_219] : memref<8x16x64xf32, #tpu.memory_space<vmem>>, vector<1x16x64xf32>
    %358 = vector.shape_cast %357 : vector<1x16x64xf32> to vector<16x64xf32>
    %cst_220 = arith.constant dense<0.000000e+00> : vector<16x256xf32>
    %359 = tpu.matmul %358, %356, %cst_220 {dimension_numbers = #tpu.dot_dimension_numbers<[1], [0], [0], [1], [0, 0, 1, 1], [], []>} : vector<16x64xf32>, vector<64x256xf32>, vector<16x256xf32> -> vector<16x256xf32>
    %c0_221 = arith.constant 0 : index
    %c0_222 = arith.constant 0 : index
    %c0_223 = arith.constant 0 : index
    %360 = vector.load %arg8[%c0_221, %c0_222, %c0_223] : memref<8x16x1xf32, #tpu.memory_space<vmem>>, vector<1x16x1xf32>
    %361 = vector.shape_cast %360 : vector<1x16x1xf32> to vector<16x1xf32>
    %362 = vector.broadcast %361 : vector<16x1xf32> to vector<16x256xf32>
    %363 = arith.addf %359, %362 : vector<16x256xf32>
    %364 = vector.extract_strided_slice %363 {offsets = [0, 0], sizes = [8, 256], strides = [1, 1]} : vector<16x256xf32> to vector<8x256xf32>
    %365 = math.tanh %364 : vector<8x256xf32>
    %366 = vector.extract_strided_slice %363 {offsets = [8, 0], sizes = [8, 256], strides = [1, 1]} : vector<16x256xf32> to vector<8x256xf32>
    %367 = arith.subf %327, %366 : vector<8x256xf32>
    %cst_224 = arith.constant 0.000000e+00 : f32
    %368 = vector.broadcast %cst_224 : f32 to vector<8x256xf32>
    %369 = arith.subf %368, %365 : vector<8x256xf32>
    %370 = math.exp %369 : vector<8x256xf32>
    %371 = arith.mulf %367, %370 : vector<8x256xf32>
    %372 = vector.shape_cast %334 : vector<8x1xi1> to vector<8x1xi1>
    %373 = vector.broadcast %372 : vector<8x1xi1> to vector<8x256xi1>
    %374 = arith.select %373, %327, %371 : vector<8x256xi1>, vector<8x256xf32>
    %cst_225 = arith.constant dense<0.000000e+00> : vector<256xf32>
    %375 = vector.multi_reduction <add>, %365, %cst_225 [0] : vector<8x256xf32> to vector<256xf32>
    %376 = vector.shape_cast %375 : vector<256xf32> to vector<1x256xf32>
    %377 = arith.subf %330, %376 : vector<1x256xf32>
    %c0_226 = arith.constant 0 : index
    %c0_227 = arith.constant 0 : index
    %378 = vector.load %arg9[%c0_226, %c0_227] : memref<8x256xf32, #tpu.memory_space<vmem>>, vector<8x256xf32>
    tpu.vector_store %arg9[%c0_226, %c0_227], %374 {strides = array<i32>} : memref<8x256xf32, #tpu.memory_space<vmem>>, vector<8x256xf32>,
    %c0_228 = arith.constant 0 : index
    %c0_229 = arith.constant 0 : index
    %379 = vector.load %arg10[%c0_228, %c0_229] : memref<1x256xf32, #tpu.memory_space<vmem>>, vector<1x256xf32>
    tpu.vector_store %arg10[%c0_228, %c0_229], %377 {strides = array<i32>} : memref<1x256xf32, #tpu.memory_space<vmem>>, vector<1x256xf32>,
    return
  }
  func.func @transform_0(%arg0: i32) -> (i32, i32) {
    %c0_i32 = arith.constant 0 : i32
    %c0_i32_0 = arith.constant 0 : i32
    return %c0_i32, %arg0 : i32, i32
  }
  func.func @transform_1(%arg0: i32) -> (i32, i32, i32) {
    %c0_i32 = arith.constant 0 : i32
    %c0_i32_0 = arith.constant 0 : i32
    %c0_i32_1 = arith.constant 0 : i32
    %c0_i32_2 = arith.constant 0 : i32
    return %c0_i32, %c0_i32_0, %c0_i32_1 : i32, i32, i32
  }
  func.func @transform_2(%arg0: i32) -> (i32, i32, i32) {
    %c0_i32 = arith.constant 0 : i32
    %c0_i32_0 = arith.constant 0 : i32
    %c0_i32_1 = arith.constant 0 : i32
    %c0_i32_2 = arith.constant 0 : i32
    return %c0_i32, %c0_i32_0, %c0_i32_1 : i32, i32, i32
  }
  func.func @transform_3(%arg0: i32) -> (i32, i32, i32) {
    %c0_i32 = arith.constant 0 : i32
    %c0_i32_0 = arith.constant 0 : i32
    %c0_i32_1 = arith.constant 0 : i32
    %c0_i32_2 = arith.constant 0 : i32
    return %c0_i32, %c0_i32_0, %c0_i32_1 : i32, i32, i32
  }
  func.func @transform_4(%arg0: i32) -> (i32, i32, i32) {
    %c0_i32 = arith.constant 0 : i32
    %c0_i32_0 = arith.constant 0 : i32
    %c0_i32_1 = arith.constant 0 : i32
    %c0_i32_2 = arith.constant 0 : i32
    return %c0_i32, %c0_i32_0, %c0_i32_1 : i32, i32, i32
  }
  func.func @transform_5(%arg0: i32) -> (i32, i32, i32) {
    %c0_i32 = arith.constant 0 : i32
    %c0_i32_0 = arith.constant 0 : i32
    %c0_i32_1 = arith.constant 0 : i32
    %c0_i32_2 = arith.constant 0 : i32
    return %c0_i32, %c0_i32_0, %c0_i32_1 : i32, i32, i32
  }
  func.func @transform_6(%arg0: i32) -> (i32, i32, i32) {
    %c0_i32 = arith.constant 0 : i32
    %c0_i32_0 = arith.constant 0 : i32
    %c0_i32_1 = arith.constant 0 : i32
    %c0_i32_2 = arith.constant 0 : i32
    return %c0_i32, %c0_i32_0, %c0_i32_1 : i32, i32, i32
  }
  func.func @transform_7(%arg0: i32) -> (i32, i32, i32) {
    %c0_i32 = arith.constant 0 : i32
    %c0_i32_0 = arith.constant 0 : i32
    %c0_i32_1 = arith.constant 0 : i32
    %c0_i32_2 = arith.constant 0 : i32
    return %c0_i32, %c0_i32_0, %c0_i32_1 : i32, i32, i32
  }
  func.func @transform_8(%arg0: i32) -> (i32, i32) {
    %c0_i32 = arith.constant 0 : i32
    %c0_i32_0 = arith.constant 0 : i32
    return %c0_i32, %arg0 : i32, i32
  }
  func.func @transform_9(%arg0: i32) -> (i32, i32) {
    %c0_i32 = arith.constant 0 : i32
    %c0_i32_0 = arith.constant 0 : i32
    return %c0_i32, %arg0 : i32, i32
  }
}

</mosaic_0001>

<bundles_post_ra>
// kernel: squeeze.1
= control target key start
LH: loop header
LB: loop body
LE: loop exit
PB: predicated region body
PF: predicated region fallthrough
CT: control target
= control target key end

     0   :  { %s77_s0 = inlined_call_operand.vmem [shape: f32[16], index: 0, kind: input, shape index: {}]   ;;  %s78_s1 = inlined_call_operand.hbm [shape: f32[2,8], index: 1, kind: output, shape index: {}]  }
   0x1   :  { %v6_v0 = vld [vmem:[%s77_s0] sm:$0x1] }
   0x2   :  { %2 = vsyncpa [#allocation1], 0  ;;  %7 = vst [vmem:[#allocation3] sm:$0x1] %v6_v0  ;;  %vm9_vm0 = vcmask 64512   ;;  %s59_s0 = smov 120  }
   0x3   :  { %s60_s8 = smov [#allocation0]  }
   0x4   :  { %s29_s9 = sshll.u32 %s60_s8, 4  ;;  %s30_s9 = int_to_ptr.vmem [resolvable:$true] %s29_s9 }
   0x5   :  { %s37_s10 = scalar_lea.vmem %s30_s9, 32  ;;  %p42_p1 = scmp.lt.s32.totalorder %s30_s9, %s30_s9 }
   0x6   :  { %p38_p0 = scmp.ne.s32.totalorder %s30_s9, %s37_s10  ;;  %p43_p2 = scmp.lt.s32.totalorder %s37_s10, %s37_s10 }
   0x8   :  { %p44_p3 = por %p43_p2, %p42_p1 }
   0x9   :  { %v11_v1 = vld [vmem:[#allocation3] sm:$0x1]  }
   0xa   :  { %v8_v2 = vld [vmem:[#allocation3] sm:$0x1]   ;;  %12 = vrot.lane.b32.xlu0 %v11_v1, %s59_s0  ;;  %p45_p4 = pnand %p44_p3, %p38_p0 }
   0xb   :  { %10 = vst.msk [vmem:[#allocation2] sm:$0x1] %vm9_vm0, %v8_v2  }
  0x7c   :  { %v13_v3 = vpop.permute.xlu0 %12  }
  0x7d   :  { %16 = vst.msk [vmem:[#allocation2 + $0x1] sm:$0x1] %vm9_vm0, %v13_v3  }
  0x84   :  { %v21_v4 = vld [vmem:[#allocation2] sm:$0x3] }
  0x85   :  { %24 = vst [vmem:[#allocation0] sm:$0x3] %v21_v4 }
  0x86   :  { %48 = shalt.err (!%p45_p4)
}
  0x87   :  { %32 = dma.vmem_to_hbm [thread:$0]  %s30_s9, 32, %s78_s1, [#allocation1]  }
  0x88   :  { %57 = dma.done.wait [#allocation1], 32  }
  0x89   :  { %58 = vsyncadd [#allocation1], 4294967264 }
  0x8a   :  { %34 = vsyncpa [#allocation1], 1 }

// kernel: rnvp_forward.1
= control target key start
LH: loop header
LB: loop body
LE: loop exit
PB: predicated region body
PF: predicated region fallthrough
CT: control target
= control target key end

     0   :  { %v7039_v2 = vmov 0   ;;  %v7037_v5 = vmov 0.0   ;;  %vm101_vm3 = vcmask 64512   ;;  %vm329_vm9 = vcmask 523264   ;;  %s7027_s0 = inlined_call_operand.vmem [shape: f32[8,16], index: 0, kind: input, shape index: {}]   ;;  %s7028_s1 = inlined_call_operand.vmem [shape: f32[8,8,1], index: 1, kind: input, shape index: {}]   ;;  %s7029_s2 = inlined_call_operand.vmem [shape: f32[8,64,8], index: 2, kind: input, shape index: {}]   ;;  %s7030_s3 = inlined_call_operand.vmem [shape: f32[8,64,1], index: 3, kind: input, shape index: {}]   ;;  %s7031_s4 = inlined_call_operand.vmem [shape: f32[8,64,64], index: 4, kind: input, shape index: {}]   ;;  %s7032_s5 = inlined_call_operand.vmem [shape: f32[8,64,1], index: 5, kind: input, shape index: {}]   ;;  %s7033_s6 = inlined_call_operand.vmem [shape: f32[8,16,64], index: 6, kind: input, shape index: {}]   ;;  %s7034_s7 = inlined_call_operand.vmem [shape: f32[8,16,1], index: 7, kind: input, shape index: {}]   ;;  %s7035_s8 = inlined_call_operand.vmem [shape: f32[8,16], index: 8, kind: output, shape index: {0}]   ;;  %s7036_s9 = inlined_call_operand.vmem [shape: f32[1,16], index: 9, kind: output, shape index: {1}]  }
   0x1   :  { %v4918_v0 = vld [vmem:[%s7030_s3 + $0x1f0] sm:$0xff]  ;;  %v4903_v1 = vld [vmem:[%s7028_s1 + $0x38] sm:$0xff]  ;;  %5326 = vset.pattern.permute.xlu1 %v7039_v2  ;;  %5325 = vset.pattern.permute.xlu0 %v7039_v2  ;;  %v4917_v3 = vld [vmem:[%s7030_s3 + $0x1e8] sm:$0xff] }
   0x2   :  { %93 = vperm.xlu1 %5326, %v4918_v0   ;;  %38 = vperm.xlu0 %5325, %v4903_v1   ;;  %v4919_v4 = vld [vmem:[%s7030_s3 + $0x1f8] sm:$0xff]  ;;  %v4916_v7 = vld [vmem:[%s7030_s3 + $0x1e0] sm:$0xff]  ;;  %v4913_v8 = vld [vmem:[%s7030_s3 + $0x1c8] sm:$0xff]  ;;  %vm35_vm0 = vcmp.gt.f32.partialorder %v4903_v1, 0.0 }
   0x3   :  { %190 = vmatprep.mubr.f32.mxu0 %v7037_v5  ;;  %418 = vmatprep.mubr.f32.mxu1 %v7037_v5  ;;  %v4915_v6 = vld [vmem:[%s7030_s3 + $0x1d8] sm:$0xff]  ;;  %v4914_v9 = vld [vmem:[%s7030_s3 + $0x1d0] sm:$0xff]  ;;  %v4912_v11 = vld [vmem:[%s7030_s3 + $0x1c0] sm:$0xff]  ;;  %v610_v21 = vsel %vm35_vm0, 1, %v7039_v2 }
   0x4   :  { %v4943_v10 = vld [vmem:[%s7032_s5 + $0x1f8] sm:$0xff]  ;;  %v4941_v12 = vld [vmem:[%s7032_s5 + $0x1e8] sm:$0xff]  ;;  %v4942_v13 = vld [vmem:[%s7032_s5 + $0x1f0] sm:$0xff] }
   0x5   :  { %v4939_v14 = vld [vmem:[%s7032_s5 + $0x1d8] sm:$0xff]  ;;  %v4940_v15 = vld [vmem:[%s7032_s5 + $0x1e0] sm:$0xff]  ;;  %v4937_v16 = vld [vmem:[%s7032_s5 + $0x1c8] sm:$0xff] }
   0x6   :  { %88 = vperm.xlu1 %5326, %v4917_v3   ;;  %98 = vperm.xlu0 %5325, %v4919_v4   ;;  %v4938_v17 = vld [vmem:[%s7032_s5 + $0x1d0] sm:$0xff]  ;;  %v4936_v19 = vld [vmem:[%s7032_s5 + $0x1c0] sm:$0xff]  ;;  %v4955_v20 = vld [vmem:[%s7034_s7 + $0x78] sm:$0xff] }
   0x7   :  { %v4954_v18 = vld [vmem:[%s7034_s7 + $0x70] sm:$0xff]  ;;  %v4974_v23 = vld [vmem:[%s7030_s3 + $0x1b8] sm:$0xff]  ;;  %v4972_v25 = vld [vmem:[%s7030_s3 + $0x1a8] sm:$0xff] }
   0x8   :  { %v4958_v22 = vld [vmem:[%s7028_s1 + $0x30] sm:$0xff]  ;;  %v4971_v26 = vld [vmem:[%s7030_s3 + $0x1a0] sm:$0xff]  ;;  %v4970_v27 = vld [vmem:[%s7030_s3 + $0x198] sm:$0xff] }
   0x9   :  { %v4973_v24 = vld [vmem:[%s7030_s3 + $0x1b0] sm:$0xff]  ;;  %v4968_v29 = vld [vmem:[%s7030_s3 + $0x188] sm:$0xff]  ;;  %v4967_v30 = vld [vmem:[%s7030_s3 + $0x180] sm:$0xff]  ;;  %vm633_vm1 = vcmp.gt.f32.partialorder %v4958_v22, 0.0 }
   0xa   :  { %78 = vperm.xlu1 %5326, %v4915_v6   ;;  %83 = vperm.xlu0 %5325, %v4916_v7   ;;  %v4969_v28 = vld [vmem:[%s7030_s3 + $0x190] sm:$0xff]  ;;  %v4998_v31 = vld [vmem:[%s7032_s5 + $0x1b8] sm:$0xff]  ;;  %v4996_v33 = vld [vmem:[%s7032_s5 + $0x1a8] sm:$0xff]  ;;  %v1206_v41 = vsel %vm633_vm1, 1, %v7039_v2 }
   0xb   :  { %v4997_v32 = vld [vmem:[%s7032_s5 + $0x1b0] sm:$0xff]  ;;  %v4995_v34 = vld [vmem:[%s7032_s5 + $0x1a0] sm:$0xff]  ;;  %v4994_v35 = vld [vmem:[%s7032_s5 + $0x198] sm:$0xff] }
   0xc   :  { %v4993_v36 = vld [vmem:[%s7032_s5 + $0x190] sm:$0xff]  ;;  %v4992_v37 = vld [vmem:[%s7032_s5 + $0x188] sm:$0xff]  ;;  %v4991_v38 = vld [vmem:[%s7032_s5 + $0x180] sm:$0xff] }
   0xd   :  { %v5009_v39 = vld [vmem:[%s7034_s7 + $0x60] sm:$0xff]  ;;  %v5010_v40 = vld [vmem:[%s7034_s7 + $0x68] sm:$0xff]  ;;  %v5029_v43 = vld [vmem:[%s7030_s3 + $0x178] sm:$0xff] }
   0xe   :  { %68 = vperm.xlu1 %5326, %v4913_v8   ;;  %73 = vperm.xlu0 %5325, %v4914_v9   ;;  %v5013_v42 = vld [vmem:[%s7028_s1 + $0x28] sm:$0xff]  ;;  %v5028_v44 = vld [vmem:[%s7030_s3 + $0x170] sm:$0xff]  ;;  %v5026_v46 = vld [vmem:[%s7030_s3 + $0x160] sm:$0xff] }
   0xf   :  { %v5027_v45 = vld [vmem:[%s7030_s3 + $0x168] sm:$0xff]  ;;  %v5025_v47 = vld [vmem:[%s7030_s3 + $0x158] sm:$0xff]  ;;  %v5024_v48 = vld [vmem:[%s7030_s3 + $0x150] sm:$0xff]  ;;  %vm1229_vm2 = vcmp.gt.f32.partialorder %v5013_v42, 0.0 }
  0x10   :  { %v5023_v49 = vld [vmem:[%s7030_s3 + $0x148] sm:$0xff]  ;;  %v5022_v50 = vld [vmem:[%s7030_s3 + $0x140] sm:$0xff]  ;;  %v5053_v51 = vld [vmem:[%s7032_s5 + $0x178] sm:$0xff]  ;;  %v1802_v61 = vsel %vm1229_vm2, 1, %v7039_v2 }
  0x11   :  { %v5052_v52 = vld [vmem:[%s7032_s5 + $0x170] sm:$0xff]  ;;  %v5051_v53 = vld [vmem:[%s7032_s5 + $0x168] sm:$0xff]  ;;  %v5050_v54 = vld [vmem:[%s7032_s5 + $0x160] sm:$0xff] }
  0x12   :  { %326 = vperm.xlu1 %5326, %v4943_v10   ;;  %63 = vperm.xlu0 %5325, %v4912_v11   ;;  %v5049_v55 = vld [vmem:[%s7032_s5 + $0x158] sm:$0xff]  ;;  %v5048_v56 = vld [vmem:[%s7032_s5 + $0x150] sm:$0xff]  ;;  %v5047_v57 = vld [vmem:[%s7032_s5 + $0x148] sm:$0xff] }
  0x13   :  { %v5046_v58 = vld [vmem:[%s7032_s5 + $0x140] sm:$0xff]  ;;  %v5064_v59 = vld [vmem:[%s7034_s7 + $0x50] sm:$0xff]  ;;  %v5065_v60 = vld [vmem:[%s7034_s7 + $0x58] sm:$0xff] }
  0x14   :  { %v5623_v62 = vld [vmem:[%s7028_s1 + $0x20] sm:$0xff]  ;;  %v5084_v63 = vld [vmem:[%s7030_s3 + $0x138] sm:$0xff]  ;;  %v5083_v0 = vld [vmem:[%s7030_s3 + $0x130] sm:$0xff] }
  0x15   :  { %v5082_v1 = vld [vmem:[%s7030_s3 + $0x128] sm:$0xff]  ;;  %v5643_v4 = vld [vmem:[%s7027_s0] sm:$0xff]  ;;  %v5080_v10 = vld [vmem:[%s7030_s3 + $0x118] sm:$0xff]  ;;  %vm1825_vm4 = vcmp.gt.f32.partialorder %v5623_v62, 0.0 }
  0x16   :  { %316 = vperm.xlu1 %5326, %v4941_v12   ;;  %321 = vperm.xlu0 %5325, %v4942_v13   ;;  %v5638_v3 = vld [vmem:[%s7027_s0 + $0x8] sm:$0xff]  ;;  %v5081_v9 = vld [vmem:[%s7030_s3 + $0x120] sm:$0xff]  ;;  %v5079_v12 = vld [vmem:[%s7030_s3 + $0x110] sm:$0xff] }
  0x17   :  { %v4904_v11 = vld [vmem:[%s7029_s2 + $0x1c0] sm:$0xff]  ;;  %v5078_v13 = vld [vmem:[%s7030_s3 + $0x108] sm:$0xff] }
  0x1a   :  { %306 = vperm.xlu1 %5326, %v4939_v14   ;;  %311 = vperm.xlu0 %5325, %v4940_v15   ;;  %v4905_v14 = vld [vmem:[%s7029_s2 + $0x1c8] sm:$0xff]  ;;  %v5077_v15 = vld [vmem:[%s7030_s3 + $0x100] sm:$0xff] }
  0x1e   :  { %296 = vperm.xlu1 %5326, %v4937_v16   ;;  %301 = vperm.xlu0 %5325, %v4938_v17   ;;  %v5108_v16 = vld [vmem:[%s7032_s5 + $0x138] sm:$0xff]  ;;  %v4906_v17 = vld [vmem:[%s7029_s2 + $0x1d0] sm:$0xff] }
  0x22   :  { %507 = vperm.xlu1 %5326, %v4954_v18   ;;  %291 = vperm.xlu0 %5325, %v4936_v19   ;;  %v5107_v19 = vld [vmem:[%s7032_s5 + $0x130] sm:$0xff] }
  0x26   :  { %512 = vperm.xlu0 %5325, %v4955_v20   ;;  %612 = vperm.xlu1 %5326, %v610_v21   ;;  %v5106_v20 = vld [vmem:[%s7032_s5 + $0x128] sm:$0xff]  ;;  %v4907_v21 = vld [vmem:[%s7029_s2 + $0x1d8] sm:$0xff] }
  0x2a   :  { %636 = vperm.xlu0 %5325, %v4958_v22   ;;  %696 = vperm.xlu1 %5326, %v4974_v23   ;;  %v5105_v22 = vld [vmem:[%s7032_s5 + $0x120] sm:$0xff]  ;;  %v5104_v23 = vld [vmem:[%s7032_s5 + $0x118] sm:$0xff] }
  0x2e   :  { %691 = vperm.xlu0 %5325, %v4973_v24   ;;  %686 = vperm.xlu1 %5326, %v4972_v25  }
  0x32   :  { %681 = vperm.xlu0 %5325, %v4971_v26   ;;  %676 = vperm.xlu1 %5326, %v4970_v27   ;;  %v4908_v26 = vld [vmem:[%s7029_s2 + $0x1e0] sm:$0xff]  ;;  %v5103_v27 = vld [vmem:[%s7032_s5 + $0x110] sm:$0xff] }
  0x36   :  { %671 = vperm.xlu0 %5325, %v4969_v28   ;;  %666 = vperm.xlu1 %5326, %v4968_v29   ;;  %v5102_v28 = vld [vmem:[%s7032_s5 + $0x108] sm:$0xff] }
  0x37   :  { %v4909_v29 = vld [vmem:[%s7029_s2 + $0x1e8] sm:$0xff] }
  0x3a   :  { %661 = vperm.xlu0 %5325, %v4967_v30   ;;  %923 = vperm.xlu1 %5326, %v4998_v31  }
  0x3e   :  { %918 = vperm.xlu0 %5325, %v4997_v32   ;;  %913 = vperm.xlu1 %5326, %v4996_v33   ;;  %v5101_v32 = vld [vmem:[%s7032_s5 + $0x100] sm:$0xff] }
  0x3f   :  { %v5119_v33 = vld [vmem:[%s7034_s7 + $0x40] sm:$0xff] }
  0x42   :  { %908 = vperm.xlu0 %5325, %v4995_v34   ;;  %903 = vperm.xlu1 %5326, %v4994_v35   ;;  %v4910_v34 = vld [vmem:[%s7029_s2 + $0x1f0] sm:$0xff]  ;;  %v5120_v35 = vld [vmem:[%s7034_s7 + $0x48] sm:$0xff] }
  0x46   :  { %898 = vperm.xlu0 %5325, %v4993_v36   ;;  %893 = vperm.xlu1 %5326, %v4992_v37   ;;  %v2398_v36 = vsel %vm1825_vm4, 1, %v7039_v2 }
  0x4a   :  { %888 = vperm.xlu0 %5325, %v4991_v38   ;;  %1103 = vperm.xlu1 %5326, %v5009_v39   ;;  %v4911_v39 = vld [vmem:[%s7029_s2 + $0x1f8] sm:$0xff] }
  0x4e   :  { %1108 = vperm.xlu0 %5325, %v5010_v40   ;;  %1208 = vperm.xlu1 %5326, %v1206_v41   ;;  %v5123_v40 = vld [vmem:[%s7028_s1 + $0x18] sm:$0xff] }
  0x4f   :  { %v5139_v41 = vld [vmem:[%s7030_s3 + $0xf8] sm:$0xff]  ;;  %vm2421_vm5 = vcmp.gt.f32.partialorder %v5123_v40, 0.0 }
  0x52   :  { %1232 = vperm.xlu0 %5325, %v5013_v42   ;;  %1292 = vperm.xlu1 %5326, %v5029_v43  }
  0x56   :  { %1287 = vperm.xlu0 %5325, %v5028_v44   ;;  %1282 = vperm.xlu1 %5326, %v5027_v45   ;;  %v5138_v44 = vld [vmem:[%s7030_s3 + $0xf0] sm:$0xff]  ;;  %v5137_v45 = vld [vmem:[%s7030_s3 + $0xe8] sm:$0xff] }
  0x5a   :  { %1277 = vperm.xlu0 %5325, %v5026_v46   ;;  %1272 = vperm.xlu1 %5326, %v5025_v47   ;;  %v5136_v46 = vld [vmem:[%s7030_s3 + $0xe0] sm:$0xff]  ;;  %v5135_v47 = vld [vmem:[%s7030_s3 + $0xd8] sm:$0xff] }
  0x5e   :  { %1267 = vperm.xlu0 %5325, %v5024_v48   ;;  %1262 = vperm.xlu1 %5326, %v5023_v49  }
  0x62   :  { %1257 = vperm.xlu0 %5325, %v5022_v50   ;;  %1519 = vperm.xlu1 %5326, %v5053_v51   ;;  %v5134_v50 = vld [vmem:[%s7030_s3 + $0xd0] sm:$0xff]  ;;  %v5133_v51 = vld [vmem:[%s7030_s3 + $0xc8] sm:$0xff] }
  0x66   :  { %1514 = vperm.xlu0 %5325, %v5052_v52   ;;  %1509 = vperm.xlu1 %5326, %v5051_v53  }
  0x6a   :  { %1504 = vperm.xlu0 %5325, %v5050_v54   ;;  %1499 = vperm.xlu1 %5326, %v5049_v55   ;;  %v5132_v54 = vld [vmem:[%s7030_s3 + $0xc0] sm:$0xff]  ;;  %v5163_v55 = vld [vmem:[%s7032_s5 + $0xf8] sm:$0xff] }
  0x6e   :  { %1494 = vperm.xlu0 %5325, %v5048_v56   ;;  %1489 = vperm.xlu1 %5326, %v5047_v57   ;;  %v5162_v56 = vld [vmem:[%s7032_s5 + $0xf0] sm:$0xff]  ;;  %v5161_v57 = vld [vmem:[%s7032_s5 + $0xe8] sm:$0xff] }
  0x72   :  { %1484 = vperm.xlu0 %5325, %v5046_v58   ;;  %1699 = vperm.xlu1 %5326, %v5064_v59  }
  0x76   :  { %1704 = vperm.xlu0 %5325, %v5065_v60   ;;  %1804 = vperm.xlu1 %5326, %v1802_v61   ;;  %v5160_v60 = vld [vmem:[%s7032_s5 + $0xe0] sm:$0xff]  ;;  %v5159_v61 = vld [vmem:[%s7032_s5 + $0xd8] sm:$0xff] }
  0x7a   :  { %1828 = vperm.xlu0 %5325, %v5623_v62   ;;  %1888 = vperm.xlu1 %5326, %v5084_v63  }
  0x7d   :  { %v39_v6 = vpop.permute.xlu0 %38  ;;  %v5678_v18 = vpop.permute.xlu1 %93 }
  0x7e   :  { %1883 = vperm.xlu0 %5325, %v5083_v0   ;;  %1878 = vperm.xlu1 %5326, %v5082_v1   ;;  %v42_v7 = vmul.f32 %v39_v6, %v5638_v3  ;;  %v41_v8 = vmul.f32 %v39_v6, %v5643_v4  ;;  %v5158_v0 = vld [vmem:[%s7032_s5 + $0xd0] sm:$0xff]  ;;  %v5157_v1 = vld [vmem:[%s7032_s5 + $0xc8] sm:$0xff]  ;;  %v5156_v6 = vld [vmem:[%s7032_s5 + $0xc0] sm:$0xff] }
  0x80   :  { %156 = vmatprep.subr.mxu0 %v42_v7  ;;  %v5174_v7 = vld [vmem:[%s7034_s7 + $0x30] sm:$0xff] }
  0x81   :  { %157 = vmatpush1.msra.mxu0 %v41_v8  ;;  %v5698_v24 = vpop.permute.xlu1 %88  ;;  %v5700_v25 = vpop.permute.xlu0 %98 }
  0x82   :  { %1873 = vperm.xlu0 %5325, %v5081_v9   ;;  %1868 = vperm.xlu1 %5326, %v5080_v10   ;;  %v5175_v10 = vld [vmem:[%s7034_s7 + $0x38] sm:$0xff] }
  0x83   :  { %4920 = vmatmul.mubr.msk.f32.vlgmr.msra.gmra.mxu0 %vm101_vm3, %v4904_v11  ;;  %v2994_v11 = vsel %vm2421_vm5, 1, %v7039_v2 }
  0x84   :  { %196 = vmatprep.mubr.f32.mxu0 %v7037_v5 }
  0x85   :  { %v5717_v30 = vpop.permute.xlu1 %78  ;;  %v5719_v31 = vpop.permute.xlu0 %83 }
  0x86   :  { %1863 = vperm.xlu0 %5325, %v5079_v12   ;;  %1858 = vperm.xlu1 %5326, %v5078_v13  }
  0x87   :  { %4921 = vmatmul.mubr.msk.f32.gmra.mxu0 %vm101_vm3, %v4905_v14  ;;  %v5178_v14 = vld [vmem:[%s7028_s1 + $0x10] sm:$0xff] }
  0x88   :  { %202 = vmatprep.mubr.f32.mxu0 %v7037_v5  ;;  %vm3017_vm6 = vcmp.gt.f32.partialorder %v5178_v14, 0.0 }
  0x89   :  { %v5738_v37 = vpop.permute.xlu1 %68  ;;  %v5740_v38 = vpop.permute.xlu0 %73 }
  0x8a   :  { %1853 = vperm.xlu0 %5325, %v5077_v15   ;;  %2115 = vperm.xlu1 %5326, %v5108_v16   ;;  %v5194_v15 = vld [vmem:[%s7030_s3 + $0xb8] sm:$0xff]  ;;  %v5193_v16 = vld [vmem:[%s7030_s3 + $0xb0] sm:$0xff] }
  0x8b   :  { %4922 = vmatmul.mubr.msk.f32.gmra.mxu0 %vm101_vm3, %v4906_v17  ;;  %v5192_v17 = vld [vmem:[%s7030_s3 + $0xa8] sm:$0xff] }
  0x8c   :  { %208 = vmatprep.mubr.f32.mxu0 %v7037_v5 }
  0x8d   :  { %v5754_v42 = vpop.permute.xlu1 %326  ;;  %v5756_v43 = vpop.permute.xlu0 %63 }
  0x8e   :  { %2110 = vperm.xlu0 %5325, %v5107_v19   ;;  %2105 = vperm.xlu1 %5326, %v5106_v20  }
  0x8f   :  { %4923 = vmatmul.mubr.msk.f32.gmra.mxu0 %vm101_vm3, %v4907_v21  ;;  %v5191_v21 = vld [vmem:[%s7030_s3 + $0xa0] sm:$0xff] }
  0x90   :  { %214 = vmatprep.mubr.f32.mxu0 %v7037_v5 }
  0x91   :  { %v5770_v48 = vpop.permute.xlu1 %316  ;;  %v5772_v49 = vpop.permute.xlu0 %321 }
  0x92   :  { %2100 = vperm.xlu0 %5325, %v5105_v22   ;;  %2095 = vperm.xlu1 %5326, %v5104_v23   ;;  %v5190_v22 = vld [vmem:[%s7030_s3 + $0x98] sm:$0xff] }
  0x93   :  { %4924 = vmatmul.mubr.msk.f32.gmra.mxu0 %vm101_vm3, %v4908_v26 }
  0x94   :  { %220 = vmatprep.mubr.f32.mxu0 %v7037_v5 }
  0x95   :  { %v5780_v52 = vpop.permute.xlu1 %306  ;;  %v5782_v53 = vpop.permute.xlu0 %311 }
  0x96   :  { %2090 = vperm.xlu0 %5325, %v5103_v27   ;;  %2085 = vperm.xlu1 %5326, %v5102_v28   ;;  %v5189_v27 = vld [vmem:[%s7030_s3 + $0x90] sm:$0xff]  ;;  %v5188_v28 = vld [vmem:[%s7030_s3 + $0x88] sm:$0xff] }
  0x97   :  { %4925 = vmatmul.mubr.msk.f32.gmra.mxu0 %vm101_vm3, %v4909_v29  ;;  %v5187_v29 = vld [vmem:[%s7030_s3 + $0x80] sm:$0xff] }
  0x98   :  { %226 = vmatprep.mubr.f32.mxu0 %v7037_v5 }
  0x99   :  { %v5796_v58 = vpop.permute.xlu1 %296  ;;  %v5798_v59 = vpop.permute.xlu0 %301 }
  0x9a   :  { %2080 = vperm.xlu0 %5325, %v5101_v32   ;;  %2295 = vperm.xlu1 %5326, %v5119_v33   ;;  %v5218_v32 = vld [vmem:[%s7032_s5 + $0xb8] sm:$0xff] }
  0x9b   :  { %4926 = vmatmul.mubr.msk.f32.gmra.mxu0 %vm101_vm3, %v4910_v34 }
  0x9c   :  { %232 = vmatprep.mubr.f32.mxu0 %v7037_v5 }
  0x9d   :  { %v5806_v62 = vpop.permute.xlu1 %507  ;;  %v5808_v63 = vpop.permute.xlu0 %291 }
  0x9e   :  { %2300 = vperm.xlu0 %5325, %v5120_v35   ;;  %2400 = vperm.xlu1 %5326, %v2398_v36   ;;  %v5217_v35 = vld [vmem:[%s7032_s5 + $0xb0] sm:$0xff]  ;;  %v5216_v36 = vld [vmem:[%s7032_s5 + $0xa8] sm:$0xff] }
  0x9f   :  { %4927 = vmatmul.mubr.msk.f32.gmra.mxu0 %vm101_vm3, %v4911_v39 }
  0xa0   :  { %585 = vmatprep.mubr.f32.mxu0 %v7037_v5  ;;  %v4453_v5 = vld [vmem:[%s7032_s5 + $0x20] sm:$0xff] }
  0xa1   :  { %v5822_v8 = vpop.permute.xlu0 %512  ;;  %v5824_v9 = vpop.permute.xlu1 %612 }
  0xa2   :  { %2424 = vperm.xlu0 %5325, %v5123_v40   ;;  %2484 = vperm.xlu1 %5326, %v5139_v41   ;;  %v5215_v41 = vld [vmem:[%s7032_s5 + $0xa0] sm:$0xff]  ;;  %vm614_vm10 = vcmp.eq.s32.totalorder %v5824_v9, 1  ;;  %v4962_v9 = vld [vmem:[%s7029_s2 + $0x198] sm:$0xff] }
  0xa5   :  { %v5830_v12 = vpop.permute.xlu0 %636  ;;  %v5832_v13 = vpop.permute.xlu1 %696 }
  0xa6   :  { %2479 = vperm.xlu0 %5325, %v5138_v44   ;;  %2474 = vperm.xlu1 %5326, %v5137_v45   ;;  %v5214_v44 = vld [vmem:[%s7032_s5 + $0x98] sm:$0xff]  ;;  %v5213_v45 = vld [vmem:[%s7032_s5 + $0x90] sm:$0xff] }
  0xa9   :  { %v5846_v19 = vpop.permute.xlu0 %691  ;;  %v5848_v20 = vpop.permute.xlu1 %686 }
  0xaa   :  { %2469 = vperm.xlu0 %5325, %v5136_v46   ;;  %2464 = vperm.xlu1 %5326, %v5135_v47   ;;  %v5212_v46 = vld [vmem:[%s7032_s5 + $0x88] sm:$0xff] }
  0xad   :  { %v5856_v23 = vpop.permute.xlu0 %681  ;;  %v5858_v26 = vpop.permute.xlu1 %676 }
  0xae   :  { %2459 = vperm.xlu0 %5325, %v5134_v50   ;;  %2454 = vperm.xlu1 %5326, %v5133_v51   ;;  %v5211_v51 = vld [vmem:[%s7032_s5 + $0x80] sm:$0xff] }
  0xb1   :  { %v5872_v33 = vpop.permute.xlu0 %671  ;;  %v5874_v34 = vpop.permute.xlu1 %666 }
  0xb2   :  { %2449 = vperm.xlu0 %5325, %v5132_v54   ;;  %2711 = vperm.xlu1 %5326, %v5163_v55   ;;  %v5229_v54 = vld [vmem:[%s7034_s7 + $0x20] sm:$0xff] }
  0xb5   :  { %v5882_v39 = vpop.permute.xlu0 %661  ;;  %v5884_v40 = vpop.permute.xlu1 %923 }
  0xb6   :  { %2706 = vperm.xlu0 %5325, %v5162_v56   ;;  %2701 = vperm.xlu1 %5326, %v5161_v57   ;;  %v5230_v57 = vld [vmem:[%s7034_s7 + $0x28] sm:$0xff] }
  0xb9   :  { %v5898_v47 = vpop.permute.xlu0 %918  ;;  %v5900_v50 = vpop.permute.xlu1 %913 }
  0xba   :  { %2696 = vperm.xlu0 %5325, %v5160_v60   ;;  %2691 = vperm.xlu1 %5326, %v5159_v61   ;;  %v3590_v60 = vsel %vm3017_vm6, 1, %v7039_v2  ;;  %v5233_v61 = vld [vmem:[%s7028_s1 + $0x8] sm:$0xff] }
  0xbb   :  { %vm3613_vm7 = vcmp.gt.f32.partialorder %v5233_v61, 0.0 }
  0xbd   :  { %v5908_v55 = vpop.permute.xlu0 %908  ;;  %v5910_v56 = vpop.permute.xlu1 %903 }
  0xbe   :  { %2686 = vperm.xlu0 %5325, %v5158_v0   ;;  %2681 = vperm.xlu1 %5326, %v5157_v1   ;;  %7067 = vst [vmem:[#allocation4_spill] sm:$0xff] %v5910_v56  ;;  %v5249_v0 = vld [vmem:[%s7030_s3 + $0x78] sm:$0xff] }
  0xc1   :  { %v5922_v1 = vpop.permute.xlu0 %898 }
  0xc2   :  { %2676 = vperm.xlu0 %5325, %v5156_v6   ;;  %2891 = vperm.xlu1 %5326, %v5174_v7   ;;  %7068 = vst [vmem:[#allocation5_spill] sm:$0xff] %v5922_v1  ;;  %v5924_v6 = vpop.permute.xlu1 %893  ;;  %v5248_v7 = vld [vmem:[%s7030_s3 + $0x70] sm:$0xff] }
  0xc3   :  { %7069 = vst [vmem:[#allocation6_spill] sm:$0xff] %v5924_v6 }
  0xc6   :  { %2896 = vperm.xlu0 %5325, %v5175_v10   ;;  %2996 = vperm.xlu1 %5326, %v2994_v11   ;;  %v5247_v10 = vld [vmem:[%s7030_s3 + $0x68] sm:$0xff]  ;;  %v5932_v11 = vpop.permute.xlu0 %888 }
  0xc7   :  { %7070 = vst [vmem:[#allocation7_spill] sm:$0xff] %v5932_v11 }
  0xca   :  { %3020 = vperm.xlu0 %5325, %v5178_v14   ;;  %3080 = vperm.xlu1 %5326, %v5194_v15   ;;  %v5934_v14 = vpop.permute.xlu1 %1103  ;;  %v5246_v15 = vld [vmem:[%s7030_s3 + $0x60] sm:$0xff] }
  0xcb   :  { %7071 = vst [vmem:[#allocation8_spill] sm:$0xff] %v5934_v14 }
  0xce   :  { %3075 = vperm.xlu0 %5325, %v5193_v16   ;;  %3070 = vperm.xlu1 %5326, %v5192_v17   ;;  %v5245_v16 = vld [vmem:[%s7030_s3 + $0x58] sm:$0xff]  ;;  %v5244_v17 = vld [vmem:[%s7030_s3 + $0x50] sm:$0xff] }
  0xd2   :  { %3065 = vperm.xlu0 %5325, %v5191_v21   ;;  %3060 = vperm.xlu1 %5326, %v5190_v22   ;;  %v5243_v21 = vld [vmem:[%s7030_s3 + $0x48] sm:$0xff]  ;;  %v5948_v22 = vpop.permute.xlu0 %1108 }
  0xd3   :  { %7072 = vst [vmem:[#allocation9_spill] sm:$0xff] %v5948_v22 }
  0xd6   :  { %3055 = vperm.xlu0 %5325, %v5189_v27   ;;  %3050 = vperm.xlu1 %5326, %v5188_v28   ;;  %v5950_v27 = vpop.permute.xlu1 %1208  ;;  %v5242_v28 = vld [vmem:[%s7030_s3 + $0x40] sm:$0xff] }
  0xd7   :  { %7073 = vst [vmem:[#allocation10_spill] sm:$0xff] %v5950_v27 }
  0xda   :  { %3045 = vperm.xlu0 %5325, %v5187_v29   ;;  %3307 = vperm.xlu1 %5326, %v5218_v32   ;;  %v5273_v29 = vld [vmem:[%s7032_s5 + $0x78] sm:$0xff]  ;;  %v5958_v32 = vpop.permute.xlu0 %1232 }
  0xdb   :  { %7074 = vst [vmem:[#allocation11_spill] sm:$0xff] %v5958_v32 }
  0xde   :  { %3302 = vperm.xlu0 %5325, %v5217_v35   ;;  %3297 = vperm.xlu1 %5326, %v5216_v36   ;;  %v5960_v35 = vpop.permute.xlu1 %1292  ;;  %v5272_v36 = vld [vmem:[%s7032_s5 + $0x70] sm:$0xff] }
  0xdf   :  { %7075 = vst [vmem:[#allocation12_spill] sm:$0xff] %v5960_v35 }
  0xe2   :  { %3292 = vperm.xlu0 %5325, %v5215_v41   ;;  %3287 = vperm.xlu1 %5326, %v5214_v44   ;;  %v5271_v41 = vld [vmem:[%s7032_s5 + $0x68] sm:$0xff]  ;;  %v5270_v44 = vld [vmem:[%s7032_s5 + $0x60] sm:$0xff] }
  0xe6   :  { %3282 = vperm.xlu0 %5325, %v5213_v45   ;;  %3277 = vperm.xlu1 %5326, %v5212_v46   ;;  %v5269_v45 = vld [vmem:[%s7032_s5 + $0x58] sm:$0xff]  ;;  %v5974_v46 = vpop.permute.xlu0 %1287 }
  0xe7   :  { %7076 = vst [vmem:[#allocation13_spill] sm:$0xff] %v5974_v46 }
  0xea   :  { %3272 = vperm.xlu0 %5325, %v5211_v51   ;;  %3487 = vperm.xlu1 %5326, %v5229_v54   ;;  %v5976_v51 = vpop.permute.xlu1 %1282  ;;  %v5268_v54 = vld [vmem:[%s7032_s5 + $0x50] sm:$0xff] }
  0xeb   :  { %7077 = vst [vmem:[#allocation14_spill] sm:$0xff] %v5976_v51 }
  0xee   :  { %3492 = vperm.xlu0 %5325, %v5230_v57   ;;  %3592 = vperm.xlu1 %5326, %v3590_v60   ;;  %v5267_v57 = vld [vmem:[%s7032_s5 + $0x48] sm:$0xff]  ;;  %v5984_v60 = vpop.permute.xlu0 %1277 }
  0xef   :  { %7078 = vst [vmem:[#allocation15_spill] sm:$0xff] %v5984_v60 }
  0xf2   :  { %3616 = vperm.xlu0 %5325, %v5233_v61   ;;  %3676 = vperm.xlu1 %5326, %v5249_v0   ;;  %v5986_v0 = vpop.permute.xlu1 %1272  ;;  %v4231_v61 = vld [vmem:[%s7030_s3 + $0x38] sm:$0xff] }
  0xf3   :  { %7079 = vst [vmem:[#allocation16_spill] sm:$0xff] %v5986_v0 }
  0xf6   :  { %3671 = vperm.xlu0 %5325, %v5248_v7   ;;  %3666 = vperm.xlu1 %5326, %v5247_v10   ;;  %v5266_v7 = vld [vmem:[%s7032_s5 + $0x40] sm:$0xff]  ;;  %v5284_v10 = vld [vmem:[%s7034_s7 + $0x10] sm:$0xff] }
  0xfa   :  { %3661 = vperm.xlu0 %5325, %v5246_v15   ;;  %3656 = vperm.xlu1 %5326, %v5245_v16   ;;  %v5285_v15 = vld [vmem:[%s7034_s7 + $0x18] sm:$0xff]  ;;  %v4186_v16 = vsel %vm3613_vm7, 1, %v7039_v2 }
  0xfe   :  { %3651 = vperm.xlu0 %5325, %v5244_v17   ;;  %3646 = vperm.xlu1 %5326, %v5243_v21   ;;  %v5998_v17 = vpop.permute.xlu0 %1267  ;;  %v6000_v21 = vpop.permute.xlu1 %1262 }
  0xff   :  { %7080 = vst [vmem:[#allocation17_spill] sm:$0xff] %v5998_v17  ;;  %7081 = vst [vmem:[#allocation18_spill] sm:$0xff] %v6000_v21 }
 0x102   :  { %3641 = vperm.xlu0 %5325, %v5242_v28   ;;  %3903 = vperm.xlu1 %5326, %v5273_v29   ;;  %v4207_v28 = vld [vmem:[%s7028_s1] sm:$0xff]  ;;  %v6008_v29 = vpop.permute.xlu0 %1257 }
 0x103   :  { %7082 = vst [vmem:[#allocation19_spill] sm:$0xff] %v6008_v29  ;;  %vm4208_vm8 = vcmp.gt.f32.partialorder %v4207_v28, 0.0 }
 0x106   :  { %3898 = vperm.xlu0 %5325, %v5272_v36   ;;  %3893 = vperm.xlu1 %5326, %v5271_v41   ;;  %v6010_v36 = vpop.permute.xlu1 %1519  ;;  %v4230_v41 = vld [vmem:[%s7030_s3 + $0x30] sm:$0xff] }
 0x107   :  { %7083 = vst [vmem:[#allocation20_spill] sm:$0xff] %v6010_v36 }
 0x10a   :  { %3888 = vperm.xlu0 %5325, %v5270_v44   ;;  %3883 = vperm.xlu1 %5326, %v5269_v45   ;;  %v4229_v44 = vld [vmem:[%s7030_s3 + $0x28] sm:$0xff]  ;;  %v4228_v45 = vld [vmem:[%s7030_s3 + $0x20] sm:$0xff] }
 0x10e   :  { %3878 = vperm.xlu0 %5325, %v5268_v54   ;;  %3873 = vperm.xlu1 %5326, %v5267_v57   ;;  %v4227_v54 = vld [vmem:[%s7030_s3 + $0x18] sm:$0xff]  ;;  %v6024_v57 = vpop.permute.xlu0 %1514 }
 0x10f   :  { %7084 = vst [vmem:[#allocation21_spill] sm:$0xff] %v6024_v57 }
 0x112   :  { %3868 = vperm.xlu0 %5325, %v5266_v7   ;;  %4083 = vperm.xlu1 %5326, %v5284_v10   ;;  %v6026_v7 = vpop.permute.xlu1 %1509  ;;  %v4226_v10 = vld [vmem:[%s7030_s3 + $0x10] sm:$0xff] }
 0x113   :  { %7085 = vst [vmem:[#allocation22_spill] sm:$0xff] %v6026_v7 }
 0x116   :  { %4088 = vperm.xlu0 %5325, %v5285_v15   ;;  %4188 = vperm.xlu1 %5326, %v4186_v16   ;;  %v4225_v15 = vld [vmem:[%s7030_s3 + $0x8] sm:$0xff]  ;;  %v6034_v16 = vpop.permute.xlu0 %1504 }
 0x117   :  { %7086 = vst [vmem:[#allocation23_spill] sm:$0xff] %v6034_v16 }
 0x11a   :  { %4211 = vperm.xlu0 %5325, %v4207_v28   ;;  %4269 = vperm.xlu1 %5326, %v4231_v61   ;;  %v6036_v61 = vpop.permute.xlu1 %1499 }
 0x11b   :  { %7087 = vst [vmem:[#allocation24_spill] sm:$0xff] %v6036_v61 }
 0x11e   :  { %4264 = vperm.xlu0 %5325, %v4230_v41   ;;  %4259 = vperm.xlu1 %5326, %v4229_v44   ;;  %v4224_v41 = vld [vmem:[%s7030_s3] sm:$0xff]  ;;  %v4456_v44 = vld [vmem:[%s7032_s5 + $0x38] sm:$0xff] }
 0x122   :  { %4254 = vperm.xlu0 %5325, %v4228_v45   ;;  %4249 = vperm.xlu1 %5326, %v4227_v54   ;;  %v4455_v45 = vld [vmem:[%s7032_s5 + $0x30] sm:$0xff]  ;;  %v4454_v54 = vld [vmem:[%s7032_s5 + $0x28] sm:$0xff] }
 0x126   :  { %4244 = vperm.xlu0 %5325, %v4226_v10   ;;  %4239 = vperm.xlu1 %5326, %v4225_v15   ;;  %v6050_v10 = vpop.permute.xlu0 %1494  ;;  %v6052_v15 = vpop.permute.xlu1 %1489 }
 0x127   :  { %7088 = vst [vmem:[#allocation25_spill] sm:$0xff] %v6050_v10  ;;  %7089 = vst [vmem:[#allocation26_spill] sm:$0xff] %v6052_v15  ;;  %v4451_v15 = vld [vmem:[%s7032_s5 + $0x10] sm:$0xff] }
 0x12a   :  { %4234 = vperm.xlu0 %5325, %v4224_v41   ;;  %4494 = vperm.xlu1 %5326, %v4456_v44   ;;  %v4452_v41 = vld [vmem:[%s7032_s5 + $0x18] sm:$0xff]  ;;  %v6060_v44 = vpop.permute.xlu0 %1484  ;;  %v6062_v2 = vpop.permute.xlu1 %1699 }
 0x12b   :  { %7090 = vst [vmem:[#allocation27_spill] sm:$0xff] %v6060_v44  ;;  %7091 = vst [vmem:[#allocation28_spill] sm:$0xff] %v6062_v2  ;;  %v4668_v2 = vld [vmem:[%s7034_s7] sm:$0xff] }
 0x12e   :  { %4489 = vperm.xlu0 %5325, %v4455_v45   ;;  %4484 = vperm.xlu1 %5326, %v4454_v54   ;;  %v4450_v45 = vld [vmem:[%s7032_s5 + $0x8] sm:$0xff]  ;;  %v4449_v54 = vld [vmem:[%s7032_s5] sm:$0xff] }
 0x132   :  { %4479 = vperm.xlu0 %5325, %v4453_v5   ;;  %4474 = vperm.xlu1 %5326, %v4452_v41   ;;  %v6076_v5 = vpop.permute.xlu0 %1704  ;;  %v6078_v41 = vpop.permute.xlu1 %1804 }
 0x133   :  { %7092 = vst [vmem:[#allocation29_spill] sm:$0xff] %v6076_v5  ;;  %7093 = vst [vmem:[#allocation30_spill] sm:$0xff] %v6078_v41 }
 0x136   :  { %4469 = vperm.xlu0 %5325, %v4451_v15   ;;  %4464 = vperm.xlu1 %5326, %v4450_v45   ;;  %v4669_v15 = vld [vmem:[%s7034_s7 + $0x8] sm:$0xff]  ;;  %v7094_v45 = vmov 0   ;;  %v6084_v10 = vpop.permute.xlu0 %1828  ;;  %v6086_v61 = vpop.permute.xlu1 %1888 }
 0x137   :  { %v4775_v44 = vsel %vm4208_vm8, 1, %v7094_v45  ;;  %7095 = vst [vmem:[#allocation31_spill] sm:$0xff] %v6084_v10  ;;  %7096 = vst [vmem:[#allocation32_spill] sm:$0xff] %v6086_v61 }
 0x13a   :  { %4459 = vperm.xlu0 %5325, %v4449_v54   ;;  %4672 = vperm.xlu1 %5326, %v4668_v2  }
 0x13e   :  { %4677 = vperm.xlu0 %5325, %v4669_v15   ;;  %4777 = vperm.xlu1 %5326, %v4775_v44  }
 0x143   :  { %v192_v16 = vpop.f32.mrf.mxu0 }
 0x145   :  { %v194_v7 = vpop.f32.mrf.mxu0 }
 0x147   :  { %v198_v5 = vpop.f32.mrf.mxu0 }
 0x149   :  { %v200_v36 = vpop.f32.mrf.mxu0 }
 0x14b   :  { %v204_v41 = vpop.f32.mrf.mxu0 }
 0x14d   :  { %v206_v28 = vpop.f32.mrf.mxu0 }
 0x14f   :  { %v210_v54 = vpop.f32.mrf.mxu0 }
 0x151   :  { %v212_v2 = vpop.f32.mrf.mxu0 }
 0x153   :  { %v216_v57 = vpop.f32.mrf.mxu0 }
 0x154   :  { %v217_v11 = vadd.f32 %v216_v57, %v5719_v31 }
 0x155   :  { %v218_v29 = vpop.f32.mrf.mxu0 }
 0x156   :  { %v219_v27 = vadd.f32 %v218_v29, %v5719_v31  ;;  %v247_v29 = vmul.f32 0.01, %v217_v11  ;;  %v201_v31 = vadd.f32 %v200_v36, %v5738_v37 }
 0x157   :  { %v222_v21 = vpop.f32.mrf.mxu0 }
 0x158   :  { %v223_v46 = vadd.f32 %v222_v21, %v5698_v24  ;;  %v205_v21 = vadd.f32 %v204_v41, %v5740_v38 }
 0x159   :  { %v224_v17 = vpop.f32.mrf.mxu0 }
 0x15a   :  { %v225_v51 = vadd.f32 %v224_v17, %v5698_v24 }
 0x15b   :  { %v228_v0 = vpop.f32.mrf.mxu0 }
 0x15c   :  { %v229_v44 = vadd.f32 %v228_v0, %v5678_v18  ;;  %v249_v0 = vmul.f32 0.01, %v223_v46 }
 0x15d   :  { %v230_v45 = vpop.f32.mrf.mxu0 }
 0x15e   :  { %v231_v10 = vadd.f32 %v230_v45, %v5678_v18  ;;  %v251_v6 = vmul.f32 0.01, %v229_v44  ;;  %v213_v45 = vadd.f32 %v212_v2, %v5717_v30  ;;  %v211_v18 = vadd.f32 %v210_v54, %v5717_v30 }
 0x15f   :  { %v234_v60 = vpop.f32.mrf.mxu0  ;;  %v7097_v54 = vmov 0.0  }
 0x160   :  { %v235_v15 = vadd.f32 %v234_v60, %v5700_v25  ;;  %v252_v22 = vmul.f32 0.01, %v231_v10  ;;  %v250_v60 = vmul.f32 0.01, %v225_v51  ;;  %v267_v56 = vmax.f32 %v229_v44, %v251_v6  ;;  %v4930_v44 = vld [vmem:[%s7031_s4 + $0x1d0] sm:$0xff] }
 0x161   :  { %v236_v61 = vpop.f32.mrf.mxu0  ;;  %v246_v57 = vmul.f32 0.01, %v213_v45  ;;  %v245_v30 = vmul.f32 0.01, %v211_v18  ;;  %v263_v6 = vmax.f32 %v217_v11, %v247_v29 }
 0x162   :  { %v237_v35 = vadd.f32 %v236_v61, %v5700_v25  ;;  %v253_v32 = vmul.f32 0.01, %v235_v15  ;;  %v207_v25 = vadd.f32 %v206_v28, %v5740_v38  ;;  %v248_v61 = vmul.f32 0.01, %v219_v27 }
 0x163   :  { %v268_v24 = vmax.f32 %v231_v10, %v252_v22  ;;  %v266_v2 = vmax.f32 %v225_v51, %v250_v60  ;;  %v193_v38 = vadd.f32 %v192_v16, %v5756_v43  ;;  %v242_v10 = vmul.f32 0.01, %v201_v31  ;;  %v4928_v16 = vld [vmem:[%s7031_s4 + $0x1c0] sm:$0xff] }
 0x164   :  { %v254_v14 = vmul.f32 0.01, %v237_v35  ;;  %v269_v17 = vmax.f32 %v235_v15, %v253_v32  ;;  %v195_v32 = vadd.f32 %v194_v7, %v5756_v43  ;;  %v244_v28 = vmul.f32 0.01, %v207_v25  ;;  %v4929_v15 = vld [vmem:[%s7031_s4 + $0x1c8] sm:$0xff]  ;;  %v4932_v60 = vld [vmem:[%s7031_s4 + $0x1e0] sm:$0xff] }
 0x165   :  { %v264_v22 = vmax.f32 %v219_v27, %v248_v61  ;;  %v262_v36 = vmax.f32 %v213_v45, %v246_v57  ;;  %v261_v41 = vmax.f32 %v211_v18, %v245_v30  ;;  %v258_v7 = vmax.f32 %v201_v31, %v242_v10  ;;  %v4931_v45 = vld [vmem:[%s7031_s4 + $0x1d8] sm:$0xff]  ;;  %v4933_v18 = vld [vmem:[%s7031_s4 + $0x1e8] sm:$0xff] }
 0x166   :  { %v270_v1 = vmax.f32 %v237_v35, %v254_v14  ;;  %v199_v14 = vadd.f32 %v198_v5, %v5738_v37  ;;  %v265_v35 = vmax.f32 %v223_v46, %v249_v0  ;;  %v240_v37 = vmul.f32 0.01, %v195_v32  ;;  %v4934_v0 = vld [vmem:[%s7031_s4 + $0x1f0] sm:$0xff] }
 0x167   :  { %v260_v5 = vmax.f32 %v207_v25, %v244_v28 }
 0x168   :  { %370 = vmatprep.subr.mxu1 %v270_v1  ;;  %v243_v1 = vmul.f32 0.01, %v205_v21  ;;  %v241_v51 = vmul.f32 0.01, %v199_v14  ;;  %v256_v43 = vmax.f32 %v195_v32, %v240_v37 }
 0x169   :  { %371 = vmatpush1.msra.mxu1 %v269_v17  ;;  %v4935_v17 = vld [vmem:[%s7031_s4 + $0x1f8] sm:$0xff] }
 0x16a   :  { %372 = vmatprep.subr.mxu1 %v268_v24  ;;  %v259_v46 = vmax.f32 %v205_v21, %v243_v1  ;;  %v257_v27 = vmax.f32 %v199_v14, %v241_v51 }
 0x16b   :  { %373 = vmatpush1.msra.mxu1 %v267_v56  ;;  %v239_v56 = vmul.f32 0.01, %v193_v38 }
 0x16c   :  { %374 = vmatprep.subr.mxu1 %v266_v2 }
 0x16d   :  { %375 = vmatpush1.msra.mxu1 %v265_v35  ;;  %v255_v11 = vmax.f32 %v193_v38, %v239_v56 }
 0x16e   :  { %376 = vmatprep.subr.mxu1 %v264_v22 }
 0x16f   :  { %377 = vmatpush1.msra.mxu1 %v263_v6 }
 0x170   :  { %378 = vmatprep.subr.mxu1 %v262_v36 }
 0x171   :  { %379 = vmatpush1.msra.mxu1 %v261_v41 }
 0x172   :  { %380 = vmatprep.subr.mxu1 %v260_v5 }
 0x173   :  { %381 = vmatpush1.msra.mxu1 %v259_v46 }
 0x174   :  { %382 = vmatprep.subr.mxu1 %v258_v7 }
 0x175   :  { %383 = vmatpush1.msra.mxu1 %v257_v27 }
 0x176   :  { %384 = vmatprep.subr.mxu1 %v256_v43 }
 0x177   :  { %385 = vmatpush1.msra.mxu1 %v255_v11 }
 0x178   :  { %4944 = vmatmul.mubr.msk.f32.vlgmr.msra.gmra.mxu1 %vm329_vm9, %v4928_v16 }
 0x179   :  { %424 = vmatprep.mubr.f32.mxu1 %v7097_v54 }
 0x17c   :  { %4945 = vmatmul.mubr.msk.f32.gmra.mxu1 %vm329_vm9, %v4929_v15 }
 0x17d   :  { %430 = vmatprep.mubr.f32.mxu1 %v7097_v54 }
 0x180   :  { %4946 = vmatmul.mubr.msk.f32.gmra.mxu1 %vm329_vm9, %v4930_v44 }
 0x181   :  { %436 = vmatprep.mubr.f32.mxu1 %v7097_v54 }
 0x184   :  { %4947 = vmatmul.mubr.msk.f32.gmra.mxu1 %vm329_vm9, %v4931_v45 }
 0x185   :  { %442 = vmatprep.mubr.f32.mxu1 %v7097_v54 }
 0x188   :  { %4948 = vmatmul.mubr.msk.f32.gmra.mxu1 %vm329_vm9, %v4932_v60 }
 0x189   :  { %448 = vmatprep.mubr.f32.mxu1 %v7097_v54 }
 0x18c   :  { %4949 = vmatmul.mubr.msk.f32.gmra.mxu1 %vm329_vm9, %v4933_v18 }
 0x18d   :  { %454 = vmatprep.mubr.f32.mxu1 %v7097_v54 }
 0x190   :  { %4950 = vmatmul.mubr.msk.f32.gmra.mxu1 %vm329_vm9, %v4934_v0 }
 0x191   :  { %460 = vmatprep.mubr.f32.mxu1 %v7097_v54 }
 0x194   :  { %4951 = vmatmul.mubr.msk.f32.gmra.mxu1 %vm329_vm9, %v4935_v17 }
 0x195   :  { %1014 = vmatprep.mubr.f32.mxu1 %v7097_v54 }
 0x238   :  { %v420_v25 = vpop.f32.mrf.mxu1 }
 0x23a   :  { %v422_v61 = vpop.f32.mrf.mxu1 }
 0x23c   :  { %v426_v24 = vpop.f32.mrf.mxu1 }
 0x23e   :  { %v428_v21 = vpop.f32.mrf.mxu1 }
 0x240   :  { %v432_v29 = vpop.f32.mrf.mxu1 }
 0x241   :  { %v433_v18 = vadd.f32 %v432_v29, %v5798_v59 }
 0x242   :  { %v434_v31 = vpop.f32.mrf.mxu1 }
 0x243   :  { %v471_v29 = vmul.f32 0.01, %v433_v18 }
 0x244   :  { %v438_v57 = vpop.f32.mrf.mxu1 }
 0x246   :  { %v440_v2 = vpop.f32.mrf.mxu1 }
 0x247   :  { %v441_v11 = vadd.f32 %v440_v2, %v5780_v52 }
 0x248   :  { %v444_v14 = vpop.f32.mrf.mxu1 }
 0x249   :  { %v445_v27 = vadd.f32 %v444_v14, %v5782_v53  ;;  %v474_v14 = vmul.f32 0.01, %v441_v11 }
 0x24a   :  { %v446_v30 = vpop.f32.mrf.mxu1 }
 0x24b   :  { %v447_v56 = vadd.f32 %v446_v30, %v5782_v53  ;;  %v475_v0 = vmul.f32 0.01, %v445_v27  ;;  %v429_v53 = vadd.f32 %v428_v21, %v5796_v58  ;;  %v427_v30 = vadd.f32 %v426_v24, %v5796_v58 }
 0x24c   :  { %v450_v35 = vpop.f32.mrf.mxu1  ;;  %v490_v21 = vmax.f32 %v441_v11, %v474_v14 }
 0x24d   :  { %v451_v37 = vadd.f32 %v450_v35, %v5770_v48  ;;  %v476_v60 = vmul.f32 0.01, %v447_v56 }
 0x24e   :  { %v452_v32 = vpop.f32.mrf.mxu1 }
 0x24f   :  { %v453_v51 = vadd.f32 %v452_v32, %v5770_v48  ;;  %v477_v44 = vmul.f32 0.01, %v451_v37  ;;  %v492_v32 = vmax.f32 %v447_v56, %v476_v60 }
 0x250   :  { %v456_v28 = vpop.f32.mrf.mxu1 }
 0x251   :  { %v457_v10 = vadd.f32 %v456_v28, %v5772_v49  ;;  %v478_v16 = vmul.f32 0.01, %v453_v51  ;;  %v491_v28 = vmax.f32 %v445_v27, %v475_v0 }
 0x252   :  { %v458_v22 = vpop.f32.mrf.mxu1 }
 0x253   :  { %v459_v1 = vadd.f32 %v458_v22, %v5772_v49  ;;  %v479_v43 = vmul.f32 0.01, %v457_v10  ;;  %v439_v49 = vadd.f32 %v438_v57, %v5780_v52  ;;  %v494_v2 = vmax.f32 %v453_v51, %v478_v16  ;;  %v4952_v51 = vld [vmem:[%s7033_s6 + $0x70] sm:$0xff] }
 0x254   :  { %v462_v38 = vpop.f32.mrf.mxu1  ;;  %v493_v57 = vmax.f32 %v451_v37, %v477_v44  ;;  %v470_v22 = vmul.f32 0.01, %v429_v53 }
 0x255   :  { %v463_v6 = vadd.f32 %v462_v38, %v5754_v42  ;;  %v480_v46 = vmul.f32 0.01, %v459_v1  ;;  %v495_v17 = vmax.f32 %v457_v10, %v479_v43  ;;  %v473_v52 = vmul.f32 0.01, %v439_v49 }
 0x256   :  { %v464_v36 = vpop.f32.mrf.mxu1  ;;  %v469_v38 = vmul.f32 0.01, %v427_v30  ;;  %v487_v10 = vmax.f32 %v433_v18, %v471_v29 }
 0x257   :  { %v465_v41 = vadd.f32 %v464_v36, %v5754_v42  ;;  %v481_v5 = vmul.f32 0.01, %v463_v6  ;;  %v435_v42 = vadd.f32 %v434_v31, %v5798_v59  ;;  %v496_v48 = vmax.f32 %v459_v1, %v480_v46 }
 0x258   :  { %v423_v31 = vadd.f32 %v422_v61, %v5808_v63  ;;  %v421_v59 = vadd.f32 %v420_v25, %v5808_v63  ;;  %v489_v1 = vmax.f32 %v439_v49, %v473_v52  ;;  %v486_v61 = vmax.f32 %v429_v53, %v470_v22  ;;  %v4964_v52 = vld [vmem:[%s7029_s2 + $0x1a8] sm:$0xff] }
 0x259   :  { %v482_v7 = vmul.f32 0.01, %v465_v41  ;;  %v497_v45 = vmax.f32 %v463_v6, %v481_v5  ;;  %v472_v35 = vmul.f32 0.01, %v435_v42  ;;  %v485_v36 = vmax.f32 %v427_v30, %v469_v38  ;;  %v4959_v30 = vld [vmem:[%s7029_s2 + $0x180] sm:$0xff] }
 0x25a   :  { %v468_v58 = vmul.f32 0.01, %v423_v31  ;;  %v467_v6 = vmul.f32 0.01, %v421_v59 }
 0x25b   :  { %v498_v15 = vmax.f32 %v465_v41, %v482_v7  ;;  %v488_v24 = vmax.f32 %v435_v42, %v472_v35  ;;  %v4953_v41 = vld [vmem:[%s7033_s6 + $0x78] sm:$0xff] }
 0x25c   :  { %v484_v63 = vmax.f32 %v423_v31, %v468_v58  ;;  %v483_v25 = vmax.f32 %v421_v59, %v467_v6  ;;  %v4966_v31 = vld [vmem:[%s7029_s2 + $0x1b8] sm:$0xff] }
 0x25d   :  { %537 = vmatprep.subr.mxu0 %v498_v15 }
 0x25e   :  { %538 = vmatpush1.msra.mxu0 %v497_v45 }
 0x25f   :  { %539 = vmatprep.subr.mxu0 %v496_v48 }
 0x260   :  { %540 = vmatpush1.msra.mxu0 %v495_v17 }
 0x261   :  { %541 = vmatprep.subr.mxu0 %v494_v2 }
 0x262   :  { %542 = vmatpush1.msra.mxu0 %v493_v57  ;;  %v4965_v57 = vld [vmem:[%s7029_s2 + $0x1b0] sm:$0xff] }
 0x263   :  { %543 = vmatprep.subr.mxu0 %v492_v32 }
 0x264   :  { %544 = vmatpush1.msra.mxu0 %v491_v28 }
 0x265   :  { %545 = vmatprep.subr.mxu0 %v490_v21 }
 0x266   :  { %546 = vmatpush1.msra.mxu0 %v489_v1 }
 0x267   :  { %547 = vmatprep.subr.mxu0 %v488_v24 }
 0x268   :  { %548 = vmatpush1.msra.mxu0 %v487_v10 }
 0x269   :  { %549 = vmatprep.subr.mxu0 %v486_v61 }
 0x26a   :  { %550 = vmatpush1.msra.mxu0 %v485_v36 }
 0x26b   :  { %551 = vmatprep.subr.mxu0 %v484_v63 }
 0x26c   :  { %552 = vmatpush1.msra.mxu0 %v483_v25 }
 0x26d   :  { %4956 = vmatmul.mubr.msk.f32.vlgmr.msra.gmra.mxu0 %vm329_vm9, %v4952_v51 }
 0x26e   :  { %591 = vmatprep.mubr.f32.mxu0 %v7097_v54 }
 0x271   :  { %4957 = vmatmul.mubr.msk.f32.gmra.mxu0 %vm329_vm9, %v4953_v41 }
 0x272   :  { %787 = vmatprep.mubr.f32.mxu0 %v7097_v54 }
 0x32d   :  { %v587_v37 = vpop.f32.mrf.mxu0 }
 0x32e   :  { %v588_v5 = vadd.f32 %v587_v37, %v5806_v62 }
 0x32f   :  { %v589_v56 = vpop.f32.mrf.mxu0 }
 0x330   :  { %5327 = vtanh.f32 %v588_v5  ;;  %v590_v46 = vadd.f32 %v589_v56, %v5806_v62 }
 0x331   :  { %v593_v49 = vpop.f32.mrf.mxu0 }
 0x332   :  { %5329 = vtanh.f32 %v590_v46  ;;  %v594_v45 = vadd.f32 %v593_v49, %v5822_v8 }
 0x333   :  { %v595_v44 = vpop.f32.mrf.mxu0 }
 0x334   :  { %v596_v42 = vadd.f32 %v595_v44, %v5822_v8  ;;  %v600_v62 = vsub.f32 %v5643_v4, %v594_v45 }
 0x336   :  { %v601_v18 = vsub.f32 %v5638_v3, %v596_v42 }
 0x33d   :  { %v6172_v7 = vpop.eup %5327 }
 0x33e   :  { %v602_v27 = vsub.f32 0.0, %v6172_v7 }
 0x33f   :  { %v6175_v43 = vpop.eup %5329 }
 0x340   :  { %v604_v11 = vmul.f32 1.442695, %v602_v27  ;;  %v603_v16 = vsub.f32 0.0, %v6175_v43 }
 0x342   :  { %5331 = vpow2.f32 %v604_v11  ;;  %v606_v15 = vmul.f32 1.442695, %v603_v16 }
 0x344   :  { %5333 = vpow2.f32 %v606_v15 }
 0x34f   :  { %v5332_v60 = vpop.eup %5331 }
 0x350   :  { %v608_v48 = vmul.f32 %v5332_v60, %v600_v62 }
 0x351   :  { %v5334_v0 = vpop.eup %5333 }
 0x352   :  { %v609_v17 = vmul.f32 %v5334_v0, %v601_v18  ;;  %v6184_v53 = vsel %vm614_vm10, %v5643_v4, %v608_v48  ;;  %v4961_v4 = vld [vmem:[%s7029_s2 + $0x190] sm:$0xff] }
 0x353   :  { %v639_v8 = vmul.f32 %v5830_v12, %v6184_v53 }
 0x354   :  { %v6187_v14 = vsel %vm614_vm10, %v5638_v3, %v609_v17  ;;  %v4960_v3 = vld [vmem:[%s7029_s2 + $0x188] sm:$0xff] }
 0x355   :  { %v640_v2 = vmul.f32 %v5830_v12, %v6187_v14  ;;  %v4963_v12 = vld [vmem:[%s7029_s2 + $0x1a0] sm:$0xff] }
 0x357   :  { %753 = vmatprep.subr.mxu0 %v640_v2 }
 0x358   :  { %754 = vmatpush1.msra.mxu0 %v639_v8 }
 0x359   :  { %4975 = vmatmul.mubr.msk.f32.vlgmr.msra.gmra.mxu0 %vm101_vm3, %v4959_v30 }
 0x35a   :  { %793 = vmatprep.mubr.f32.mxu0 %v7097_v54 }
 0x35d   :  { %4976 = vmatmul.mubr.msk.f32.gmra.mxu0 %vm101_vm3, %v4960_v3 }
 0x35e   :  { %799 = vmatprep.mubr.f32.mxu0 %v7097_v54 }
 0x361   :  { %4977 = vmatmul.mubr.msk.f32.gmra.mxu0 %vm101_vm3, %v4961_v4 }
 0x362   :  { %805 = vmatprep.mubr.f32.mxu0 %v7097_v54 }
 0x365   :  { %4978 = vmatmul.mubr.msk.f32.gmra.mxu0 %vm101_vm3, %v4962_v9 }
 0x366   :  { %811 = vmatprep.mubr.f32.mxu0 %v7097_v54 }
 0x369   :  { %4979 = vmatmul.mubr.msk.f32.gmra.mxu0 %vm101_vm3, %v4963_v12 }
 0x36a   :  { %817 = vmatprep.mubr.f32.mxu0 %v7097_v54 }
 0x36d   :  { %4980 = vmatmul.mubr.msk.f32.gmra.mxu0 %vm101_vm3, %v4964_v52 }
 0x36e   :  { %823 = vmatprep.mubr.f32.mxu0 %v7097_v54 }
 0x371   :  { %4981 = vmatmul.mubr.msk.f32.gmra.mxu0 %vm101_vm3, %v4965_v57 }
 0x372   :  { %829 = vmatprep.mubr.f32.mxu0 %v7097_v54 }
 0x375   :  { %4982 = vmatmul.mubr.msk.f32.gmra.mxu0 %vm101_vm3, %v4966_v31 }
 0x376   :  { %1181 = vmatprep.mubr.f32.mxu0 %v7097_v54 }
 0x419   :  { %v789_v35 = vpop.f32.mrf.mxu0 }
 0x41b   :  { %v791_v32 = vpop.f32.mrf.mxu0 }
 0x41c   :  { %v792_v4 = vadd.f32 %v791_v32, %v5882_v39 }
 0x41d   :  { %v795_v59 = vpop.f32.mrf.mxu0 }
 0x41e   :  { %v796_v30 = vadd.f32 %v795_v59, %v5874_v34 }
 0x41f   :  { %v797_v29 = vpop.f32.mrf.mxu0 }
 0x421   :  { %v801_v28 = vpop.f32.mrf.mxu0 }
 0x422   :  { %v802_v18 = vadd.f32 %v801_v28, %v5872_v33  ;;  %v838_v28 = vmul.f32 0.01, %v796_v30 }
 0x423   :  { %v803_v22 = vpop.f32.mrf.mxu0 }
 0x424   :  { %v840_v52 = vmul.f32 0.01, %v802_v18 }
 0x425   :  { %v807_v21 = vpop.f32.mrf.mxu0 }
 0x427   :  { %v809_v38 = vpop.f32.mrf.mxu0 }
 0x428   :  { %v810_v44 = vadd.f32 %v809_v38, %v5858_v26  ;;  %v856_v38 = vmax.f32 %v802_v18, %v840_v52 }
 0x429   :  { %v813_v1 = vpop.f32.mrf.mxu0 }
 0x42a   :  { %v814_v15 = vadd.f32 %v813_v1, %v5856_v23  ;;  %v843_v2 = vmul.f32 0.01, %v810_v44  ;;  %v854_v1 = vmax.f32 %v796_v30, %v838_v28 }
 0x42b   :  { %v815_v58 = vpop.f32.mrf.mxu0 }
 0x42c   :  { %v816_v27 = vadd.f32 %v815_v58, %v5856_v23  ;;  %v844_v0 = vmul.f32 0.01, %v814_v15  ;;  %v798_v23 = vadd.f32 %v797_v29, %v5874_v34  ;;  %v859_v29 = vmax.f32 %v810_v44, %v843_v2  ;;  %v4983_v58 = vld [vmem:[%s7031_s4 + $0x180] sm:$0xff] }
 0x42d   :  { %v819_v24 = vpop.f32.mrf.mxu0  ;;  %v837_v34 = vmul.f32 0.01, %v792_v4 }
 0x42e   :  { %v820_v56 = vadd.f32 %v819_v24, %v5848_v20  ;;  %v845_v48 = vmul.f32 0.01, %v816_v27  ;;  %v860_v57 = vmax.f32 %v814_v15, %v844_v0  ;;  %v839_v31 = vmul.f32 0.01, %v798_v23  ;;  %v4984_v24 = vld [vmem:[%s7031_s4 + $0x188] sm:$0xff] }
 0x42f   :  { %v821_v6 = vpop.f32.mrf.mxu0 }
 0x430   :  { %v822_v37 = vadd.f32 %v821_v6, %v5848_v20  ;;  %v846_v62 = vmul.f32 0.01, %v820_v56  ;;  %v861_v12 = vmax.f32 %v816_v27, %v845_v48  ;;  %v855_v32 = vmax.f32 %v798_v23, %v839_v31  ;;  %v4985_v6 = vld [vmem:[%s7031_s4 + $0x190] sm:$0xff] }
 0x431   :  { %v825_v10 = vpop.f32.mrf.mxu0 }
 0x432   :  { %v826_v51 = vadd.f32 %v825_v10, %v5846_v19  ;;  %v847_v45 = vmul.f32 0.01, %v822_v37  ;;  %v862_v3 = vmax.f32 %v820_v56, %v846_v62  ;;  %v4986_v10 = vld [vmem:[%s7031_s4 + $0x198] sm:$0xff] }
 0x433   :  { %v827_v61 = vpop.f32.mrf.mxu0 }
 0x434   :  { %v828_v63 = vadd.f32 %v827_v61, %v5846_v19  ;;  %v848_v49 = vmul.f32 0.01, %v826_v51  ;;  %v808_v19 = vadd.f32 %v807_v21, %v5858_v26  ;;  %v863_v8 = vmax.f32 %v822_v37, %v847_v45  ;;  %v4987_v61 = vld [vmem:[%s7031_s4 + $0x1a0] sm:$0xff] }
 0x435   :  { %v831_v36 = vpop.f32.mrf.mxu0 }
 0x436   :  { %v832_v25 = vadd.f32 %v831_v36, %v5832_v13  ;;  %v849_v11 = vmul.f32 0.01, %v828_v63  ;;  %v864_v17 = vmax.f32 %v826_v51, %v848_v49  ;;  %v842_v26 = vmul.f32 0.01, %v808_v19  ;;  %v4988_v36 = vld [vmem:[%s7031_s4 + $0x1a8] sm:$0xff] }
 0x437   :  { %v833_v41 = vpop.f32.mrf.mxu0 }
 0x438   :  { %v834_v5 = vadd.f32 %v833_v41, %v5832_v13  ;;  %v850_v46 = vmul.f32 0.01, %v832_v25  ;;  %v804_v13 = vadd.f32 %v803_v22, %v5872_v33  ;;  %v865_v20 = vmax.f32 %v828_v63, %v849_v11  ;;  %v4989_v63 = vld [vmem:[%s7031_s4 + $0x1b0] sm:$0xff] }
 0x439   :  { %v790_v33 = vadd.f32 %v789_v35, %v5882_v39  ;;  %v858_v22 = vmax.f32 %v808_v19, %v842_v26  ;;  %v853_v39 = vmax.f32 %v792_v4, %v837_v34 }
 0x43a   :  { %v851_v16 = vmul.f32 0.01, %v834_v5  ;;  %v866_v60 = vmax.f32 %v832_v25, %v850_v46  ;;  %v841_v9 = vmul.f32 0.01, %v804_v13  ;;  %v4990_v25 = vld [vmem:[%s7031_s4 + $0x1b8] sm:$0xff] }
 0x43b   :  { %v836_v21 = vmul.f32 0.01, %v790_v33 }
 0x43c   :  { %v867_v42 = vmax.f32 %v834_v5, %v851_v16  ;;  %v857_v59 = vmax.f32 %v804_v13, %v841_v9 }
 0x43d   :  { %v852_v35 = vmax.f32 %v790_v33, %v836_v21 }
 0x43e   :  { %966 = vmatprep.subr.mxu1 %v867_v42 }
 0x43f   :  { %967 = vmatpush1.msra.mxu1 %v866_v60 }
 0x440   :  { %968 = vmatprep.subr.mxu1 %v865_v20 }
 0x441   :  { %969 = vmatpush1.msra.mxu1 %v864_v17 }
 0x442   :  { %970 = vmatprep.subr.mxu1 %v863_v8 }
 0x443   :  { %971 = vmatpush1.msra.mxu1 %v862_v3  ;;  %v7098_v3 = vld [vmem:[#allocation4_spill] sm:$0xff] }
 0x444   :  { %972 = vmatprep.subr.mxu1 %v861_v12 }
 0x445   :  { %973 = vmatpush1.msra.mxu1 %v860_v57  ;;  %v7099_v57 = vld [vmem:[#allocation5_spill] sm:$0xff] }
 0x446   :  { %974 = vmatprep.subr.mxu1 %v859_v29 }
 0x447   :  { %975 = vmatpush1.msra.mxu1 %v858_v22 }
 0x448   :  { %976 = vmatprep.subr.mxu1 %v857_v59 }
 0x449   :  { %977 = vmatpush1.msra.mxu1 %v856_v38 }
 0x44a   :  { %978 = vmatprep.subr.mxu1 %v855_v32 }
 0x44b   :  { %979 = vmatpush1.msra.mxu1 %v854_v1 }
 0x44c   :  { %980 = vmatprep.subr.mxu1 %v853_v39  ;;  %v7101_v39 = vld [vmem:[#allocation7_spill] sm:$0xff] }
 0x44d   :  { %981 = vmatpush1.msra.mxu1 %v852_v35 }
 0x44e   :  { %4999 = vmatmul.mubr.msk.f32.vlgmr.msra.gmra.mxu1 %vm329_vm9, %v4983_v58 }
 0x44f   :  { %1020 = vmatprep.mubr.f32.mxu1 %v7097_v54 }
 0x452   :  { %5000 = vmatmul.mubr.msk.f32.gmra.mxu1 %vm329_vm9, %v4984_v24 }
 0x453   :  { %1026 = vmatprep.mubr.f32.mxu1 %v7097_v54 }
 0x456   :  { %5001 = vmatmul.mubr.msk.f32.gmra.mxu1 %vm329_vm9, %v4985_v6 }
 0x457   :  { %1032 = vmatprep.mubr.f32.mxu1 %v7097_v54 }
 0x45a   :  { %5002 = vmatmul.mubr.msk.f32.gmra.mxu1 %vm329_vm9, %v4986_v10 }
 0x45b   :  { %1038 = vmatprep.mubr.f32.mxu1 %v7097_v54 }
 0x45e   :  { %5003 = vmatmul.mubr.msk.f32.gmra.mxu1 %vm329_vm9, %v4987_v61 }
 0x45f   :  { %1044 = vmatprep.mubr.f32.mxu1 %v7097_v54 }
 0x462   :  { %5004 = vmatmul.mubr.msk.f32.gmra.mxu1 %vm329_vm9, %v4988_v36 }
 0x463   :  { %1050 = vmatprep.mubr.f32.mxu1 %v7097_v54 }
 0x466   :  { %5005 = vmatmul.mubr.msk.f32.gmra.mxu1 %vm329_vm9, %v4989_v63 }
 0x467   :  { %1056 = vmatprep.mubr.f32.mxu1 %v7097_v54 }
 0x46a   :  { %5006 = vmatmul.mubr.msk.f32.gmra.mxu1 %vm329_vm9, %v4990_v25 }
 0x46b   :  { %1383 = vmatprep.mubr.f32.mxu1 %v7097_v54 }
 0x50e   :  { %v1016_v51 = vpop.f32.mrf.mxu1 }
 0x50f   :  { %v1017_v6 = vadd.f32 %v1016_v51, %v7101_v39 }
 0x510   :  { %v1018_v41 = vpop.f32.mrf.mxu1 }
 0x511   :  { %v1019_v35 = vadd.f32 %v1018_v41, %v7101_v39 }
 0x512   :  { %v1022_v37 = vpop.f32.mrf.mxu1 }
 0x514   :  { %v1024_v5 = vpop.f32.mrf.mxu1 }
 0x516   :  { %v1028_v56 = vpop.f32.mrf.mxu1 }
 0x517   :  { %v1029_v29 = vadd.f32 %v1028_v56, %v7099_v57 }
 0x518   :  { %v1030_v46 = vpop.f32.mrf.mxu1 }
 0x519   :  { %v1067_v10 = vmul.f32 0.01, %v1029_v29 }
 0x51a   :  { %v1034_v27 = vpop.f32.mrf.mxu1 }
 0x51c   :  { %v1036_v11 = vpop.f32.mrf.mxu1 }
 0x51d   :  { %v1037_v4 = vadd.f32 %v1036_v11, %v7098_v3 }
 0x51e   :  { %v1040_v16 = vpop.f32.mrf.mxu1 }
 0x51f   :  { %v1041_v30 = vadd.f32 %v1040_v16, %v5908_v55  ;;  %v1070_v59 = vmul.f32 0.01, %v1037_v4 }
 0x520   :  { %v1042_v15 = vpop.f32.mrf.mxu1 }
 0x521   :  { %v1043_v23 = vadd.f32 %v1042_v15, %v5908_v55  ;;  %v1071_v28 = vmul.f32 0.01, %v1041_v30  ;;  %v7100_v55 = vld [vmem:[#allocation6_spill] sm:$0xff]  ;;  %v1086_v63 = vmax.f32 %v1037_v4, %v1070_v59  ;;  %v5007_v15 = vld [vmem:[%s7033_s6 + $0x60] sm:$0xff] }
 0x522   :  { %v1046_v49 = vpop.f32.mrf.mxu1  ;;  %v1025_v34 = vadd.f32 %v1024_v5, %v7100_v55  ;;  %v1023_v38 = vadd.f32 %v1022_v37, %v7100_v55  ;;  %v1064_v37 = vmul.f32 0.01, %v1019_v35 }
 0x523   :  { %v1047_v0 = vadd.f32 %v1046_v49, %v5900_v50  ;;  %v1072_v31 = vmul.f32 0.01, %v1043_v23  ;;  %v1087_v61 = vmax.f32 %v1041_v30, %v1071_v28  ;;  %v5008_v49 = vld [vmem:[%s7033_s6 + $0x68] sm:$0xff] }
 0x524   :  { %v1048_v44 = vpop.f32.mrf.mxu1  ;;  %v1066_v36 = vmul.f32 0.01, %v1025_v34  ;;  %v1065_v25 = vmul.f32 0.01, %v1023_v38  ;;  %v1080_v51 = vmax.f32 %v1019_v35, %v1064_v37 }
 0x525   :  { %v1049_v20 = vadd.f32 %v1048_v44, %v5900_v50  ;;  %v1073_v33 = vmul.f32 0.01, %v1047_v0  ;;  %v1088_v24 = vmax.f32 %v1043_v23, %v1072_v31 }
 0x526   :  { %v1052_v45 = vpop.f32.mrf.mxu1  ;;  %v1082_v41 = vmax.f32 %v1025_v34, %v1066_v36  ;;  %v1081_v11 = vmax.f32 %v1023_v38, %v1065_v25  ;;  %v7103_v38 = vld [vmem:[#allocation9_spill] sm:$0xff]  ;;  %v7104_v25 = vld [vmem:[#allocation10_spill] sm:$0xff] }
 0x527   :  { %v1053_v13 = vadd.f32 %v1052_v45, %v5898_v47  ;;  %v1074_v9 = vmul.f32 0.01, %v1049_v20  ;;  %v1089_v1 = vmax.f32 %v1047_v0, %v1073_v33  ;;  %v7102_v45 = vld [vmem:[#allocation8_spill] sm:$0xff]  ;;  %vm1210_vm11 = vcmp.eq.s32.totalorder %v7104_v25, 1  ;;  %v7112_v25 = vld [vmem:[#allocation18_spill] sm:$0xff] }
 0x528   :  { %v1054_v42 = vpop.f32.mrf.mxu1 }
 0x529   :  { %v1055_v62 = vadd.f32 %v1054_v42, %v5898_v47  ;;  %v1075_v26 = vmul.f32 0.01, %v1053_v13  ;;  %v1035_v47 = vadd.f32 %v1034_v27, %v7098_v3  ;;  %v1090_v21 = vmax.f32 %v1049_v20, %v1074_v9 }
 0x52a   :  { %v1058_v19 = vpop.f32.mrf.mxu1  ;;  %v1083_v27 = vmax.f32 %v1029_v29, %v1067_v10 }
 0x52b   :  { %v1059_v60 = vadd.f32 %v1058_v19, %v5884_v40  ;;  %v1076_v2 = vmul.f32 0.01, %v1055_v62  ;;  %v1091_v22 = vmax.f32 %v1053_v13, %v1075_v26  ;;  %v1069_v32 = vmul.f32 0.01, %v1035_v47 }
 0x52c   :  { %v1060_v48 = vpop.f32.mrf.mxu1  ;;  %v617_v19 = vrot.slane %v6172_v7, 4  ;;  %v623_v13 = vrot.slane %v6175_v43, 4 }
 0x52d   :  { %v1061_v18 = vadd.f32 %v1060_v48, %v5884_v40  ;;  %v1077_v17 = vmul.f32 0.01, %v1059_v60  ;;  %v1031_v40 = vadd.f32 %v1030_v46, %v7099_v57  ;;  %v1092_v50 = vmax.f32 %v1055_v62, %v1076_v2 }
 0x52e   :  { %v1085_v5 = vmax.f32 %v1035_v47, %v1069_v32  ;;  %v1063_v46 = vmul.f32 0.01, %v1017_v6  ;;  %v618_v48 = vadd.f32 %v6172_v7, %v617_v19  ;;  %v624_v20 = vadd.f32 %v6175_v43, %v623_v13 }
 0x52f   :  { %v1078_v8 = vmul.f32 0.01, %v1061_v18  ;;  %v1093_v52 = vmax.f32 %v1059_v60, %v1077_v17  ;;  %v1068_v58 = vmul.f32 0.01, %v1031_v40 }
 0x530   :  { %v1079_v16 = vmax.f32 %v1017_v6, %v1063_v46  ;;  %v625_v0 = vrot.slane %v624_v20, 2  ;;  %v7105_v46 = vld [vmem:[#allocation11_spill] sm:$0xff] }
 0x531   :  { %v1094_v12 = vmax.f32 %v1061_v18, %v1078_v8  ;;  %v1084_v56 = vmax.f32 %v1031_v40, %v1068_v58  ;;  %v619_v18 = vrot.slane %v618_v48, 2 }
 0x532   :  { %v626_v2 = vadd.f32 %v625_v0, %v624_v20 }
 0x533   :  { %1133 = vmatprep.subr.mxu0 %v1094_v12  ;;  %v620_v17 = vadd.f32 %v619_v18, %v618_v48 }
 0x534   :  { %1134 = vmatpush1.msra.mxu0 %v1093_v52  ;;  %v627_v33 = vrot.slane %v626_v2, 1 }
 0x535   :  { %1135 = vmatprep.subr.mxu0 %v1092_v50  ;;  %v621_v3 = vrot.slane %v620_v17, 1 }
 0x536   :  { %1136 = vmatpush1.msra.mxu0 %v1091_v22  ;;  %v628_v22 = vadd.f32 %v627_v33, %v626_v2  ;;  %v7108_v33 = vld [vmem:[#allocation14_spill] sm:$0xff] }
 0x537   :  { %1137 = vmatprep.subr.mxu0 %v1090_v21  ;;  %v622_v40 = vadd.f32 %v621_v3, %v620_v17 }
 0x538   :  { %1138 = vmatpush1.msra.mxu0 %v1089_v1  ;;  %v630_v1 = vsub.f32 0.0, %v628_v22 }
 0x539   :  { %1139 = vmatprep.subr.mxu0 %v1088_v24  ;;  %v629_v55 = vsub.f32 0.0, %v622_v40 }
 0x53a   :  { %1140 = vmatpush1.msra.mxu0 %v1087_v61 }
 0x53b   :  { %1141 = vmatprep.subr.mxu0 %v1086_v63 }
 0x53c   :  { %1142 = vmatpush1.msra.mxu0 %v1085_v5 }
 0x53d   :  { %1143 = vmatprep.subr.mxu0 %v1084_v56 }
 0x53e   :  { %1144 = vmatpush1.msra.mxu0 %v1083_v27 }
 0x53f   :  { %1145 = vmatprep.subr.mxu0 %v1082_v41 }
 0x540   :  { %1146 = vmatpush1.msra.mxu0 %v1081_v11  ;;  %v5014_v11 = vld [vmem:[%s7029_s2 + $0x140] sm:$0xff] }
 0x541   :  { %1147 = vmatprep.subr.mxu0 %v1080_v51  ;;  %v5017_v51 = vld [vmem:[%s7029_s2 + $0x158] sm:$0xff] }
 0x542   :  { %1148 = vmatpush1.msra.mxu0 %v1079_v16  ;;  %v5018_v16 = vld [vmem:[%s7029_s2 + $0x160] sm:$0xff] }
 0x543   :  { %5011 = vmatmul.mubr.msk.f32.vlgmr.msra.gmra.mxu0 %vm329_vm9, %v5007_v15  ;;  %v5019_v15 = vld [vmem:[%s7029_s2 + $0x168] sm:$0xff] }
 0x544   :  { %1187 = vmatprep.mubr.f32.mxu0 %v7097_v54 }
 0x547   :  { %5012 = vmatmul.mubr.msk.f32.gmra.mxu0 %vm329_vm9, %v5008_v49  ;;  %v5020_v49 = vld [vmem:[%s7029_s2 + $0x170] sm:$0xff] }
 0x548   :  { %1610 = vmatprep.mubr.f32.mxu0 %v7097_v54 }
 0x603   :  { %v1183_v44 = vpop.f32.mrf.mxu0 }
 0x604   :  { %v1184_v42 = vadd.f32 %v1183_v44, %v7102_v45  ;;  %v5021_v44 = vld [vmem:[%s7029_s2 + $0x178] sm:$0xff] }
 0x605   :  { %v1185_v62 = vpop.f32.mrf.mxu0 }
 0x606   :  { %5335 = vtanh.f32 %v1184_v42  ;;  %v1186_v60 = vadd.f32 %v1185_v62, %v7102_v45 }
 0x607   :  { %v1189_v50 = vpop.f32.mrf.mxu0 }
 0x608   :  { %5337 = vtanh.f32 %v1186_v60  ;;  %v1190_v32 = vadd.f32 %v1189_v50, %v7103_v38 }
 0x609   :  { %v1191_v21 = vpop.f32.mrf.mxu0 }
 0x60a   :  { %v1192_v58 = vadd.f32 %v1191_v21, %v7103_v38  ;;  %v1196_v6 = vsub.f32 %v6184_v53, %v1190_v32 }
 0x60c   :  { %v1197_v36 = vsub.f32 %v6187_v14, %v1192_v58 }
 0x613   :  { %v5336_v23 = vpop.eup %5335 }
 0x614   :  { %v1213_v8 = vrot.slane %v5336_v23, 4  ;;  %v1198_v30 = vsub.f32 0.0, %v5336_v23 }
 0x615   :  { %v5338_v26 = vpop.eup %5337 }
 0x616   :  { %v1214_v4 = vadd.f32 %v5336_v23, %v1213_v8  ;;  %v1219_v9 = vrot.slane %v5338_v26, 4  ;;  %v1200_v12 = vmul.f32 1.442695, %v1198_v30  ;;  %v1199_v47 = vsub.f32 0.0, %v5338_v26 }
 0x618   :  { %v1215_v52 = vrot.slane %v1214_v4, 2  ;;  %v1220_v57 = vadd.f32 %v5338_v26, %v1219_v9  ;;  %5339 = vpow2.f32 %v1200_v12  ;;  %v1202_v7 = vmul.f32 1.442695, %v1199_v47  ;;  %v7106_v26 = vld [vmem:[#allocation13_spill] sm:$0xff] }
 0x61a   :  { %v1216_v43 = vadd.f32 %v1215_v52, %v1214_v4  ;;  %v1221_v31 = vrot.slane %v1220_v57, 2  ;;  %5341 = vpow2.f32 %v1202_v7  ;;  %v7107_v4 = vld [vmem:[#allocation12_spill] sm:$0xff] }
 0x61c   :  { %v1217_v29 = vrot.slane %v1216_v43, 1  ;;  %v1222_v28 = vadd.f32 %v1221_v31, %v1220_v57 }
 0x61e   :  { %v1218_v34 = vadd.f32 %v1217_v29, %v1216_v43  ;;  %v1223_v59 = vrot.slane %v1222_v28, 1  ;;  %v7109_v43 = vld [vmem:[#allocation15_spill] sm:$0xff] }
 0x620   :  { %v1224_v39 = vadd.f32 %v1223_v59, %v1222_v28  ;;  %v6322_v35 = vsub.f32 %v629_v55, %v1218_v34  ;;  %v7110_v55 = vld [vmem:[#allocation16_spill] sm:$0xff] }
 0x622   :  { %v6325_v24 = vsub.f32 %v630_v1, %v1224_v39  ;;  %v7111_v39 = vld [vmem:[#allocation17_spill] sm:$0xff] }
 0x625   :  { %v5340_v10 = vpop.eup %5339 }
 0x626   :  { %v1204_v61 = vmul.f32 %v5340_v10, %v1196_v6 }
 0x627   :  { %v5342_v63 = vpop.eup %5341 }
 0x628   :  { %v1205_v5 = vmul.f32 %v5342_v63, %v1197_v36  ;;  %v6331_v37 = vsel %vm1210_vm11, %v6184_v53, %v1204_v61  ;;  %v5015_v53 = vld [vmem:[%s7029_s2 + $0x148] sm:$0xff] }
 0x629   :  { %v1235_v41 = vmul.f32 %v7105_v46, %v6331_v37 }
 0x62a   :  { %v6334_v56 = vsel %vm1210_vm11, %v6187_v14, %v1205_v5  ;;  %v5016_v14 = vld [vmem:[%s7029_s2 + $0x150] sm:$0xff] }
 0x62b   :  { %v1236_v27 = vmul.f32 %v7105_v46, %v6334_v56 }
 0x62d   :  { %1349 = vmatprep.subr.mxu1 %v1236_v27 }
 0x62e   :  { %1350 = vmatpush1.msra.mxu1 %v1235_v41 }
 0x62f   :  { %5030 = vmatmul.mubr.msk.f32.vlgmr.msra.gmra.mxu1 %vm101_vm3, %v5014_v11 }
 0x630   :  { %1389 = vmatprep.mubr.f32.mxu1 %v7097_v54 }
 0x633   :  { %5031 = vmatmul.mubr.msk.f32.gmra.mxu1 %vm101_vm3, %v5015_v53 }
 0x634   :  { %1395 = vmatprep.mubr.f32.mxu1 %v7097_v54 }
 0x637   :  { %5032 = vmatmul.mubr.msk.f32.gmra.mxu1 %vm101_vm3, %v5016_v14  ;;  %v7113_v14 = vld [vmem:[#allocation19_spill] sm:$0xff] }
 0x638   :  { %1401 = vmatprep.mubr.f32.mxu1 %v7097_v54 }
 0x63b   :  { %5033 = vmatmul.mubr.msk.f32.gmra.mxu1 %vm101_vm3, %v5017_v51 }
 0x63c   :  { %1407 = vmatprep.mubr.f32.mxu1 %v7097_v54 }
 0x63f   :  { %5034 = vmatmul.mubr.msk.f32.gmra.mxu1 %vm101_vm3, %v5018_v16 }
 0x640   :  { %1413 = vmatprep.mubr.f32.mxu1 %v7097_v54 }
 0x643   :  { %5035 = vmatmul.mubr.msk.f32.gmra.mxu1 %vm101_vm3, %v5019_v15 }
 0x644   :  { %1419 = vmatprep.mubr.f32.mxu1 %v7097_v54 }
 0x647   :  { %5036 = vmatmul.mubr.msk.f32.gmra.mxu1 %vm101_vm3, %v5020_v49 }
 0x648   :  { %1425 = vmatprep.mubr.f32.mxu1 %v7097_v54 }
 0x64b   :  { %5037 = vmatmul.mubr.msk.f32.gmra.mxu1 %vm101_vm3, %v5021_v44 }
 0x64c   :  { %1777 = vmatprep.mubr.f32.mxu1 %v7097_v54 }
 0x6ef   :  { %v1385_v45 = vpop.f32.mrf.mxu1 }
 0x6f0   :  { %v1386_v49 = vadd.f32 %v1385_v45, %v7113_v14 }
 0x6f1   :  { %v1387_v42 = vpop.f32.mrf.mxu1 }
 0x6f2   :  { %v1388_v51 = vadd.f32 %v1387_v42, %v7113_v14  ;;  %v7118_v14 = vld [vmem:[#allocation24_spill] sm:$0xff] }
 0x6f3   :  { %v1391_v19 = vpop.f32.mrf.mxu1 }
 0x6f4   :  { %v1392_v41 = vadd.f32 %v1391_v19, %v7112_v25  ;;  %v1433_v19 = vmul.f32 0.01, %v1388_v51 }
 0x6f5   :  { %v1393_v62 = vpop.f32.mrf.mxu1 }
 0x6f6   :  { %v1394_v5 = vadd.f32 %v1393_v62, %v7112_v25  ;;  %v1449_v45 = vmax.f32 %v1388_v51, %v1433_v19 }
 0x6f7   :  { %v1397_v60 = vpop.f32.mrf.mxu1 }
 0x6f8   :  { %v1398_v61 = vadd.f32 %v1397_v60, %v7111_v39 }
 0x6f9   :  { %v1399_v13 = vpop.f32.mrf.mxu1 }
 0x6fa   :  { %v1400_v58 = vadd.f32 %v1399_v13, %v7111_v39  ;;  %v1436_v44 = vmul.f32 0.01, %v1398_v61  ;;  %v1435_v13 = vmul.f32 0.01, %v1394_v5 }
 0x6fb   :  { %v1403_v48 = vpop.f32.mrf.mxu1 }
 0x6fc   :  { %v1404_v38 = vadd.f32 %v1403_v48, %v7110_v55  ;;  %v1437_v16 = vmul.f32 0.01, %v1400_v58  ;;  %v1434_v48 = vmul.f32 0.01, %v1392_v41  ;;  %v1451_v42 = vmax.f32 %v1394_v5, %v1435_v13  ;;  %v7117_v5 = vld [vmem:[#allocation23_spill] sm:$0xff]  ;;  %v7119_v13 = vld [vmem:[#allocation25_spill] sm:$0xff] }
 0x6fd   :  { %v1405_v20 = vpop.f32.mrf.mxu1 }
 0x6fe   :  { %v1406_v34 = vadd.f32 %v1405_v20, %v7110_v55  ;;  %v1438_v11 = vmul.f32 0.01, %v1404_v38 }
 0x6ff   :  { %v1409_v18 = vpop.f32.mrf.mxu1 }
 0x700   :  { %v1410_v28 = vadd.f32 %v1409_v18, %v7109_v43  ;;  %v1439_v46 = vmul.f32 0.01, %v1406_v34  ;;  %v1454_v20 = vmax.f32 %v1404_v38, %v1438_v11  ;;  %v1453_v18 = vmax.f32 %v1400_v58, %v1437_v16  ;;  %v7114_v38 = vld [vmem:[#allocation21_spill] sm:$0xff] }
 0x701   :  { %v1411_v0 = vpop.f32.mrf.mxu1 }
 0x702   :  { %v1412_v31 = vadd.f32 %v1411_v0, %v7109_v43  ;;  %v1440_v36 = vmul.f32 0.01, %v1410_v28  ;;  %v1455_v62 = vmax.f32 %v1406_v34, %v1439_v46  ;;  %v1432_v0 = vmul.f32 0.01, %v1386_v49 }
 0x703   :  { %v1415_v17 = vpop.f32.mrf.mxu1 }
 0x704   :  { %v1416_v7 = vadd.f32 %v1415_v17, %v7108_v33  ;;  %v1441_v6 = vmul.f32 0.01, %v1412_v31  ;;  %v1456_v60 = vmax.f32 %v1410_v28, %v1440_v36  ;;  %v1452_v17 = vmax.f32 %v1398_v61, %v1436_v44 }
 0x705   :  { %v1417_v23 = vpop.f32.mrf.mxu1 }
 0x706   :  { %v1418_v52 = vadd.f32 %v1417_v23, %v7108_v33  ;;  %v1442_v32 = vmul.f32 0.01, %v1416_v7  ;;  %v1457_v15 = vmax.f32 %v1412_v31, %v1441_v6  ;;  %v1450_v23 = vmax.f32 %v1392_v41, %v1434_v48 }
 0x707   :  { %v1421_v2 = vpop.f32.mrf.mxu1 }
 0x708   :  { %v1422_v12 = vadd.f32 %v1421_v2, %v7106_v26  ;;  %v1443_v59 = vmul.f32 0.01, %v1418_v52  ;;  %v1458_v53 = vmax.f32 %v1416_v7, %v1442_v32  ;;  %v1448_v2 = vmax.f32 %v1386_v49, %v1432_v0 }
 0x709   :  { %v1423_v8 = vpop.f32.mrf.mxu1 }
 0x70a   :  { %v1424_v3 = vadd.f32 %v1423_v8, %v7106_v26  ;;  %v1444_v22 = vmul.f32 0.01, %v1422_v12  ;;  %v1459_v27 = vmax.f32 %v1418_v52, %v1443_v59  ;;  %v5038_v8 = vld [vmem:[%s7031_s4 + $0x140] sm:$0xff]  ;;  %v5040_v26 = vld [vmem:[%s7031_s4 + $0x150] sm:$0xff] }
 0x70b   :  { %v1427_v30 = vpop.f32.mrf.mxu1 }
 0x70c   :  { %v1428_v9 = vadd.f32 %v1427_v30, %v7107_v4  ;;  %v1445_v50 = vmul.f32 0.01, %v1424_v3  ;;  %v1460_v63 = vmax.f32 %v1422_v12, %v1444_v22  ;;  %v5039_v30 = vld [vmem:[%s7031_s4 + $0x148] sm:$0xff]  ;;  %v5044_v12 = vld [vmem:[%s7031_s4 + $0x170] sm:$0xff] }
 0x70d   :  { %v1429_v47 = vpop.f32.mrf.mxu1 }
 0x70e   :  { %v1430_v57 = vadd.f32 %v1429_v47, %v7107_v4  ;;  %v1446_v40 = vmul.f32 0.01, %v1428_v9  ;;  %v1461_v10 = vmax.f32 %v1424_v3, %v1445_v50  ;;  %v5041_v3 = vld [vmem:[%s7031_s4 + $0x158] sm:$0xff]  ;;  %v5042_v4 = vld [vmem:[%s7031_s4 + $0x160] sm:$0xff] }
 0x70f   :  { %v5045_v47 = vld [vmem:[%s7031_s4 + $0x178] sm:$0xff] }
 0x710   :  { %v1447_v29 = vmul.f32 0.01, %v1430_v57  ;;  %v1462_v1 = vmax.f32 %v1428_v9, %v1446_v40  ;;  %v5043_v9 = vld [vmem:[%s7031_s4 + $0x168] sm:$0xff] }
 0x712   :  { %v1463_v21 = vmax.f32 %v1430_v57, %v1447_v29 }
 0x714   :  { %1562 = vmatprep.subr.mxu0 %v1463_v21 }
 0x715   :  { %1563 = vmatpush1.msra.mxu0 %v1462_v1  ;;  %v7115_v1 = vld [vmem:[#allocation20_spill] sm:$0xff] }
 0x716   :  { %1564 = vmatprep.subr.mxu0 %v1461_v10  ;;  %v7116_v10 = vld [vmem:[#allocation22_spill] sm:$0xff] }
 0x717   :  { %1565 = vmatpush1.msra.mxu0 %v1460_v63 }
 0x718   :  { %1566 = vmatprep.subr.mxu0 %v1459_v27 }
 0x719   :  { %1567 = vmatpush1.msra.mxu0 %v1458_v53 }
 0x71a   :  { %1568 = vmatprep.subr.mxu0 %v1457_v15 }
 0x71b   :  { %1569 = vmatpush1.msra.mxu0 %v1456_v60 }
 0x71c   :  { %1570 = vmatprep.subr.mxu0 %v1455_v62 }
 0x71d   :  { %1571 = vmatpush1.msra.mxu0 %v1454_v20 }
 0x71e   :  { %1572 = vmatprep.subr.mxu0 %v1453_v18 }
 0x71f   :  { %1573 = vmatpush1.msra.mxu0 %v1452_v17  ;;  %v7120_v17 = vld [vmem:[#allocation26_spill] sm:$0xff] }
 0x720   :  { %1574 = vmatprep.subr.mxu0 %v1451_v42 }
 0x721   :  { %1575 = vmatpush1.msra.mxu0 %v1450_v23 }
 0x722   :  { %1576 = vmatprep.subr.mxu0 %v1449_v45 }
 0x723   :  { %1577 = vmatpush1.msra.mxu0 %v1448_v2 }
 0x724   :  { %5054 = vmatmul.mubr.msk.f32.vlgmr.msra.gmra.mxu0 %vm329_vm9, %v5038_v8 }
 0x725   :  { %1616 = vmatprep.mubr.f32.mxu0 %v7097_v54 }
 0x728   :  { %5055 = vmatmul.mubr.msk.f32.gmra.mxu0 %vm329_vm9, %v5039_v30 }
 0x729   :  { %1622 = vmatprep.mubr.f32.mxu0 %v7097_v54 }
 0x72c   :  { %5056 = vmatmul.mubr.msk.f32.gmra.mxu0 %vm329_vm9, %v5040_v26  ;;  %v7121_v26 = vld [vmem:[#allocation27_spill] sm:$0xff] }
 0x72d   :  { %1628 = vmatprep.mubr.f32.mxu0 %v7097_v54 }
 0x730   :  { %5057 = vmatmul.mubr.msk.f32.gmra.mxu0 %vm329_vm9, %v5041_v3 }
 0x731   :  { %1634 = vmatprep.mubr.f32.mxu0 %v7097_v54 }
 0x734   :  { %5058 = vmatmul.mubr.msk.f32.gmra.mxu0 %vm329_vm9, %v5042_v4 }
 0x735   :  { %1640 = vmatprep.mubr.f32.mxu0 %v7097_v54 }
 0x738   :  { %5059 = vmatmul.mubr.msk.f32.gmra.mxu0 %vm329_vm9, %v5043_v9 }
 0x739   :  { %1646 = vmatprep.mubr.f32.mxu0 %v7097_v54 }
 0x73c   :  { %5060 = vmatmul.mubr.msk.f32.gmra.mxu0 %vm329_vm9, %v5044_v12 }
 0x73d   :  { %1652 = vmatprep.mubr.f32.mxu0 %v7097_v54 }
 0x740   :  { %5061 = vmatmul.mubr.msk.f32.gmra.mxu0 %vm329_vm9, %v5045_v47 }
 0x741   :  { %2206 = vmatprep.mubr.f32.mxu0 %v7097_v54 }
 0x7e4   :  { %v1612_v33 = vpop.f32.mrf.mxu0 }
 0x7e5   :  { %v1613_v12 = vadd.f32 %v1612_v33, %v7121_v26 }
 0x7e6   :  { %v1614_v52 = vpop.f32.mrf.mxu0 }
 0x7e7   :  { %v1615_v3 = vadd.f32 %v1614_v52, %v7121_v26 }
 0x7e8   :  { %v1618_v57 = vpop.f32.mrf.mxu0 }
 0x7e9   :  { %v1619_v2 = vadd.f32 %v1618_v57, %v7120_v17  ;;  %v1660_v57 = vmul.f32 0.01, %v1615_v3 }
 0x7ea   :  { %v1620_v7 = vpop.f32.mrf.mxu0 }
 0x7eb   :  { %v1621_v42 = vadd.f32 %v1620_v7, %v7120_v17  ;;  %v1676_v33 = vmax.f32 %v1615_v3, %v1660_v57  ;;  %v7125_v3 = vld [vmem:[#allocation31_spill] sm:$0xff] }
 0x7ec   :  { %v1624_v40 = vpop.f32.mrf.mxu0 }
 0x7ed   :  { %v1625_v19 = vadd.f32 %v1624_v40, %v7119_v13 }
 0x7ee   :  { %v1626_v43 = vpop.f32.mrf.mxu0 }
 0x7ef   :  { %v1627_v62 = vadd.f32 %v1626_v43, %v7119_v13  ;;  %v1663_v47 = vmul.f32 0.01, %v1625_v19  ;;  %v1662_v43 = vmul.f32 0.01, %v1621_v42  ;;  %v7123_v13 = vld [vmem:[#allocation29_spill] sm:$0xff] }
 0x7f0   :  { %v1630_v31 = vpop.f32.mrf.mxu0 }
 0x7f1   :  { %v1631_v49 = vadd.f32 %v1630_v31, %v7118_v14  ;;  %v1664_v4 = vmul.f32 0.01, %v1627_v62  ;;  %v1661_v31 = vmul.f32 0.01, %v1619_v2  ;;  %v1678_v52 = vmax.f32 %v1621_v42, %v1662_v43  ;;  %v5074_v43 = vld [vmem:[%s7029_s2 + $0x128] sm:$0xff] }
 0x7f2   :  { %v1632_v50 = vpop.f32.mrf.mxu0 }
 0x7f3   :  { %v1633_v51 = vadd.f32 %v1632_v50, %v7118_v14  ;;  %v1665_v8 = vmul.f32 0.01, %v1631_v49 }
 0x7f4   :  { %v1636_v29 = vpop.f32.mrf.mxu0 }
 0x7f5   :  { %v1637_v11 = vadd.f32 %v1636_v29, %v7117_v5  ;;  %v1666_v23 = vmul.f32 0.01, %v1633_v51  ;;  %v1681_v50 = vmax.f32 %v1631_v49, %v1665_v8  ;;  %v1680_v29 = vmax.f32 %v1627_v62, %v1664_v4 }
 0x7f6   :  { %v1638_v28 = vpop.f32.mrf.mxu0 }
 0x7f7   :  { %v1639_v46 = vadd.f32 %v1638_v28, %v7117_v5  ;;  %v1667_v18 = vmul.f32 0.01, %v1637_v11  ;;  %v1682_v7 = vmax.f32 %v1633_v51, %v1666_v23  ;;  %v1659_v28 = vmul.f32 0.01, %v1613_v12 }
 0x7f8   :  { %v1642_v22 = vpop.f32.mrf.mxu0 }
 0x7f9   :  { %v1643_v63 = vadd.f32 %v1642_v22, %v7116_v10  ;;  %v1668_v48 = vmul.f32 0.01, %v1639_v46  ;;  %v1683_v40 = vmax.f32 %v1637_v11, %v1667_v18  ;;  %v1679_v22 = vmax.f32 %v1625_v19, %v1663_v47  ;;  %v5072_v47 = vld [vmem:[%s7029_s2 + $0x118] sm:$0xff] }
 0x7fa   :  { %v1644_v55 = vpop.f32.mrf.mxu0 }
 0x7fb   :  { %v1645_v61 = vadd.f32 %v1644_v55, %v7116_v10  ;;  %v1669_v44 = vmul.f32 0.01, %v1643_v63  ;;  %v1684_v9 = vmax.f32 %v1639_v46, %v1668_v48  ;;  %v1677_v55 = vmax.f32 %v1619_v2, %v1661_v31  ;;  %v7124_v2 = vld [vmem:[#allocation30_spill] sm:$0xff] }
 0x7fc   :  { %v1648_v34 = vpop.f32.mrf.mxu0  ;;  %vm1806_vm12 = vcmp.eq.s32.totalorder %v7124_v2, 1  ;;  %v5076_v31 = vld [vmem:[%s7029_s2 + $0x138] sm:$0xff] }
 0x7fd   :  { %v1649_v58 = vadd.f32 %v1648_v34, %v7114_v38  ;;  %v1670_v16 = vmul.f32 0.01, %v1645_v61  ;;  %v1685_v30 = vmax.f32 %v1643_v63, %v1669_v44  ;;  %v1675_v34 = vmax.f32 %v1613_v12, %v1659_v28  ;;  %v5069_v12 = vld [vmem:[%s7029_s2 + $0x100] sm:$0xff] }
 0x7fe   :  { %v1650_v59 = vpop.f32.mrf.mxu0 }
 0x7ff   :  { %v1651_v32 = vadd.f32 %v1650_v59, %v7114_v38  ;;  %v1671_v53 = vmul.f32 0.01, %v1649_v58  ;;  %v1686_v45 = vmax.f32 %v1645_v61, %v1670_v16  ;;  %v5062_v59 = vld [vmem:[%s7033_s6 + $0x50] sm:$0xff] }
 0x800   :  { %v1654_v21 = vpop.f32.mrf.mxu0 }
 0x801   :  { %v1655_v39 = vadd.f32 %v1654_v21, %v7115_v1  ;;  %v1672_v27 = vmul.f32 0.01, %v1651_v32  ;;  %v1687_v0 = vmax.f32 %v1649_v58, %v1671_v53  ;;  %v5063_v21 = vld [vmem:[%s7033_s6 + $0x58] sm:$0xff] }
 0x802   :  { %v1656_v6 = vpop.f32.mrf.mxu0 }
 0x803   :  { %v1657_v36 = vadd.f32 %v1656_v6, %v7115_v1  ;;  %v1673_v25 = vmul.f32 0.01, %v1655_v39  ;;  %v1688_v20 = vmax.f32 %v1651_v32, %v1672_v27  ;;  %v7122_v32 = vld [vmem:[#allocation28_spill] sm:$0xff] }
 0x805   :  { %v1674_v41 = vmul.f32 0.01, %v1657_v36  ;;  %v1689_v60 = vmax.f32 %v1655_v39, %v1673_v25 }
 0x807   :  { %v1690_v15 = vmax.f32 %v1657_v36, %v1674_v41 }
 0x809   :  { %1729 = vmatprep.subr.mxu1 %v1690_v15 }
 0x80a   :  { %1730 = vmatpush1.msra.mxu1 %v1689_v60 }
 0x80b   :  { %1731 = vmatprep.subr.mxu1 %v1688_v20 }
 0x80c   :  { %1732 = vmatpush1.msra.mxu1 %v1687_v0 }
 0x80d   :  { %1733 = vmatprep.subr.mxu1 %v1686_v45 }
 0x80e   :  { %1734 = vmatpush1.msra.mxu1 %v1685_v30 }
 0x80f   :  { %1735 = vmatprep.subr.mxu1 %v1684_v9 }
 0x810   :  { %1736 = vmatpush1.msra.mxu1 %v1683_v40  ;;  %v5073_v40 = vld [vmem:[%s7029_s2 + $0x120] sm:$0xff] }
 0x811   :  { %1737 = vmatprep.subr.mxu1 %v1682_v7  ;;  %v5075_v7 = vld [vmem:[%s7029_s2 + $0x130] sm:$0xff] }
 0x812   :  { %1738 = vmatpush1.msra.mxu1 %v1681_v50 }
 0x813   :  { %1739 = vmatprep.subr.mxu1 %v1680_v29 }
 0x814   :  { %1740 = vmatpush1.msra.mxu1 %v1679_v22 }
 0x815   :  { %1741 = vmatprep.subr.mxu1 %v1678_v52 }
 0x816   :  { %1742 = vmatpush1.msra.mxu1 %v1677_v55 }
 0x817   :  { %1743 = vmatprep.subr.mxu1 %v1676_v33 }
 0x818   :  { %1744 = vmatpush1.msra.mxu1 %v1675_v34 }
 0x819   :  { %5066 = vmatmul.mubr.msk.f32.vlgmr.msra.gmra.mxu1 %vm329_vm9, %v5062_v59 }
 0x81a   :  { %1783 = vmatprep.mubr.f32.mxu1 %v7097_v54 }
 0x81d   :  { %5067 = vmatmul.mubr.msk.f32.gmra.mxu1 %vm329_vm9, %v5063_v21 }
 0x81e   :  { %1979 = vmatprep.mubr.f32.mxu1 %v7097_v54 }
 0x8d9   :  { %v1779_v38 = vpop.f32.mrf.mxu1 }
 0x8da   :  { %v1780_v1 = vadd.f32 %v1779_v38, %v7122_v32  ;;  %v1884_v38 = vpop.permute.xlu0 %1883 }
 0x8db   :  { %v1781_v39 = vpop.f32.mrf.mxu1 }
 0x8dc   :  { %5343 = vtanh.f32 %v1780_v1  ;;  %v1782_v58 = vadd.f32 %v1781_v39, %v7122_v32  ;;  %v1879_v39 = vpop.permute.xlu1 %1878 }
 0x8dd   :  { %v1785_v51 = vpop.f32.mrf.mxu1 }
 0x8de   :  { %5345 = vtanh.f32 %v1782_v58  ;;  %v1786_v62 = vadd.f32 %v1785_v51, %v7123_v13 }
 0x8df   :  { %v1787_v60 = vpop.f32.mrf.mxu1 }
 0x8e0   :  { %v1788_v19 = vadd.f32 %v1787_v60, %v7123_v13  ;;  %v1792_v0 = vsub.f32 %v6331_v37, %v1786_v62 }
 0x8e2   :  { %v1793_v23 = vsub.f32 %v6334_v56, %v1788_v19 }
 0x8e9   :  { %v5344_v6 = vpop.eup %5343 }
 0x8ea   :  { %v1809_v10 = vrot.slane %v5344_v6, 4  ;;  %v1794_v61 = vsub.f32 0.0, %v5344_v6 }
 0x8eb   :  { %v5346_v36 = vpop.eup %5345 }
 0x8ec   :  { %v1810_v63 = vadd.f32 %v5344_v6, %v1809_v10  ;;  %v1815_v25 = vrot.slane %v5346_v36, 4  ;;  %v1796_v5 = vmul.f32 1.442695, %v1794_v61  ;;  %v1795_v46 = vsub.f32 0.0, %v5346_v36  ;;  %v1874_v6 = vpop.permute.xlu0 %1873 }
 0x8ee   :  { %v1811_v27 = vrot.slane %v1810_v63, 2  ;;  %v1816_v41 = vadd.f32 %v5346_v36, %v1815_v25  ;;  %5347 = vpow2.f32 %v1796_v5  ;;  %v1798_v11 = vmul.f32 1.442695, %v1795_v46  ;;  %v7126_v36 = vld [vmem:[#allocation32_spill] sm:$0xff] }
 0x8f0   :  { %v1812_v53 = vadd.f32 %v1811_v27, %v1810_v63  ;;  %v1817_v14 = vrot.slane %v1816_v41, 2  ;;  %5349 = vpow2.f32 %v1798_v11 }
 0x8f2   :  { %v1813_v16 = vrot.slane %v1812_v53, 1  ;;  %v1818_v15 = vadd.f32 %v1817_v14, %v1816_v41  ;;  %v1869_v41 = vpop.permute.xlu1 %1868 }
 0x8f4   :  { %v6464_v49 = vadd.f32 %v1813_v16, %v1812_v53  ;;  %v1819_v44 = vrot.slane %v1818_v15, 1 }
 0x8f6   :  { %v6467_v48 = vadd.f32 %v1819_v44, %v1818_v15  ;;  %v1821_v20 = vsub.f32 %v6322_v35, %v6464_v49  ;;  %v1864_v15 = vpop.permute.xlu0 %1863 }
 0x8f8   :  { %v1822_v18 = vsub.f32 %v6325_v24, %v6467_v48 }
 0x8fb   :  { %v5348_v17 = vpop.eup %5347 }
 0x8fc   :  { %v1800_v42 = vmul.f32 %v5348_v17, %v1792_v0 }
 0x8fd   :  { %v5350_v45 = vpop.eup %5349 }
 0x8fe   :  { %v1801_v8 = vmul.f32 %v5350_v45, %v1793_v23  ;;  %v6478_v30 = vsel %vm1806_vm12, %v6331_v37, %v1800_v42  ;;  %v5070_v37 = vld [vmem:[%s7029_s2 + $0x108] sm:$0xff] }
 0x8ff   :  { %v1831_v9 = vmul.f32 %v7125_v3, %v6478_v30 }
 0x900   :  { %v6481_v26 = vsel %vm1806_vm12, %v6334_v56, %v1801_v8  ;;  %v5071_v56 = vld [vmem:[%s7029_s2 + $0x110] sm:$0xff]  ;;  %v1859_v8 = vpop.permute.xlu1 %1858 }
 0x901   :  { %v1832_v4 = vmul.f32 %v7125_v3, %v6481_v26 }
 0x903   :  { %1945 = vmatprep.subr.mxu1 %v1832_v4 }
 0x904   :  { %1946 = vmatpush1.msra.mxu1 %v1831_v9 }
 0x905   :  { %5085 = vmatmul.mubr.msk.f32.vlgmr.msra.gmra.mxu1 %vm101_vm3, %v5069_v12 }
 0x906   :  { %1985 = vmatprep.mubr.f32.mxu1 %v7097_v54 }
 0x909   :  { %5086 = vmatmul.mubr.msk.f32.gmra.mxu1 %vm101_vm3, %v5070_v37 }
 0x90a   :  { %1991 = vmatprep.mubr.f32.mxu1 %v7097_v54 }
 0x90d   :  { %5087 = vmatmul.mubr.msk.f32.gmra.mxu1 %vm101_vm3, %v5071_v56 }
 0x90e   :  { %1997 = vmatprep.mubr.f32.mxu1 %v7097_v54 }
 0x911   :  { %5088 = vmatmul.mubr.msk.f32.gmra.mxu1 %vm101_vm3, %v5072_v47  ;;  %v1854_v47 = vpop.permute.xlu0 %1853 }
 0x912   :  { %2003 = vmatprep.mubr.f32.mxu1 %v7097_v54 }
 0x915   :  { %5089 = vmatmul.mubr.msk.f32.gmra.mxu1 %vm101_vm3, %v5073_v40 }
 0x916   :  { %2009 = vmatprep.mubr.f32.mxu1 %v7097_v54 }
 0x919   :  { %5090 = vmatmul.mubr.msk.f32.gmra.mxu1 %vm101_vm3, %v5074_v43 }
 0x91a   :  { %2015 = vmatprep.mubr.f32.mxu1 %v7097_v54 }
 0x91d   :  { %5091 = vmatmul.mubr.msk.f32.gmra.mxu1 %vm101_vm3, %v5075_v7 }
 0x91e   :  { %2021 = vmatprep.mubr.f32.mxu1 %v7097_v54 }
 0x921   :  { %5092 = vmatmul.mubr.msk.f32.gmra.mxu1 %vm101_vm3, %v5076_v31 }
 0x922   :  { %2373 = vmatprep.mubr.f32.mxu1 %v7097_v54 }
 0x9c5   :  { %v1981_v50 = vpop.f32.mrf.mxu1 }
 0x9c7   :  { %v1983_v57 = vpop.f32.mrf.mxu1 }
 0x9c8   :  { %v1984_v31 = vadd.f32 %v1983_v57, %v1854_v47 }
 0x9c9   :  { %v1987_v29 = vpop.f32.mrf.mxu1 }
 0x9ca   :  { %v1988_v40 = vadd.f32 %v1987_v29, %v1859_v8 }
 0x9cb   :  { %v1989_v28 = vpop.f32.mrf.mxu1 }
 0x9cc   :  { %v1990_v12 = vadd.f32 %v1989_v28, %v1859_v8  ;;  %v2030_v28 = vmul.f32 0.01, %v1988_v40 }
 0x9cd   :  { %v1993_v22 = vpop.f32.mrf.mxu1 }
 0x9ce   :  { %v1994_v3 = vadd.f32 %v1993_v22, %v1864_v15  ;;  %v2031_v22 = vmul.f32 0.01, %v1990_v12 }
 0x9cf   :  { %v1995_v52 = vpop.f32.mrf.mxu1 }
 0x9d0   :  { %v1996_v23 = vadd.f32 %v1995_v52, %v1864_v15  ;;  %v2047_v57 = vmax.f32 %v1990_v12, %v2031_v22 }
 0x9d1   :  { %v1999_v55 = vpop.f32.mrf.mxu1 }
 0x9d2   :  { %v2000_v0 = vadd.f32 %v1999_v55, %v1869_v41  ;;  %v2033_v55 = vmul.f32 0.01, %v1996_v23 }
 0x9d3   :  { %v2001_v33 = vpop.f32.mrf.mxu1 }
 0x9d4   :  { %v2002_v13 = vadd.f32 %v2001_v33, %v1869_v41  ;;  %v2034_v43 = vmul.f32 0.01, %v2000_v0  ;;  %v1982_v33 = vadd.f32 %v1981_v50, %v1854_v47 }
 0x9d5   :  { %v2005_v34 = vpop.f32.mrf.mxu1 }
 0x9d6   :  { %v2006_v44 = vadd.f32 %v2005_v34, %v1874_v6  ;;  %v2035_v37 = vmul.f32 0.01, %v2002_v13  ;;  %v2032_v34 = vmul.f32 0.01, %v1994_v3  ;;  %v2028_v29 = vmul.f32 0.01, %v1982_v33 }
 0x9d7   :  { %v2007_v59 = vpop.f32.mrf.mxu1 }
 0x9d8   :  { %v2008_v14 = vadd.f32 %v2007_v59, %v1874_v6  ;;  %v2036_v4 = vmul.f32 0.01, %v2006_v44  ;;  %v2044_v6 = vmax.f32 %v1982_v33, %v2028_v29 }
 0x9d9   :  { %v2011_v21 = vpop.f32.mrf.mxu1 }
 0x9da   :  { %v2012_v11 = vadd.f32 %v2011_v21, %v1879_v39  ;;  %v2037_v45 = vmul.f32 0.01, %v2008_v14  ;;  %v2052_v59 = vmax.f32 %v2006_v44, %v2036_v4  ;;  %v2051_v21 = vmax.f32 %v2002_v13, %v2035_v37 }
 0x9db   :  { %v2013_v32 = vpop.f32.mrf.mxu1 }
 0x9dc   :  { %v2014_v46 = vadd.f32 %v2013_v32, %v1879_v39  ;;  %v2038_v17 = vmul.f32 0.01, %v2012_v11  ;;  %v2053_v52 = vmax.f32 %v2008_v14, %v2037_v45  ;;  %v2029_v32 = vmul.f32 0.01, %v1984_v31 }
 0x9dd   :  { %v2017_v1 = vpop.f32.mrf.mxu1  ;;  %v2048_v39 = vmax.f32 %v1994_v3, %v2032_v34 }
 0x9de   :  { %v2018_v25 = vadd.f32 %v2017_v1, %v1884_v38  ;;  %v2039_v62 = vmul.f32 0.01, %v2014_v46  ;;  %v2054_v7 = vmax.f32 %v2012_v11, %v2038_v17  ;;  %v2049_v1 = vmax.f32 %v1996_v23, %v2033_v55 }
 0x9df   :  { %v2019_v58 = vpop.f32.mrf.mxu1  ;;  %v2045_v50 = vmax.f32 %v1984_v31, %v2029_v32 }
 0x9e0   :  { %v2020_v61 = vadd.f32 %v2019_v58, %v1884_v38  ;;  %v2040_v60 = vmul.f32 0.01, %v2018_v25  ;;  %v2055_v56 = vmax.f32 %v2014_v46, %v2039_v62  ;;  %v2050_v38 = vmax.f32 %v2000_v0, %v2034_v43  ;;  %v5099_v46 = vld [vmem:[%s7031_s4 + $0x130] sm:$0xff]  ;;  %v2116_v62 = vpop.permute.xlu1 %2115  ;;  %v2111_v0 = vpop.permute.xlu0 %2110 }
 0x9e1   :  { %v2023_v10 = vpop.f32.mrf.mxu1  ;;  %v2046_v58 = vmax.f32 %v1988_v40, %v2030_v28 }
 0x9e2   :  { %v2024_v63 = vadd.f32 %v2023_v10, %v7126_v36  ;;  %v2041_v51 = vmul.f32 0.01, %v2020_v61  ;;  %v2056_v9 = vmax.f32 %v2018_v25, %v2040_v60  ;;  %v5093_v10 = vld [vmem:[%s7031_s4 + $0x100] sm:$0xff] }
 0x9e3   :  { %v2025_v5 = vpop.f32.mrf.mxu1  ;;  %v5097_v25 = vld [vmem:[%s7031_s4 + $0x120] sm:$0xff] }
 0x9e4   :  { %v2026_v27 = vadd.f32 %v2025_v5, %v7126_v36  ;;  %v2042_v53 = vmul.f32 0.01, %v2024_v63  ;;  %v2057_v2 = vmax.f32 %v2020_v61, %v2041_v51  ;;  %v5094_v61 = vld [vmem:[%s7031_s4 + $0x108] sm:$0xff]  ;;  %v5095_v36 = vld [vmem:[%s7031_s4 + $0x110] sm:$0xff]  ;;  %v2106_v23 = vpop.permute.xlu1 %2105 }
 0x9e5   :  { %v5098_v5 = vld [vmem:[%s7031_s4 + $0x128] sm:$0xff] }
 0x9e6   :  { %v2043_v16 = vmul.f32 0.01, %v2026_v27  ;;  %v2058_v42 = vmax.f32 %v2024_v63, %v2042_v53  ;;  %v5096_v63 = vld [vmem:[%s7031_s4 + $0x118] sm:$0xff] }
 0x9e8   :  { %v2059_v19 = vmax.f32 %v2026_v27, %v2043_v16  ;;  %v5100_v27 = vld [vmem:[%s7031_s4 + $0x138] sm:$0xff]  ;;  %v2096_v47 = vpop.permute.xlu1 %2095 }
 0x9ea   :  { %2158 = vmatprep.subr.mxu0 %v2059_v19 }
 0x9eb   :  { %2159 = vmatpush1.msra.mxu0 %v2058_v42 }
 0x9ec   :  { %2160 = vmatprep.subr.mxu0 %v2057_v2  ;;  %v2101_v2 = vpop.permute.xlu0 %2100 }
 0x9ed   :  { %2161 = vmatpush1.msra.mxu0 %v2056_v9 }
 0x9ee   :  { %2162 = vmatprep.subr.mxu0 %v2055_v56 }
 0x9ef   :  { %2163 = vmatpush1.msra.mxu0 %v2054_v7 }
 0x9f0   :  { %2164 = vmatprep.subr.mxu0 %v2053_v52  ;;  %v2091_v52 = vpop.permute.xlu0 %2090 }
 0x9f1   :  { %2165 = vmatpush1.msra.mxu0 %v2052_v59 }
 0x9f2   :  { %2166 = vmatprep.subr.mxu0 %v2051_v21 }
 0x9f3   :  { %2167 = vmatpush1.msra.mxu0 %v2050_v38 }
 0x9f4   :  { %2168 = vmatprep.subr.mxu0 %v2049_v1 }
 0x9f5   :  { %2169 = vmatpush1.msra.mxu0 %v2048_v39 }
 0x9f6   :  { %2170 = vmatprep.subr.mxu0 %v2047_v57  ;;  %v2086_v57 = vpop.permute.xlu1 %2085 }
 0x9f7   :  { %2171 = vmatpush1.msra.mxu0 %v2046_v58 }
 0x9f8   :  { %2172 = vmatprep.subr.mxu0 %v2045_v50 }
 0x9f9   :  { %2173 = vmatpush1.msra.mxu0 %v2044_v6 }
 0x9fa   :  { %5109 = vmatmul.mubr.msk.f32.vlgmr.msra.gmra.mxu0 %vm329_vm9, %v5093_v10 }
 0x9fb   :  { %2212 = vmatprep.mubr.f32.mxu0 %v7097_v54 }
 0x9fe   :  { %5110 = vmatmul.mubr.msk.f32.gmra.mxu0 %vm329_vm9, %v5094_v61 }
 0x9ff   :  { %2218 = vmatprep.mubr.f32.mxu0 %v7097_v54 }
 0xa02   :  { %5111 = vmatmul.mubr.msk.f32.gmra.mxu0 %vm329_vm9, %v5095_v36 }
 0xa03   :  { %2224 = vmatprep.mubr.f32.mxu0 %v7097_v54 }
 0xa06   :  { %5112 = vmatmul.mubr.msk.f32.gmra.mxu0 %vm329_vm9, %v5096_v63  ;;  %v2081_v63 = vpop.permute.xlu0 %2080 }
 0xa07   :  { %2230 = vmatprep.mubr.f32.mxu0 %v7097_v54 }
 0xa0a   :  { %5113 = vmatmul.mubr.msk.f32.gmra.mxu0 %vm329_vm9, %v5097_v25 }
 0xa0b   :  { %2236 = vmatprep.mubr.f32.mxu0 %v7097_v54 }
 0xa0e   :  { %5114 = vmatmul.mubr.msk.f32.gmra.mxu0 %vm329_vm9, %v5098_v5 }
 0xa0f   :  { %2242 = vmatprep.mubr.f32.mxu0 %v7097_v54 }
 0xa12   :  { %5115 = vmatmul.mubr.msk.f32.gmra.mxu0 %vm329_vm9, %v5099_v46 }
 0xa13   :  { %2248 = vmatprep.mubr.f32.mxu0 %v7097_v54 }
 0xa16   :  { %5116 = vmatmul.mubr.msk.f32.gmra.mxu0 %vm329_vm9, %v5100_v27 }
 0xa17   :  { %2575 = vmatprep.mubr.f32.mxu0 %v7097_v54 }
 0xaba   :  { %v2208_v41 = vpop.f32.mrf.mxu0 }
 0xabc   :  { %v2210_v11 = vpop.f32.mrf.mxu0 }
 0xabd   :  { %v2211_v27 = vadd.f32 %v2210_v11, %v2081_v63 }
 0xabe   :  { %v2214_v53 = vpop.f32.mrf.mxu0 }
 0xabf   :  { %v2215_v25 = vadd.f32 %v2214_v53, %v2086_v57 }
 0xac0   :  { %v2216_v14 = vpop.f32.mrf.mxu0 }
 0xac1   :  { %v2217_v10 = vadd.f32 %v2216_v14, %v2086_v57  ;;  %v2257_v14 = vmul.f32 0.01, %v2215_v25 }
 0xac2   :  { %v2220_v51 = vpop.f32.mrf.mxu0 }
 0xac3   :  { %v2221_v58 = vadd.f32 %v2220_v51, %v2091_v52  ;;  %v2258_v51 = vmul.f32 0.01, %v2217_v10 }
 0xac4   :  { %v2222_v16 = vpop.f32.mrf.mxu0 }
 0xac5   :  { %v2223_v1 = vadd.f32 %v2222_v16, %v2091_v52  ;;  %v2274_v11 = vmax.f32 %v2217_v10, %v2258_v51  ;;  %v5131_v51 = vld [vmem:[%s7029_s2 + $0xf8] sm:$0xff] }
 0xac6   :  { %v2226_v15 = vpop.f32.mrf.mxu0 }
 0xac7   :  { %v2227_v28 = vadd.f32 %v2226_v15, %v2096_v47  ;;  %v2260_v15 = vmul.f32 0.01, %v2223_v1 }
 0xac8   :  { %v2228_v44 = vpop.f32.mrf.mxu0 }
 0xac9   :  { %v2229_v59 = vadd.f32 %v2228_v44, %v2096_v47  ;;  %v2261_v5 = vmul.f32 0.01, %v2227_v28  ;;  %v2209_v44 = vadd.f32 %v2208_v41, %v2081_v63 }
 0xaca   :  { %v2232_v60 = vpop.f32.mrf.mxu0 }
 0xacb   :  { %v2233_v33 = vadd.f32 %v2232_v60, %v2101_v2  ;;  %v2262_v61 = vmul.f32 0.01, %v2229_v59  ;;  %v2259_v60 = vmul.f32 0.01, %v2221_v58  ;;  %v2255_v53 = vmul.f32 0.01, %v2209_v44 }
 0xacc   :  { %v2234_v13 = vpop.f32.mrf.mxu0 }
 0xacd   :  { %v2235_v7 = vadd.f32 %v2234_v13, %v2101_v2  ;;  %v2263_v50 = vmul.f32 0.01, %v2233_v33  ;;  %v5117_v2 = vld [vmem:[%s7033_s6 + $0x40] sm:$0xff] }
 0xace   :  { %v2238_v19 = vpop.f32.mrf.mxu0 }
 0xacf   :  { %v2239_v40 = vadd.f32 %v2238_v19, %v2106_v23  ;;  %v2264_v29 = vmul.f32 0.01, %v2235_v7  ;;  %v2279_v13 = vmax.f32 %v2233_v33, %v2263_v50  ;;  %v2277_v19 = vmax.f32 %v2227_v28, %v2261_v5 }
 0xad0   :  { %v2240_v17 = vpop.f32.mrf.mxu0 }
 0xad1   :  { %v2241_v37 = vadd.f32 %v2240_v17, %v2106_v23  ;;  %v2265_v38 = vmul.f32 0.01, %v2239_v40  ;;  %v2280_v16 = vmax.f32 %v2235_v7, %v2264_v29  ;;  %v2276_v17 = vmax.f32 %v2223_v1, %v2260_v15 }
 0xad2   :  { %v2244_v42 = vpop.f32.mrf.mxu0  ;;  %v2273_v23 = vmax.f32 %v2215_v25, %v2257_v14 }
 0xad3   :  { %v2245_v9 = vadd.f32 %v2244_v42, %v2111_v0  ;;  %v2266_v22 = vmul.f32 0.01, %v2241_v37  ;;  %v2281_v46 = vmax.f32 %v2239_v40, %v2265_v38  ;;  %v2275_v42 = vmax.f32 %v2221_v58, %v2259_v60  ;;  %v5129_v60 = vld [vmem:[%s7029_s2 + $0xe8] sm:$0xff] }
 0xad4   :  { %v2246_v45 = vpop.f32.mrf.mxu0 }
 0xad5   :  { %v2247_v3 = vadd.f32 %v2246_v45, %v2111_v0  ;;  %v2267_v34 = vmul.f32 0.01, %v2245_v9  ;;  %v2282_v36 = vmax.f32 %v2241_v37, %v2266_v22  ;;  %v2256_v0 = vmul.f32 0.01, %v2211_v27 }
 0xad6   :  { %v2250_v8 = vpop.f32.mrf.mxu0  ;;  %v2271_v45 = vmax.f32 %v2209_v44, %v2255_v53  ;;  %v5128_v44 = vld [vmem:[%s7029_s2 + $0xe0] sm:$0xff] }
 0xad7   :  { %v2251_v4 = vadd.f32 %v2250_v8, %v2116_v62  ;;  %v2268_v31 = vmul.f32 0.01, %v2247_v3  ;;  %v2283_v6 = vmax.f32 %v2245_v9, %v2267_v34  ;;  %v2272_v41 = vmax.f32 %v2211_v27, %v2256_v0  ;;  %v5118_v8 = vld [vmem:[%s7033_s6 + $0x48] sm:$0xff] }
 0xad8   :  { %v2252_v12 = vpop.f32.mrf.mxu0 }
 0xad9   :  { %v2253_v56 = vadd.f32 %v2252_v12, %v2116_v62  ;;  %v2269_v43 = vmul.f32 0.01, %v2251_v4  ;;  %v2284_v39 = vmax.f32 %v2247_v3, %v2268_v31  ;;  %v2278_v62 = vmax.f32 %v2229_v59, %v2262_v61  ;;  %v2296_v3 = vpop.permute.xlu1 %2295 }
 0xadb   :  { %v2270_v55 = vmul.f32 0.01, %v2253_v56  ;;  %v2285_v32 = vmax.f32 %v2251_v4, %v2269_v43 }
 0xadd   :  { %v2286_v21 = vmax.f32 %v2253_v56, %v2270_v55  ;;  %v2401_v27 = vpop.permute.xlu1 %2400 }
 0xade   :  { %vm2402_vm13 = vcmp.eq.s32.totalorder %v2401_v27, 1 }
 0xadf   :  { %2325 = vmatprep.subr.mxu1 %v2286_v21 }
 0xae0   :  { %2326 = vmatpush1.msra.mxu1 %v2285_v32 }
 0xae1   :  { %2327 = vmatprep.subr.mxu1 %v2284_v39  ;;  %v2301_v39 = vpop.permute.xlu0 %2300 }
 0xae2   :  { %2328 = vmatpush1.msra.mxu1 %v2283_v6 }
 0xae3   :  { %2329 = vmatprep.subr.mxu1 %v2282_v36 }
 0xae4   :  { %2330 = vmatpush1.msra.mxu1 %v2281_v46 }
 0xae5   :  { %2331 = vmatprep.subr.mxu1 %v2280_v16  ;;  %v2425_v49 = vpop.permute.xlu0 %2424  ;;  %v5127_v16 = vld [vmem:[%s7029_s2 + $0xd8] sm:$0xff] }
 0xae6   :  { %2332 = vmatpush1.msra.mxu1 %v2279_v13  ;;  %v5130_v13 = vld [vmem:[%s7029_s2 + $0xf0] sm:$0xff] }
 0xae7   :  { %2333 = vmatprep.subr.mxu1 %v2278_v62 }
 0xae8   :  { %2334 = vmatpush1.msra.mxu1 %v2277_v19 }
 0xae9   :  { %2335 = vmatprep.subr.mxu1 %v2276_v17 }
 0xaea   :  { %2336 = vmatpush1.msra.mxu1 %v2275_v42 }
 0xaeb   :  { %2337 = vmatprep.subr.mxu1 %v2274_v11 }
 0xaec   :  { %2338 = vmatpush1.msra.mxu1 %v2273_v23 }
 0xaed   :  { %2339 = vmatprep.subr.mxu1 %v2272_v41 }
 0xaee   :  { %2340 = vmatpush1.msra.mxu1 %v2271_v45  ;;  %v2485_v45 = vpop.permute.xlu1 %2484 }
 0xaef   :  { %5121 = vmatmul.mubr.msk.f32.vlgmr.msra.gmra.mxu1 %vm329_vm9, %v5117_v2 }
 0xaf0   :  { %2379 = vmatprep.mubr.f32.mxu1 %v7097_v54 }
 0xaf3   :  { %5122 = vmatmul.mubr.msk.f32.gmra.mxu1 %vm329_vm9, %v5118_v8  ;;  %v2480_v8 = vpop.permute.xlu0 %2479 }
 0xaf4   :  { %2802 = vmatprep.mubr.f32.mxu1 %v7097_v54 }
 0xbaf   :  { %v2375_v4 = vpop.f32.mrf.mxu1 }
 0xbb0   :  { %v2376_v9 = vadd.f32 %v2375_v4, %v2296_v3 }
 0xbb1   :  { %v2377_v12 = vpop.f32.mrf.mxu1 }
 0xbb2   :  { %5351 = vtanh.f32 %v2376_v9  ;;  %v2378_v37 = vadd.f32 %v2377_v12, %v2296_v3  ;;  %v2475_v9 = vpop.permute.xlu1 %2474 }
 0xbb3   :  { %v2381_v28 = vpop.f32.mrf.mxu1 }
 0xbb4   :  { %5353 = vtanh.f32 %v2378_v37  ;;  %v2382_v58 = vadd.f32 %v2381_v28, %v2301_v39  ;;  %v2470_v37 = vpop.permute.xlu0 %2469 }
 0xbb5   :  { %v2383_v57 = vpop.f32.mrf.mxu1 }
 0xbb6   :  { %v2384_v10 = vadd.f32 %v2383_v57, %v2301_v39  ;;  %v2388_v36 = vsub.f32 %v6478_v30, %v2382_v58 }
 0xbb8   :  { %v2389_v5 = vsub.f32 %v6481_v26, %v2384_v10  ;;  %v2460_v28 = vpop.permute.xlu0 %2459 }
 0xbbf   :  { %v5352_v56 = vpop.eup %5351 }
 0xbc0   :  { %v2405_v47 = vrot.slane %v5352_v56, 4  ;;  %v2390_v40 = vsub.f32 0.0, %v5352_v56 }
 0xbc1   :  { %v5354_v43 = vpop.eup %5353 }
 0xbc2   :  { %v2406_v7 = vadd.f32 %v5352_v56, %v2405_v47  ;;  %v2411_v31 = vrot.slane %v5354_v43, 4  ;;  %v2392_v55 = vmul.f32 1.442695, %v2390_v40  ;;  %v2391_v52 = vsub.f32 0.0, %v5354_v43 }
 0xbc4   :  { %v2407_v33 = vrot.slane %v2406_v7, 2  ;;  %v2412_v34 = vadd.f32 %v5354_v43, %v2411_v31  ;;  %5355 = vpow2.f32 %v2392_v55  ;;  %v2394_v59 = vmul.f32 1.442695, %v2391_v52  ;;  %v2465_v52 = vpop.permute.xlu1 %2464 }
 0xbc6   :  { %v2408_v22 = vadd.f32 %v2407_v33, %v2406_v7  ;;  %v2413_v21 = vrot.slane %v2412_v34, 2  ;;  %5357 = vpow2.f32 %v2394_v59 }
 0xbc8   :  { %v2409_v38 = vrot.slane %v2408_v22, 1  ;;  %v2414_v32 = vadd.f32 %v2413_v21, %v2412_v34 }
 0xbca   :  { %v2410_v1 = vadd.f32 %v2409_v38, %v2408_v22  ;;  %v2415_v29 = vrot.slane %v2414_v32, 1 }
 0xbcc   :  { %v2416_v50 = vadd.f32 %v2415_v29, %v2414_v32  ;;  %v6582_v6 = vsub.f32 %v1821_v20, %v2410_v1 }
 0xbce   :  { %v6587_v61 = vsub.f32 %v1822_v18, %v2416_v50  ;;  %v5124_v18 = vld [vmem:[%s7029_s2 + $0xc0] sm:$0xff] }
 0xbd1   :  { %v5356_v63 = vpop.eup %5355 }
 0xbd2   :  { %v2396_v25 = vmul.f32 %v5356_v63, %v2388_v36 }
 0xbd3   :  { %v5358_v46 = vpop.eup %5357 }
 0xbd4   :  { %v2397_v15 = vmul.f32 %v5358_v46, %v2389_v5  ;;  %v6592_v35 = vsel %vm2402_vm13, %v6478_v30, %v2396_v25  ;;  %v5125_v30 = vld [vmem:[%s7029_s2 + $0xc8] sm:$0xff]  ;;  %v2455_v25 = vpop.permute.xlu1 %2454 }
 0xbd5   :  { %v2427_v48 = vmul.f32 %v2425_v49, %v6592_v35 }
 0xbd6   :  { %v6595_v20 = vsel %vm2402_vm13, %v6481_v26, %v2397_v15  ;;  %v5126_v26 = vld [vmem:[%s7029_s2 + $0xd0] sm:$0xff] }
 0xbd7   :  { %v2428_v24 = vmul.f32 %v2425_v49, %v6595_v20 }
 0xbd9   :  { %2541 = vmatprep.subr.mxu0 %v2428_v24 }
 0xbda   :  { %2542 = vmatpush1.msra.mxu0 %v2427_v48  ;;  %v2450_v48 = vpop.permute.xlu0 %2449 }
 0xbdb   :  { %5140 = vmatmul.mubr.msk.f32.vlgmr.msra.gmra.mxu0 %vm101_vm3, %v5124_v18 }
 0xbdc   :  { %2581 = vmatprep.mubr.f32.mxu0 %v7097_v54 }
 0xbdf   :  { %5141 = vmatmul.mubr.msk.f32.gmra.mxu0 %vm101_vm3, %v5125_v30 }
 0xbe0   :  { %2587 = vmatprep.mubr.f32.mxu0 %v7097_v54 }
 0xbe3   :  { %5142 = vmatmul.mubr.msk.f32.gmra.mxu0 %vm101_vm3, %v5126_v26 }
 0xbe4   :  { %2593 = vmatprep.mubr.f32.mxu0 %v7097_v54 }
 0xbe7   :  { %5143 = vmatmul.mubr.msk.f32.gmra.mxu0 %vm101_vm3, %v5127_v16 }
 0xbe8   :  { %2599 = vmatprep.mubr.f32.mxu0 %v7097_v54 }
 0xbeb   :  { %5144 = vmatmul.mubr.msk.f32.gmra.mxu0 %vm101_vm3, %v5128_v44 }
 0xbec   :  { %2605 = vmatprep.mubr.f32.mxu0 %v7097_v54 }
 0xbef   :  { %5145 = vmatmul.mubr.msk.f32.gmra.mxu0 %vm101_vm3, %v5129_v60 }
 0xbf0   :  { %2611 = vmatprep.mubr.f32.mxu0 %v7097_v54 }
 0xbf3   :  { %5146 = vmatmul.mubr.msk.f32.gmra.mxu0 %vm101_vm3, %v5130_v13 }
 0xbf4   :  { %2617 = vmatprep.mubr.f32.mxu0 %v7097_v54 }
 0xbf7   :  { %5147 = vmatmul.mubr.msk.f32.gmra.mxu0 %vm101_vm3, %v5131_v51 }
 0xbf8   :  { %2969 = vmatprep.mubr.f32.mxu0 %v7097_v54 }
 0xc9b   :  { %v2577_v62 = vpop.f32.mrf.mxu0 }
 0xc9c   :  { %v2578_v13 = vadd.f32 %v2577_v62, %v2450_v48 }
 0xc9d   :  { %v2579_v14 = vpop.f32.mrf.mxu0 }
 0xc9e   :  { %v2580_v16 = vadd.f32 %v2579_v14, %v2450_v48 }
 0xc9f   :  { %v2583_v19 = vpop.f32.mrf.mxu0 }
 0xca0   :  { %v2584_v18 = vadd.f32 %v2583_v19, %v2455_v25  ;;  %v2624_v19 = vmul.f32 0.01, %v2578_v13 }
 0xca1   :  { %v2585_v0 = vpop.f32.mrf.mxu0 }
 0xca2   :  { %v2586_v15 = vadd.f32 %v2585_v0, %v2455_v25  ;;  %v2626_v0 = vmul.f32 0.01, %v2584_v18 }
 0xca3   :  { %v2589_v17 = vpop.f32.mrf.mxu0 }
 0xca4   :  { %v2590_v5 = vadd.f32 %v2589_v17, %v2460_v28  ;;  %v2627_v17 = vmul.f32 0.01, %v2586_v15 }
 0xca5   :  { %v2591_v53 = vpop.f32.mrf.mxu0 }
 0xca6   :  { %v2592_v10 = vadd.f32 %v2591_v53, %v2460_v28  ;;  %v2628_v51 = vmul.f32 0.01, %v2590_v5  ;;  %v2643_v14 = vmax.f32 %v2586_v15, %v2627_v17  ;;  %v2712_v28 = vpop.permute.xlu1 %2711 }
 0xca7   :  { %v2595_v42 = vpop.f32.mrf.mxu0 }
 0xca8   :  { %v2596_v57 = vadd.f32 %v2595_v42, %v2465_v52  ;;  %v2629_v44 = vmul.f32 0.01, %v2592_v10 }
 0xca9   :  { %v2597_v11 = vpop.f32.mrf.mxu0 }
 0xcaa   :  { %v2598_v1 = vadd.f32 %v2597_v11, %v2465_v52  ;;  %v2630_v30 = vmul.f32 0.01, %v2596_v57 }
 0xcab   :  { %v2601_v23 = vpop.f32.mrf.mxu0 }
 0xcac   :  { %v2602_v38 = vadd.f32 %v2601_v23, %v2470_v37  ;;  %v2631_v49 = vmul.f32 0.01, %v2598_v1  ;;  %v2646_v11 = vmax.f32 %v2596_v57, %v2630_v30  ;;  %v2625_v23 = vmul.f32 0.01, %v2580_v16 }
 0xcad   :  { %v2603_v41 = vpop.f32.mrf.mxu0 }
 0xcae   :  { %v2604_v59 = vadd.f32 %v2603_v41, %v2470_v37  ;;  %v2632_v46 = vmul.f32 0.01, %v2602_v38  ;;  %v2647_v42 = vmax.f32 %v2598_v1, %v2631_v49  ;;  %v2645_v41 = vmax.f32 %v2592_v10, %v2629_v44  ;;  %v5152_v37 = vld [vmem:[%s7031_s4 + $0xe0] sm:$0xff] }
 0xcaf   :  { %v2607_v2 = vpop.f32.mrf.mxu0  ;;  %v2641_v62 = vmax.f32 %v2580_v16, %v2625_v23 }
 0xcb0   :  { %v2608_v33 = vadd.f32 %v2607_v2, %v2475_v9  ;;  %v2633_v36 = vmul.f32 0.01, %v2604_v59  ;;  %v2648_v53 = vmax.f32 %v2602_v38, %v2632_v46  ;;  %v2642_v2 = vmax.f32 %v2584_v18, %v2626_v0 }
 0xcb1   :  { %v2609_v3 = vpop.f32.mrf.mxu0 }
 0xcb2   :  { %v2610_v31 = vadd.f32 %v2609_v3, %v2475_v9  ;;  %v2634_v58 = vmul.f32 0.01, %v2608_v33  ;;  %v2649_v60 = vmax.f32 %v2604_v59, %v2633_v36  ;;  %v5148_v3 = vld [vmem:[%s7031_s4 + $0xc0] sm:$0xff]  ;;  %v5150_v9 = vld [vmem:[%s7031_s4 + $0xd0] sm:$0xff] }
 0xcb3   :  { %v2613_v4 = vpop.f32.mrf.mxu0 }
 0xcb4   :  { %v2614_v43 = vadd.f32 %v2613_v4, %v2480_v8  ;;  %v2635_v29 = vmul.f32 0.01, %v2610_v31  ;;  %v2650_v26 = vmax.f32 %v2608_v33, %v2634_v58  ;;  %v5149_v4 = vld [vmem:[%s7031_s4 + $0xc8] sm:$0xff] }
 0xcb5   :  { %v2615_v12 = vpop.f32.mrf.mxu0 }
 0xcb6   :  { %v2616_v47 = vadd.f32 %v2615_v12, %v2480_v8  ;;  %v2636_v32 = vmul.f32 0.01, %v2614_v43  ;;  %v2651_v24 = vmax.f32 %v2610_v31, %v2635_v29  ;;  %v2640_v8 = vmax.f32 %v2578_v13, %v2624_v19  ;;  %v5151_v12 = vld [vmem:[%s7031_s4 + $0xd8] sm:$0xff] }
 0xcb7   :  { %v2619_v56 = vpop.f32.mrf.mxu0 }
 0xcb8   :  { %v2620_v40 = vadd.f32 %v2619_v56, %v2485_v45  ;;  %v2637_v22 = vmul.f32 0.01, %v2616_v47  ;;  %v2652_v27 = vmax.f32 %v2614_v43, %v2636_v32  ;;  %v5153_v56 = vld [vmem:[%s7031_s4 + $0xe8] sm:$0xff]  ;;  %v2707_v32 = vpop.permute.xlu0 %2706 }
 0xcb9   :  { %v2621_v7 = vpop.f32.mrf.mxu0 }
 0xcba   :  { %v2622_v55 = vadd.f32 %v2621_v7, %v2485_v45  ;;  %v2638_v34 = vmul.f32 0.01, %v2620_v40  ;;  %v2653_v63 = vmax.f32 %v2616_v47, %v2637_v22  ;;  %v2644_v45 = vmax.f32 %v2590_v5, %v2628_v51  ;;  %v5154_v47 = vld [vmem:[%s7031_s4 + $0xf0] sm:$0xff] }
 0xcbc   :  { %v2639_v21 = vmul.f32 0.01, %v2622_v55  ;;  %v2654_v50 = vmax.f32 %v2620_v40, %v2638_v34  ;;  %v5155_v40 = vld [vmem:[%s7031_s4 + $0xf8] sm:$0xff]  ;;  %v2697_v58 = vpop.permute.xlu0 %2696 }
 0xcbe   :  { %v2655_v39 = vmax.f32 %v2622_v55, %v2639_v21 }
 0xcc0   :  { %2754 = vmatprep.subr.mxu1 %v2655_v39  ;;  %v2702_v39 = vpop.permute.xlu1 %2701  ;;  %v2687_v30 = vpop.permute.xlu0 %2686 }
 0xcc1   :  { %2755 = vmatpush1.msra.mxu1 %v2654_v50 }
 0xcc2   :  { %2756 = vmatprep.subr.mxu1 %v2653_v63 }
 0xcc3   :  { %2757 = vmatpush1.msra.mxu1 %v2652_v27 }
 0xcc4   :  { %2758 = vmatprep.subr.mxu1 %v2651_v24  ;;  %v2692_v27 = vpop.permute.xlu1 %2691 }
 0xcc5   :  { %2759 = vmatpush1.msra.mxu1 %v2650_v26 }
 0xcc6   :  { %2760 = vmatprep.subr.mxu1 %v2649_v60 }
 0xcc7   :  { %2761 = vmatpush1.msra.mxu1 %v2648_v53 }
 0xcc8   :  { %2762 = vmatprep.subr.mxu1 %v2647_v42  ;;  %v2682_v23 = vpop.permute.xlu1 %2681 }
 0xcc9   :  { %2763 = vmatpush1.msra.mxu1 %v2646_v11 }
 0xcca   :  { %2764 = vmatprep.subr.mxu1 %v2645_v41 }
 0xccb   :  { %2765 = vmatpush1.msra.mxu1 %v2644_v45 }
 0xccc   :  { %2766 = vmatprep.subr.mxu1 %v2643_v14 }
 0xccd   :  { %2767 = vmatpush1.msra.mxu1 %v2642_v2 }
 0xcce   :  { %2768 = vmatprep.subr.mxu1 %v2641_v62 }
 0xccf   :  { %2769 = vmatpush1.msra.mxu1 %v2640_v8  ;;  %v2677_v8 = vpop.permute.xlu0 %2676 }
 0xcd0   :  { %5164 = vmatmul.mubr.msk.f32.vlgmr.msra.gmra.mxu1 %vm329_vm9, %v5148_v3 }
 0xcd1   :  { %2808 = vmatprep.mubr.f32.mxu1 %v7097_v54 }
 0xcd4   :  { %5165 = vmatmul.mubr.msk.f32.gmra.mxu1 %vm329_vm9, %v5149_v4 }
 0xcd5   :  { %2814 = vmatprep.mubr.f32.mxu1 %v7097_v54 }
 0xcd8   :  { %5166 = vmatmul.mubr.msk.f32.gmra.mxu1 %vm329_vm9, %v5150_v9 }
 0xcd9   :  { %2820 = vmatprep.mubr.f32.mxu1 %v7097_v54 }
 0xcdc   :  { %5167 = vmatmul.mubr.msk.f32.gmra.mxu1 %vm329_vm9, %v5151_v12 }
 0xcdd   :  { %2826 = vmatprep.mubr.f32.mxu1 %v7097_v54 }
 0xce0   :  { %5168 = vmatmul.mubr.msk.f32.gmra.mxu1 %vm329_vm9, %v5152_v37 }
 0xce1   :  { %2832 = vmatprep.mubr.f32.mxu1 %v7097_v54 }
 0xce4   :  { %5169 = vmatmul.mubr.msk.f32.gmra.mxu1 %vm329_vm9, %v5153_v56 }
 0xce5   :  { %2838 = vmatprep.mubr.f32.mxu1 %v7097_v54 }
 0xce8   :  { %5170 = vmatmul.mubr.msk.f32.gmra.mxu1 %vm329_vm9, %v5154_v47 }
 0xce9   :  { %2844 = vmatprep.mubr.f32.mxu1 %v7097_v54 }
 0xcec   :  { %5171 = vmatmul.mubr.msk.f32.gmra.mxu1 %vm329_vm9, %v5155_v40 }
 0xced   :  { %3398 = vmatprep.mubr.f32.mxu1 %v7097_v54 }
 0xd90   :  { %v2804_v43 = vpop.f32.mrf.mxu1 }
 0xd91   :  { %v2805_v47 = vadd.f32 %v2804_v43, %v2677_v8 }
 0xd92   :  { %v2806_v7 = vpop.f32.mrf.mxu1 }
 0xd93   :  { %v2807_v12 = vadd.f32 %v2806_v7, %v2677_v8 }
 0xd94   :  { %v2810_v31 = vpop.f32.mrf.mxu1 }
 0xd95   :  { %v2811_v3 = vadd.f32 %v2810_v31, %v2682_v23  ;;  %v2851_v31 = vmul.f32 0.01, %v2805_v47 }
 0xd96   :  { %v2812_v55 = vpop.f32.mrf.mxu1 }
 0xd97   :  { %v2813_v14 = vadd.f32 %v2812_v55, %v2682_v23  ;;  %v2853_v55 = vmul.f32 0.01, %v2811_v3 }
 0xd98   :  { %v2816_v52 = vpop.f32.mrf.mxu1 }
 0xd99   :  { %v2817_v41 = vadd.f32 %v2816_v52, %v2687_v30  ;;  %v2854_v52 = vmul.f32 0.01, %v2813_v14 }
 0xd9a   :  { %v2818_v33 = vpop.f32.mrf.mxu1 }
 0xd9b   :  { %v2819_v42 = vadd.f32 %v2818_v33, %v2687_v30  ;;  %v2855_v40 = vmul.f32 0.01, %v2817_v41  ;;  %v2870_v7 = vmax.f32 %v2813_v14, %v2854_v52  ;;  %v5184_v52 = vld [vmem:[%s7029_s2 + $0xa8] sm:$0xff] }
 0xd9c   :  { %v2822_v34 = vpop.f32.mrf.mxu1 }
 0xd9d   :  { %v2823_v51 = vadd.f32 %v2822_v34, %v2692_v27  ;;  %v2856_v37 = vmul.f32 0.01, %v2819_v42 }
 0xd9e   :  { %v2824_v59 = vpop.f32.mrf.mxu1 }
 0xd9f   :  { %v2825_v44 = vadd.f32 %v2824_v59, %v2692_v27  ;;  %v2857_v4 = vmul.f32 0.01, %v2823_v51 }
 0xda0   :  { %v2828_v22 = vpop.f32.mrf.mxu1 }
 0xda1   :  { %v2829_v26 = vadd.f32 %v2828_v22, %v2697_v58  ;;  %v2858_v2 = vmul.f32 0.01, %v2825_v44  ;;  %v2873_v59 = vmax.f32 %v2823_v51, %v2857_v4  ;;  %v2852_v22 = vmul.f32 0.01, %v2807_v12 }
 0xda2   :  { %v2830_v21 = vpop.f32.mrf.mxu1 }
 0xda3   :  { %v2831_v24 = vadd.f32 %v2830_v21, %v2697_v58  ;;  %v2859_v19 = vmul.f32 0.01, %v2829_v26  ;;  %v2874_v34 = vmax.f32 %v2825_v44, %v2858_v2  ;;  %v2872_v21 = vmax.f32 %v2819_v42, %v2856_v37 }
 0xda4   :  { %v2834_v38 = vpop.f32.mrf.mxu1  ;;  %v2868_v43 = vmax.f32 %v2807_v12, %v2852_v22 }
 0xda5   :  { %v2835_v15 = vadd.f32 %v2834_v38, %v2702_v39  ;;  %v2860_v0 = vmul.f32 0.01, %v2831_v24  ;;  %v2875_v33 = vmax.f32 %v2829_v26, %v2859_v19  ;;  %v2869_v38 = vmax.f32 %v2811_v3, %v2853_v55  ;;  %v5186_v55 = vld [vmem:[%s7029_s2 + $0xb8] sm:$0xff] }
 0xda6   :  { %v2836_v1 = vpop.f32.mrf.mxu1 }
 0xda7   :  { %v2837_v5 = vadd.f32 %v2836_v1, %v2702_v39  ;;  %v2861_v53 = vmul.f32 0.01, %v2835_v15  ;;  %v2876_v56 = vmax.f32 %v2831_v24, %v2860_v0  ;;  %v5172_v1 = vld [vmem:[%s7033_s6 + $0x30] sm:$0xff]  ;;  %v2892_v39 = vpop.permute.xlu1 %2891 }
 0xda8   :  { %v2840_v29 = vpop.f32.mrf.mxu1 }
 0xda9   :  { %v2841_v63 = vadd.f32 %v2840_v29, %v2707_v32  ;;  %v2862_v60 = vmul.f32 0.01, %v2837_v5  ;;  %v2877_v9 = vmax.f32 %v2835_v15, %v2861_v53  ;;  %v5173_v29 = vld [vmem:[%s7033_s6 + $0x38] sm:$0xff]  ;;  %v2897_v53 = vpop.permute.xlu0 %2896 }
 0xdaa   :  { %v2842_v57 = vpop.f32.mrf.mxu1 }
 0xdab   :  { %v2843_v10 = vadd.f32 %v2842_v57, %v2707_v32  ;;  %v2863_v16 = vmul.f32 0.01, %v2841_v63  ;;  %v2878_v62 = vmax.f32 %v2837_v5, %v2862_v60  ;;  %v2867_v32 = vmax.f32 %v2805_v47, %v2851_v31  ;;  %v2997_v8 = vpop.permute.xlu1 %2996  ;;  %v5179_v47 = vld [vmem:[%s7029_s2 + $0x80] sm:$0xff] }
 0xdac   :  { %v2846_v50 = vpop.f32.mrf.mxu1  ;;  %vm2998_vm14 = vcmp.eq.s32.totalorder %v2997_v8, 1 }
 0xdad   :  { %v2847_v36 = vadd.f32 %v2846_v50, %v2712_v28  ;;  %v2864_v48 = vmul.f32 0.01, %v2843_v10  ;;  %v2879_v45 = vmax.f32 %v2841_v63, %v2863_v16 }
 0xdae   :  { %v2848_v25 = vpop.f32.mrf.mxu1 }
 0xdaf   :  { %v2849_v46 = vadd.f32 %v2848_v25, %v2712_v28  ;;  %v2865_v49 = vmul.f32 0.01, %v2847_v36  ;;  %v2880_v11 = vmax.f32 %v2843_v10, %v2864_v48  ;;  %v2871_v28 = vmax.f32 %v2817_v41, %v2855_v40  ;;  %v5182_v40 = vld [vmem:[%s7029_s2 + $0x98] sm:$0xff] }
 0xdb1   :  { %v2866_v18 = vmul.f32 0.01, %v2849_v46  ;;  %v2881_v17 = vmax.f32 %v2847_v36, %v2865_v49 }
 0xdb3   :  { %v2882_v13 = vmax.f32 %v2849_v46, %v2866_v18 }
 0xdb5   :  { %2921 = vmatprep.subr.mxu0 %v2882_v13 }
 0xdb6   :  { %2922 = vmatpush1.msra.mxu0 %v2881_v17 }
 0xdb7   :  { %2923 = vmatprep.subr.mxu0 %v2880_v11 }
 0xdb8   :  { %2924 = vmatpush1.msra.mxu0 %v2879_v45 }
 0xdb9   :  { %2925 = vmatprep.subr.mxu0 %v2878_v62 }
 0xdba   :  { %2926 = vmatpush1.msra.mxu0 %v2877_v9  ;;  %v3021_v9 = vpop.permute.xlu0 %3020 }
 0xdbb   :  { %2927 = vmatprep.subr.mxu0 %v2876_v56 }
 0xdbc   :  { %2928 = vmatpush1.msra.mxu0 %v2875_v33  ;;  %v5183_v33 = vld [vmem:[%s7029_s2 + $0xa0] sm:$0xff] }
 0xdbd   :  { %2929 = vmatprep.subr.mxu0 %v2874_v34  ;;  %v5185_v34 = vld [vmem:[%s7029_s2 + $0xb0] sm:$0xff] }
 0xdbe   :  { %2930 = vmatpush1.msra.mxu0 %v2873_v59 }
 0xdbf   :  { %2931 = vmatprep.subr.mxu0 %v2872_v21 }
 0xdc0   :  { %2932 = vmatpush1.msra.mxu0 %v2871_v28 }
 0xdc1   :  { %2933 = vmatprep.subr.mxu0 %v2870_v7 }
 0xdc2   :  { %2934 = vmatpush1.msra.mxu0 %v2869_v38 }
 0xdc3   :  { %2935 = vmatprep.subr.mxu0 %v2868_v43 }
 0xdc4   :  { %2936 = vmatpush1.msra.mxu0 %v2867_v32 }
 0xdc5   :  { %5176 = vmatmul.mubr.msk.f32.vlgmr.msra.gmra.mxu0 %vm329_vm9, %v5172_v1 }
 0xdc6   :  { %2975 = vmatprep.mubr.f32.mxu0 %v7097_v54 }
 0xdc9   :  { %5177 = vmatmul.mubr.msk.f32.gmra.mxu0 %vm329_vm9, %v5173_v29  ;;  %v3081_v29 = vpop.permute.xlu1 %3080 }
 0xdca   :  { %3171 = vmatprep.mubr.f32.mxu0 %v7097_v54 }
 0xe85   :  { %v2971_v57 = vpop.f32.mrf.mxu0 }
 0xe86   :  { %v2972_v58 = vadd.f32 %v2971_v57, %v2892_v39  ;;  %v3076_v57 = vpop.permute.xlu0 %3075 }
 0xe87   :  { %v2973_v50 = vpop.f32.mrf.mxu0 }
 0xe88   :  { %5359 = vtanh.f32 %v2972_v58  ;;  %v2974_v10 = vadd.f32 %v2973_v50, %v2892_v39 }
 0xe89   :  { %v2977_v16 = vpop.f32.mrf.mxu0 }
 0xe8a   :  { %5361 = vtanh.f32 %v2974_v10  ;;  %v2978_v42 = vadd.f32 %v2977_v16, %v2897_v53  ;;  %v3071_v10 = vpop.permute.xlu1 %3070 }
 0xe8b   :  { %v2979_v17 = vpop.f32.mrf.mxu0 }
 0xe8c   :  { %v2980_v23 = vadd.f32 %v2979_v17, %v2897_v53  ;;  %v2984_v19 = vsub.f32 %v6592_v35, %v2978_v42 }
 0xe8e   :  { %v2985_v2 = vsub.f32 %v6595_v20, %v2980_v23 }
 0xe95   :  { %v5360_v36 = vpop.eup %5359 }
 0xe96   :  { %v3001_v63 = vrot.slane %v5360_v36, 4  ;;  %v2986_v25 = vsub.f32 0.0, %v5360_v36 }
 0xe97   :  { %v5362_v5 = vpop.eup %5361 }
 0xe98   :  { %v3002_v46 = vadd.f32 %v5360_v36, %v3001_v63  ;;  %v3007_v27 = vrot.slane %v5362_v5, 4  ;;  %v2988_v15 = vmul.f32 1.442695, %v2986_v25  ;;  %v2987_v49 = vsub.f32 0.0, %v5362_v5  ;;  %v3066_v63 = vpop.permute.xlu0 %3065 }
 0xe9a   :  { %v3003_v24 = vrot.slane %v3002_v46, 2  ;;  %v3008_v48 = vadd.f32 %v5362_v5, %v3007_v27  ;;  %5363 = vpow2.f32 %v2988_v15  ;;  %v2990_v18 = vmul.f32 1.442695, %v2987_v49 }
 0xe9c   :  { %v3004_v30 = vadd.f32 %v3003_v24, %v3002_v46  ;;  %5365 = vpow2.f32 %v2990_v18  ;;  %v3009_v26 = vrot.slane %v3008_v48, 2 }
 0xe9e   :  { %v3005_v44 = vrot.slane %v3004_v30, 1  ;;  %v3010_v60 = vadd.f32 %v3009_v26, %v3008_v48  ;;  %v3061_v48 = vpop.permute.xlu1 %3060 }
 0xea0   :  { %v6689_v13 = vadd.f32 %v3005_v44, %v3004_v30  ;;  %v3011_v51 = vrot.slane %v3010_v60, 1 }
 0xea2   :  { %v6691_v0 = vadd.f32 %v3011_v51, %v3010_v60  ;;  %v3013_v11 = vsub.f32 %v6582_v6, %v6689_v13  ;;  %v3056_v60 = vpop.permute.xlu0 %3055 }
 0xea4   :  { %v3014_v41 = vsub.f32 %v6587_v61, %v6691_v0 }
 0xea7   :  { %v5364_v45 = vpop.eup %5363 }
 0xea8   :  { %v2992_v14 = vmul.f32 %v5364_v45, %v2984_v19 }
 0xea9   :  { %v5366_v62 = vpop.eup %5365 }
 0xeaa   :  { %v2993_v3 = vmul.f32 %v5366_v62, %v2985_v2  ;;  %v6700_v4 = vsel %vm2998_vm14, %v6592_v35, %v2992_v14  ;;  %v5180_v35 = vld [vmem:[%s7029_s2 + $0x88] sm:$0xff] }
 0xeab   :  { %v3023_v56 = vmul.f32 %v3021_v9, %v6700_v4 }
 0xeac   :  { %v6703_v12 = vsel %vm2998_vm14, %v6595_v20, %v2993_v3  ;;  %v5181_v20 = vld [vmem:[%s7029_s2 + $0x90] sm:$0xff]  ;;  %v3051_v3 = vpop.permute.xlu1 %3050 }
 0xead   :  { %v3024_v37 = vmul.f32 %v3021_v9, %v6703_v12 }
 0xeaf   :  { %3137 = vmatprep.subr.mxu0 %v3024_v37 }
 0xeb0   :  { %3138 = vmatpush1.msra.mxu0 %v3023_v56 }
 0xeb1   :  { %5195 = vmatmul.mubr.msk.f32.vlgmr.msra.gmra.mxu0 %vm101_vm3, %v5179_v47 }
 0xeb2   :  { %3177 = vmatprep.mubr.f32.mxu0 %v7097_v54 }
 0xeb5   :  { %5196 = vmatmul.mubr.msk.f32.gmra.mxu0 %vm101_vm3, %v5180_v35 }
 0xeb6   :  { %3183 = vmatprep.mubr.f32.mxu0 %v7097_v54 }
 0xeb9   :  { %5197 = vmatmul.mubr.msk.f32.gmra.mxu0 %vm101_vm3, %v5181_v20 }
 0xeba   :  { %3189 = vmatprep.mubr.f32.mxu0 %v7097_v54 }
 0xebd   :  { %5198 = vmatmul.mubr.msk.f32.gmra.mxu0 %vm101_vm3, %v5182_v40  ;;  %v3046_v40 = vpop.permute.xlu0 %3045 }
 0xebe   :  { %3195 = vmatprep.mubr.f32.mxu0 %v7097_v54 }
 0xec1   :  { %5199 = vmatmul.mubr.msk.f32.gmra.mxu0 %vm101_vm3, %v5183_v33 }
 0xec2   :  { %3201 = vmatprep.mubr.f32.mxu0 %v7097_v54 }
 0xec5   :  { %5200 = vmatmul.mubr.msk.f32.gmra.mxu0 %vm101_vm3, %v5184_v52 }
 0xec6   :  { %3207 = vmatprep.mubr.f32.mxu0 %v7097_v54 }
 0xec9   :  { %5201 = vmatmul.mubr.msk.f32.gmra.mxu0 %vm101_vm3, %v5185_v34 }
 0xeca   :  { %3213 = vmatprep.mubr.f32.mxu0 %v7097_v54 }
 0xecd   :  { %5202 = vmatmul.mubr.msk.f32.gmra.mxu0 %vm101_vm3, %v5186_v55 }
 0xece   :  { %3565 = vmatprep.mubr.f32.mxu0 %v7097_v54 }
 0xf71   :  { %v3173_v59 = vpop.f32.mrf.mxu0 }
 0xf73   :  { %v3175_v22 = vpop.f32.mrf.mxu0 }
 0xf74   :  { %v3176_v55 = vadd.f32 %v3175_v22, %v3046_v40 }
 0xf75   :  { %v3179_v21 = vpop.f32.mrf.mxu0 }
 0xf76   :  { %v3180_v33 = vadd.f32 %v3179_v21, %v3051_v3 }
 0xf77   :  { %v3181_v31 = vpop.f32.mrf.mxu0 }
 0xf78   :  { %v3182_v47 = vadd.f32 %v3181_v31, %v3051_v3  ;;  %v3222_v31 = vmul.f32 0.01, %v3180_v33 }
 0xf79   :  { %v3185_v28 = vpop.f32.mrf.mxu0 }
 0xf7a   :  { %v3186_v9 = vadd.f32 %v3185_v28, %v3056_v60  ;;  %v3223_v28 = vmul.f32 0.01, %v3182_v47 }
 0xf7b   :  { %v3187_v7 = vpop.f32.mrf.mxu0 }
 0xf7c   :  { %v3188_v2 = vadd.f32 %v3187_v7, %v3056_v60  ;;  %v3239_v22 = vmax.f32 %v3182_v47, %v3223_v28 }
 0xf7d   :  { %v3191_v38 = vpop.f32.mrf.mxu0 }
 0xf7e   :  { %v3192_v19 = vadd.f32 %v3191_v38, %v3061_v48  ;;  %v3225_v38 = vmul.f32 0.01, %v3188_v2 }
 0xf7f   :  { %v3193_v43 = vpop.f32.mrf.mxu0 }
 0xf80   :  { %v3194_v17 = vadd.f32 %v3193_v43, %v3061_v48  ;;  %v3226_v52 = vmul.f32 0.01, %v3192_v19  ;;  %v3174_v43 = vadd.f32 %v3173_v59, %v3046_v40 }
 0xf81   :  { %v3197_v32 = vpop.f32.mrf.mxu0 }
 0xf82   :  { %v3198_v51 = vadd.f32 %v3197_v32, %v3066_v63  ;;  %v3227_v35 = vmul.f32 0.01, %v3194_v17  ;;  %v3224_v32 = vmul.f32 0.01, %v3186_v9  ;;  %v3220_v21 = vmul.f32 0.01, %v3174_v43 }
 0xf83   :  { %v3199_v1 = vpop.f32.mrf.mxu0 }
 0xf84   :  { %v3200_v26 = vadd.f32 %v3199_v1, %v3066_v63  ;;  %v3228_v37 = vmul.f32 0.01, %v3198_v51  ;;  %v5203_v63 = vld [vmem:[%s7031_s4 + $0x80] sm:$0xff] }
 0xf85   :  { %v3203_v39 = vpop.f32.mrf.mxu0 }
 0xf86   :  { %v3204_v18 = vadd.f32 %v3203_v39, %v3071_v10  ;;  %v3229_v62 = vmul.f32 0.01, %v3200_v26  ;;  %v3244_v1 = vmax.f32 %v3198_v51, %v3228_v37  ;;  %v3242_v39 = vmax.f32 %v3192_v19, %v3226_v52  ;;  %v3303_v19 = vpop.permute.xlu0 %3302 }
 0xf87   :  { %v3205_v58 = vpop.f32.mrf.mxu0 }
 0xf88   :  { %v3206_v49 = vadd.f32 %v3205_v58, %v3071_v10  ;;  %v3230_v45 = vmul.f32 0.01, %v3204_v18  ;;  %v3245_v7 = vmax.f32 %v3200_v26, %v3229_v62  ;;  %v3241_v58 = vmax.f32 %v3188_v2, %v3225_v38 }
 0xf89   :  { %v3209_v50 = vpop.f32.mrf.mxu0  ;;  %v3238_v10 = vmax.f32 %v3180_v33, %v3222_v31 }
 0xf8a   :  { %v3210_v27 = vadd.f32 %v3209_v50, %v3076_v57  ;;  %v3231_v42 = vmul.f32 0.01, %v3206_v49  ;;  %v3246_v34 = vmax.f32 %v3204_v18, %v3230_v45  ;;  %v3240_v50 = vmax.f32 %v3186_v9, %v3224_v32 }
 0xf8b   :  { %v3211_v36 = vpop.f32.mrf.mxu0 }
 0xf8c   :  { %v3212_v5 = vadd.f32 %v3211_v36, %v3076_v57  ;;  %v3232_v53 = vmul.f32 0.01, %v3210_v27  ;;  %v3247_v20 = vmax.f32 %v3206_v49, %v3231_v42  ;;  %v3221_v57 = vmul.f32 0.01, %v3176_v55  ;;  %v5209_v49 = vld [vmem:[%s7031_s4 + $0xb0] sm:$0xff]  ;;  %v3308_v42 = vpop.permute.xlu1 %3307 }
 0xf8d   :  { %v3215_v25 = vpop.f32.mrf.mxu0  ;;  %v3236_v36 = vmax.f32 %v3174_v43, %v3220_v21 }
 0xf8e   :  { %v3216_v46 = vadd.f32 %v3215_v25, %v3081_v29  ;;  %v3233_v16 = vmul.f32 0.01, %v3212_v5  ;;  %v3248_v56 = vmax.f32 %v3210_v27, %v3232_v53  ;;  %v3237_v59 = vmax.f32 %v3176_v55, %v3221_v57  ;;  %v5204_v25 = vld [vmem:[%s7031_s4 + $0x88] sm:$0xff]  ;;  %v5207_v27 = vld [vmem:[%s7031_s4 + $0xa0] sm:$0xff] }
 0xf8f   :  { %v3217_v15 = vpop.f32.mrf.mxu0 }
 0xf90   :  { %v3218_v24 = vadd.f32 %v3217_v15, %v3081_v29  ;;  %v3234_v30 = vmul.f32 0.01, %v3216_v46  ;;  %v3249_v8 = vmax.f32 %v3212_v5, %v3233_v16  ;;  %v3243_v29 = vmax.f32 %v3194_v17, %v3227_v35  ;;  %v5205_v5 = vld [vmem:[%s7031_s4 + $0x90] sm:$0xff]  ;;  %v5208_v15 = vld [vmem:[%s7031_s4 + $0xa8] sm:$0xff]  ;;  %v3298_v2 = vpop.permute.xlu1 %3297 }
 0xf92   :  { %v3235_v44 = vmul.f32 0.01, %v3218_v24  ;;  %v3250_v14 = vmax.f32 %v3216_v46, %v3234_v30  ;;  %v5206_v46 = vld [vmem:[%s7031_s4 + $0x98] sm:$0xff] }
 0xf94   :  { %v3251_v23 = vmax.f32 %v3218_v24, %v3235_v44  ;;  %v5210_v24 = vld [vmem:[%s7031_s4 + $0xb8] sm:$0xff]  ;;  %v3288_v40 = vpop.permute.xlu1 %3287 }
 0xf96   :  { %3350 = vmatprep.subr.mxu1 %v3251_v23 }
 0xf97   :  { %3351 = vmatpush1.msra.mxu1 %v3250_v14 }
 0xf98   :  { %3352 = vmatprep.subr.mxu1 %v3249_v8  ;;  %v3293_v8 = vpop.permute.xlu0 %3292 }
 0xf99   :  { %3353 = vmatpush1.msra.mxu1 %v3248_v56 }
 0xf9a   :  { %3354 = vmatprep.subr.mxu1 %v3247_v20 }
 0xf9b   :  { %3355 = vmatpush1.msra.mxu1 %v3246_v34 }
 0xf9c   :  { %3356 = vmatprep.subr.mxu1 %v3245_v7  ;;  %v3283_v7 = vpop.permute.xlu0 %3282 }
 0xf9d   :  { %3357 = vmatpush1.msra.mxu1 %v3244_v1 }
 0xf9e   :  { %3358 = vmatprep.subr.mxu1 %v3243_v29 }
 0xf9f   :  { %3359 = vmatpush1.msra.mxu1 %v3242_v39 }
 0xfa0   :  { %3360 = vmatprep.subr.mxu1 %v3241_v58 }
 0xfa1   :  { %3361 = vmatpush1.msra.mxu1 %v3240_v50 }
 0xfa2   :  { %3362 = vmatprep.subr.mxu1 %v3239_v22  ;;  %v3278_v22 = vpop.permute.xlu1 %3277 }
 0xfa3   :  { %3363 = vmatpush1.msra.mxu1 %v3238_v10 }
 0xfa4   :  { %3364 = vmatprep.subr.mxu1 %v3237_v59 }
 0xfa5   :  { %3365 = vmatpush1.msra.mxu1 %v3236_v36 }
 0xfa6   :  { %5219 = vmatmul.mubr.msk.f32.vlgmr.msra.gmra.mxu1 %vm329_vm9, %v5203_v63 }
 0xfa7   :  { %3404 = vmatprep.mubr.f32.mxu1 %v7097_v54 }
 0xfaa   :  { %5220 = vmatmul.mubr.msk.f32.gmra.mxu1 %vm329_vm9, %v5204_v25 }
 0xfab   :  { %3410 = vmatprep.mubr.f32.mxu1 %v7097_v54 }
 0xfae   :  { %5221 = vmatmul.mubr.msk.f32.gmra.mxu1 %vm329_vm9, %v5205_v5 }
 0xfaf   :  { %3416 = vmatprep.mubr.f32.mxu1 %v7097_v54 }
 0xfb2   :  { %5222 = vmatmul.mubr.msk.f32.gmra.mxu1 %vm329_vm9, %v5206_v46  ;;  %v3273_v46 = vpop.permute.xlu0 %3272 }
 0xfb3   :  { %3422 = vmatprep.mubr.f32.mxu1 %v7097_v54 }
 0xfb6   :  { %5223 = vmatmul.mubr.msk.f32.gmra.mxu1 %vm329_vm9, %v5207_v27 }
 0xfb7   :  { %3428 = vmatprep.mubr.f32.mxu1 %v7097_v54 }
 0xfba   :  { %5224 = vmatmul.mubr.msk.f32.gmra.mxu1 %vm329_vm9, %v5208_v15 }
 0xfbb   :  { %3434 = vmatprep.mubr.f32.mxu1 %v7097_v54 }
 0xfbe   :  { %5225 = vmatmul.mubr.msk.f32.gmra.mxu1 %vm329_vm9, %v5209_v49 }
 0xfbf   :  { %3440 = vmatprep.mubr.f32.mxu1 %v7097_v54 }
 0xfc2   :  { %5226 = vmatmul.mubr.msk.f32.gmra.mxu1 %vm329_vm9, %v5210_v24 }
 0xfc3   :  { %3767 = vmatprep.mubr.f32.mxu1 %v7097_v54 }
0x1066   :  { %v3400_v48 = vpop.f32.mrf.mxu1 }
0x1068   :  { %v3402_v18 = vpop.f32.mrf.mxu1 }
0x1069   :  { %v3403_v24 = vadd.f32 %v3402_v18, %v3273_v46 }
0x106a   :  { %v3406_v30 = vpop.f32.mrf.mxu1 }
0x106b   :  { %v3407_v27 = vadd.f32 %v3406_v30, %v3278_v22 }
0x106c   :  { %v3408_v26 = vpop.f32.mrf.mxu1 }
0x106d   :  { %v3409_v63 = vadd.f32 %v3408_v26, %v3278_v22  ;;  %v3449_v26 = vmul.f32 0.01, %v3407_v27 }
0x106e   :  { %v3412_v16 = vpop.f32.mrf.mxu1 }
0x106f   :  { %v3413_v10 = vadd.f32 %v3412_v16, %v3283_v7  ;;  %v3450_v16 = vmul.f32 0.01, %v3409_v63 }
0x1070   :  { %v3414_v44 = vpop.f32.mrf.mxu1 }
0x1071   :  { %v3415_v58 = vadd.f32 %v3414_v44, %v3283_v7  ;;  %v3466_v18 = vmax.f32 %v3409_v63, %v3450_v16  ;;  %v5241_v16 = vld [vmem:[%s7029_s2 + $0x78] sm:$0xff] }
0x1072   :  { %v3418_v60 = vpop.f32.mrf.mxu1 }
0x1073   :  { %v3419_v31 = vadd.f32 %v3418_v60, %v3288_v40  ;;  %v3452_v60 = vmul.f32 0.01, %v3415_v58 }
0x1074   :  { %v3420_v51 = vpop.f32.mrf.mxu1 }
0x1075   :  { %v3421_v1 = vadd.f32 %v3420_v51, %v3288_v40  ;;  %v3453_v15 = vmul.f32 0.01, %v3419_v31  ;;  %v3401_v51 = vadd.f32 %v3400_v48, %v3273_v46 }
0x1076   :  { %v3424_v53 = vpop.f32.mrf.mxu1 }
0x1077   :  { %v3425_v43 = vadd.f32 %v3424_v53, %v3293_v8  ;;  %v3454_v25 = vmul.f32 0.01, %v3421_v1  ;;  %v3451_v53 = vmul.f32 0.01, %v3413_v10  ;;  %v3447_v30 = vmul.f32 0.01, %v3401_v51 }
0x1078   :  { %v3426_v17 = vpop.f32.mrf.mxu1 }
0x1079   :  { %v3427_v34 = vadd.f32 %v3426_v17, %v3293_v8  ;;  %v3455_v59 = vmul.f32 0.01, %v3425_v43  ;;  %v5227_v8 = vld [vmem:[%s7033_s6 + $0x20] sm:$0xff] }
0x107a   :  { %v3430_v23 = vpop.f32.mrf.mxu1 }
0x107b   :  { %v3431_v33 = vadd.f32 %v3430_v23, %v3298_v2  ;;  %v3456_v21 = vmul.f32 0.01, %v3427_v34  ;;  %v3471_v17 = vmax.f32 %v3425_v43, %v3455_v59  ;;  %v3469_v23 = vmax.f32 %v3419_v31, %v3453_v15 }
0x107c   :  { %v3432_v45 = vpop.f32.mrf.mxu1 }
0x107d   :  { %v3433_v35 = vadd.f32 %v3432_v45, %v3298_v2  ;;  %v3457_v39 = vmul.f32 0.01, %v3431_v33  ;;  %v3472_v44 = vmax.f32 %v3427_v34, %v3456_v21  ;;  %v3468_v45 = vmax.f32 %v3415_v58, %v3452_v60 }
0x107e   :  { %v3436_v14 = vpop.f32.mrf.mxu1  ;;  %v3465_v2 = vmax.f32 %v3407_v27, %v3449_v26 }
0x107f   :  { %v3437_v56 = vadd.f32 %v3436_v14, %v3303_v19  ;;  %v3458_v28 = vmul.f32 0.01, %v3433_v35  ;;  %v3473_v49 = vmax.f32 %v3431_v33, %v3457_v39  ;;  %v3467_v14 = vmax.f32 %v3413_v10, %v3451_v53  ;;  %v5239_v53 = vld [vmem:[%s7029_s2 + $0x68] sm:$0xff] }
0x1080   :  { %v3438_v62 = vpop.f32.mrf.mxu1 }
0x1081   :  { %v3439_v9 = vadd.f32 %v3438_v62, %v3303_v19  ;;  %v3459_v32 = vmul.f32 0.01, %v3437_v56  ;;  %v3474_v5 = vmax.f32 %v3433_v35, %v3458_v28  ;;  %v3448_v19 = vmul.f32 0.01, %v3403_v24 }
0x1082   :  { %v3442_v3 = vpop.f32.mrf.mxu1  ;;  %v3463_v62 = vmax.f32 %v3401_v51, %v3447_v30  ;;  %v5238_v51 = vld [vmem:[%s7029_s2 + $0x60] sm:$0xff] }
0x1083   :  { %v3443_v37 = vadd.f32 %v3442_v3, %v3308_v42  ;;  %v3460_v55 = vmul.f32 0.01, %v3439_v9  ;;  %v3475_v36 = vmax.f32 %v3437_v56, %v3459_v32  ;;  %v3464_v48 = vmax.f32 %v3403_v24, %v3448_v19  ;;  %v5228_v3 = vld [vmem:[%s7033_s6 + $0x28] sm:$0xff] }
0x1084   :  { %v3444_v47 = vpop.f32.mrf.mxu1 }
0x1085   :  { %v3445_v20 = vadd.f32 %v3444_v47, %v3308_v42  ;;  %v3461_v52 = vmul.f32 0.01, %v3443_v37  ;;  %v3476_v50 = vmax.f32 %v3439_v9, %v3460_v55  ;;  %v3470_v42 = vmax.f32 %v3421_v1, %v3454_v25  ;;  %v3488_v9 = vpop.permute.xlu1 %3487 }
0x1087   :  { %v3462_v38 = vmul.f32 0.01, %v3445_v20  ;;  %v3477_v57 = vmax.f32 %v3443_v37, %v3461_v52 }
0x1089   :  { %v3478_v29 = vmax.f32 %v3445_v20, %v3462_v38  ;;  %v3593_v27 = vpop.permute.xlu1 %3592 }
0x108a   :  { %vm3594_vm15 = vcmp.eq.s32.totalorder %v3593_v27, 1 }
0x108b   :  { %3517 = vmatprep.subr.mxu0 %v3478_v29 }
0x108c   :  { %3518 = vmatpush1.msra.mxu0 %v3477_v57 }
0x108d   :  { %3519 = vmatprep.subr.mxu0 %v3476_v50  ;;  %v3493_v50 = vpop.permute.xlu0 %3492 }
0x108e   :  { %3520 = vmatpush1.msra.mxu0 %v3475_v36 }
0x108f   :  { %3521 = vmatprep.subr.mxu0 %v3474_v5 }
0x1090   :  { %3522 = vmatpush1.msra.mxu0 %v3473_v49 }
0x1091   :  { %3523 = vmatprep.subr.mxu0 %v3472_v44  ;;  %v3617_v13 = vpop.permute.xlu0 %3616  ;;  %v5237_v44 = vld [vmem:[%s7029_s2 + $0x58] sm:$0xff] }
0x1092   :  { %3524 = vmatpush1.msra.mxu0 %v3471_v17  ;;  %v5240_v17 = vld [vmem:[%s7029_s2 + $0x70] sm:$0xff] }
0x1093   :  { %3525 = vmatprep.subr.mxu0 %v3470_v42 }
0x1094   :  { %3526 = vmatpush1.msra.mxu0 %v3469_v23 }
0x1095   :  { %3527 = vmatprep.subr.mxu0 %v3468_v45 }
0x1096   :  { %3528 = vmatpush1.msra.mxu0 %v3467_v14 }
0x1097   :  { %3529 = vmatprep.subr.mxu0 %v3466_v18 }
0x1098   :  { %3530 = vmatpush1.msra.mxu0 %v3465_v2 }
0x1099   :  { %3531 = vmatprep.subr.mxu0 %v3464_v48 }
0x109a   :  { %3532 = vmatpush1.msra.mxu0 %v3463_v62  ;;  %v3677_v62 = vpop.permute.xlu1 %3676 }
0x109b   :  { %5231 = vmatmul.mubr.msk.f32.vlgmr.msra.gmra.mxu0 %vm329_vm9, %v5227_v8 }
0x109c   :  { %3571 = vmatprep.mubr.f32.mxu0 %v7097_v54 }
0x109f   :  { %5232 = vmatmul.mubr.msk.f32.gmra.mxu0 %vm329_vm9, %v5228_v3  ;;  %v3672_v3 = vpop.permute.xlu0 %3671 }
0x10a0   :  { %3994 = vmatprep.mubr.f32.mxu0 %v7097_v54 }
0x115b   :  { %v3567_v37 = vpop.f32.mrf.mxu0 }
0x115c   :  { %v3568_v56 = vadd.f32 %v3567_v37, %v3488_v9 }
0x115d   :  { %v3569_v47 = vpop.f32.mrf.mxu0 }
0x115e   :  { %5367 = vtanh.f32 %v3568_v56  ;;  %v3570_v35 = vadd.f32 %v3569_v47, %v3488_v9  ;;  %v3667_v56 = vpop.permute.xlu1 %3666 }
0x115f   :  { %v3573_v31 = vpop.f32.mrf.mxu0 }
0x1160   :  { %5369 = vtanh.f32 %v3570_v35  ;;  %v3574_v10 = vadd.f32 %v3573_v31, %v3493_v50  ;;  %v3662_v35 = vpop.permute.xlu0 %3661 }
0x1161   :  { %v3575_v22 = vpop.f32.mrf.mxu0 }
0x1162   :  { %v3576_v63 = vadd.f32 %v3575_v22, %v3493_v50  ;;  %v3580_v5 = vsub.f32 %v6700_v4, %v3574_v10 }
0x1164   :  { %v3581_v49 = vsub.f32 %v6703_v12, %v3576_v63  ;;  %v3652_v31 = vpop.permute.xlu0 %3651 }
0x116b   :  { %v5368_v20 = vpop.eup %5367 }
0x116c   :  { %v3597_v40 = vrot.slane %v5368_v20, 4  ;;  %v3582_v33 = vsub.f32 0.0, %v5368_v20 }
0x116d   :  { %v5370_v52 = vpop.eup %5369 }
0x116e   :  { %v3598_v34 = vadd.f32 %v5368_v20, %v3597_v40  ;;  %v3603_v55 = vrot.slane %v5370_v52, 4  ;;  %v3584_v38 = vmul.f32 1.442695, %v3582_v33  ;;  %v3583_v7 = vsub.f32 0.0, %v5370_v52 }
0x1170   :  { %v3599_v43 = vrot.slane %v3598_v34, 2  ;;  %5371 = vpow2.f32 %v3584_v38  ;;  %v3586_v32 = vmul.f32 1.442695, %v3583_v7  ;;  %v3604_v1 = vadd.f32 %v5370_v52, %v3603_v55  ;;  %v3657_v7 = vpop.permute.xlu1 %3656 }
0x1172   :  { %5373 = vpow2.f32 %v3586_v32  ;;  %v3600_v28 = vadd.f32 %v3599_v43, %v3598_v34  ;;  %v3605_v29 = vrot.slane %v3604_v1, 2 }
0x1174   :  { %v3601_v39 = vrot.slane %v3600_v28, 1  ;;  %v3606_v57 = vadd.f32 %v3605_v29, %v3604_v1  ;;  %v3647_v27 = vpop.permute.xlu1 %3646 }
0x1176   :  { %v3602_v58 = vadd.f32 %v3601_v39, %v3600_v28  ;;  %v3607_v21 = vrot.slane %v3606_v57, 1 }
0x1178   :  { %v3608_v59 = vadd.f32 %v3607_v21, %v3606_v57  ;;  %v6800_v36 = vsub.f32 %v3013_v11, %v3602_v58 }
0x117a   :  { %v6805_v25 = vsub.f32 %v3014_v41, %v3608_v59  ;;  %v5234_v41 = vld [vmem:[%s7029_s2 + $0x40] sm:$0xff] }
0x117d   :  { %v5372_v46 = vpop.eup %5371 }
0x117e   :  { %v3588_v15 = vmul.f32 %v5372_v46, %v3580_v5 }
0x117f   :  { %v5374_v24 = vpop.eup %5373 }
0x1180   :  { %v3589_v60 = vmul.f32 %v5374_v24, %v3581_v49  ;;  %v6810_v6 = vsel %vm3594_vm15, %v6700_v4, %v3588_v15  ;;  %v5235_v4 = vld [vmem:[%s7029_s2 + $0x48] sm:$0xff] }
0x1181   :  { %v3619_v0 = vmul.f32 %v3617_v13, %v6810_v6 }
0x1182   :  { %v6813_v11 = vsel %vm3594_vm15, %v6703_v12, %v3589_v60  ;;  %v5236_v12 = vld [vmem:[%s7029_s2 + $0x50] sm:$0xff] }
0x1183   :  { %v3620_v61 = vmul.f32 %v3617_v13, %v6813_v11 }
0x1185   :  { %3733 = vmatprep.subr.mxu1 %v3620_v61 }
0x1186   :  { %3734 = vmatpush1.msra.mxu1 %v3619_v0  ;;  %v3642_v0 = vpop.permute.xlu0 %3641 }
0x1187   :  { %5250 = vmatmul.mubr.msk.f32.vlgmr.msra.gmra.mxu1 %vm101_vm3, %v5234_v41 }
0x1188   :  { %3773 = vmatprep.mubr.f32.mxu1 %v7097_v54 }
0x118b   :  { %5251 = vmatmul.mubr.msk.f32.gmra.mxu1 %vm101_vm3, %v5235_v4 }
0x118c   :  { %3779 = vmatprep.mubr.f32.mxu1 %v7097_v54 }
0x118f   :  { %5252 = vmatmul.mubr.msk.f32.gmra.mxu1 %vm101_vm3, %v5236_v12 }
0x1190   :  { %3785 = vmatprep.mubr.f32.mxu1 %v7097_v54 }
0x1193   :  { %5253 = vmatmul.mubr.msk.f32.gmra.mxu1 %vm101_vm3, %v5237_v44 }
0x1194   :  { %3791 = vmatprep.mubr.f32.mxu1 %v7097_v54 }
0x1197   :  { %5254 = vmatmul.mubr.msk.f32.gmra.mxu1 %vm101_vm3, %v5238_v51 }
0x1198   :  { %3797 = vmatprep.mubr.f32.mxu1 %v7097_v54 }
0x119b   :  { %5255 = vmatmul.mubr.msk.f32.gmra.mxu1 %vm101_vm3, %v5239_v53 }
0x119c   :  { %3803 = vmatprep.mubr.f32.mxu1 %v7097_v54 }
0x119f   :  { %5256 = vmatmul.mubr.msk.f32.gmra.mxu1 %vm101_vm3, %v5240_v17 }
0x11a0   :  { %3809 = vmatprep.mubr.f32.mxu1 %v7097_v54 }
0x11a3   :  { %5257 = vmatmul.mubr.msk.f32.gmra.mxu1 %vm101_vm3, %v5241_v16 }
0x11a4   :  { %4161 = vmatprep.mubr.f32.mxu1 %v7097_v54 }
0x1247   :  { %v3769_v42 = vpop.f32.mrf.mxu1 }
0x1248   :  { %v3770_v17 = vadd.f32 %v3769_v42, %v3642_v0 }
0x1249   :  { %v3771_v26 = vpop.f32.mrf.mxu1 }
0x124a   :  { %v3772_v44 = vadd.f32 %v3771_v26, %v3642_v0 }
0x124b   :  { %v3775_v23 = vpop.f32.mrf.mxu1 }
0x124c   :  { %v3776_v41 = vadd.f32 %v3775_v23, %v3647_v27  ;;  %v3816_v23 = vmul.f32 0.01, %v3770_v17 }
0x124d   :  { %v3777_v19 = vpop.f32.mrf.mxu1 }
0x124e   :  { %v3778_v60 = vadd.f32 %v3777_v19, %v3647_v27  ;;  %v3818_v19 = vmul.f32 0.01, %v3776_v41 }
0x124f   :  { %v3781_v45 = vpop.f32.mrf.mxu1 }
0x1250   :  { %v3782_v15 = vadd.f32 %v3781_v45, %v3652_v31  ;;  %v3819_v45 = vmul.f32 0.01, %v3778_v60 }
0x1251   :  { %v3783_v30 = vpop.f32.mrf.mxu1 }
0x1252   :  { %v3784_v63 = vadd.f32 %v3783_v30, %v3652_v31  ;;  %v3820_v16 = vmul.f32 0.01, %v3782_v15  ;;  %v3835_v26 = vmax.f32 %v3778_v60, %v3819_v45  ;;  %v3904_v31 = vpop.permute.xlu1 %3903 }
0x1253   :  { %v3787_v14 = vpop.f32.mrf.mxu1 }
0x1254   :  { %v3788_v22 = vadd.f32 %v3787_v14, %v3657_v7  ;;  %v3821_v51 = vmul.f32 0.01, %v3784_v63 }
0x1255   :  { %v3789_v18 = vpop.f32.mrf.mxu1 }
0x1256   :  { %v3790_v58 = vadd.f32 %v3789_v18, %v3657_v7  ;;  %v3822_v4 = vmul.f32 0.01, %v3788_v22 }
0x1257   :  { %v3793_v2 = vpop.f32.mrf.mxu1 }
0x1258   :  { %v3794_v39 = vadd.f32 %v3793_v2, %v3662_v35  ;;  %v3823_v13 = vmul.f32 0.01, %v3790_v58  ;;  %v3838_v18 = vmax.f32 %v3788_v22, %v3822_v4  ;;  %v3817_v2 = vmul.f32 0.01, %v3772_v44 }
0x1259   :  { %v3795_v48 = vpop.f32.mrf.mxu1 }
0x125a   :  { %v3796_v1 = vadd.f32 %v3795_v48, %v3662_v35  ;;  %v3824_v49 = vmul.f32 0.01, %v3794_v39  ;;  %v3839_v14 = vmax.f32 %v3790_v58, %v3823_v13  ;;  %v3837_v48 = vmax.f32 %v3784_v63, %v3821_v51  ;;  %v5262_v35 = vld [vmem:[%s7031_s4 + $0x60] sm:$0xff] }
0x125b   :  { %v3799_v8 = vpop.f32.mrf.mxu1  ;;  %v3833_v42 = vmax.f32 %v3772_v44, %v3817_v2 }
0x125c   :  { %v3800_v43 = vadd.f32 %v3799_v8, %v3667_v56  ;;  %v3825_v5 = vmul.f32 0.01, %v3796_v1  ;;  %v3840_v30 = vmax.f32 %v3794_v39, %v3824_v49  ;;  %v3834_v8 = vmax.f32 %v3776_v41, %v3818_v19 }
0x125d   :  { %v3801_v9 = vpop.f32.mrf.mxu1 }
0x125e   :  { %v3802_v55 = vadd.f32 %v3801_v9, %v3667_v56  ;;  %v3826_v10 = vmul.f32 0.01, %v3800_v43  ;;  %v3841_v53 = vmax.f32 %v3796_v1, %v3825_v5  ;;  %v5258_v9 = vld [vmem:[%s7031_s4 + $0x40] sm:$0xff]  ;;  %v5260_v56 = vld [vmem:[%s7031_s4 + $0x50] sm:$0xff] }
0x125f   :  { %v3805_v37 = vpop.f32.mrf.mxu1 }
0x1260   :  { %v3806_v52 = vadd.f32 %v3805_v37, %v3672_v3  ;;  %v3827_v21 = vmul.f32 0.01, %v3802_v55  ;;  %v3842_v12 = vmax.f32 %v3800_v43, %v3826_v10  ;;  %v5259_v37 = vld [vmem:[%s7031_s4 + $0x48] sm:$0xff] }
0x1261   :  { %v3807_v47 = vpop.f32.mrf.mxu1 }
0x1262   :  { %v3808_v40 = vadd.f32 %v3807_v47, %v3672_v3  ;;  %v3828_v57 = vmul.f32 0.01, %v3806_v52  ;;  %v3843_v61 = vmax.f32 %v3802_v55, %v3827_v21  ;;  %v3832_v3 = vmax.f32 %v3770_v17, %v3816_v23  ;;  %v5261_v47 = vld [vmem:[%s7031_s4 + $0x58] sm:$0xff] }
0x1263   :  { %v3811_v20 = vpop.f32.mrf.mxu1 }
0x1264   :  { %v3812_v33 = vadd.f32 %v3811_v20, %v3677_v62  ;;  %v3829_v28 = vmul.f32 0.01, %v3808_v40  ;;  %v3844_v24 = vmax.f32 %v3806_v52, %v3828_v57  ;;  %v5263_v20 = vld [vmem:[%s7031_s4 + $0x68] sm:$0xff]  ;;  %v3899_v57 = vpop.permute.xlu0 %3898 }
0x1265   :  { %v3813_v34 = vpop.f32.mrf.mxu1 }
0x1266   :  { %v3814_v38 = vadd.f32 %v3813_v34, %v3677_v62  ;;  %v3830_v32 = vmul.f32 0.01, %v3812_v33  ;;  %v3845_v46 = vmax.f32 %v3808_v40, %v3829_v28  ;;  %v3836_v62 = vmax.f32 %v3782_v15, %v3820_v16  ;;  %v5264_v40 = vld [vmem:[%s7031_s4 + $0x70] sm:$0xff] }
0x1268   :  { %v3831_v29 = vmul.f32 0.01, %v3814_v38  ;;  %v3846_v59 = vmax.f32 %v3812_v33, %v3830_v32  ;;  %v5265_v33 = vld [vmem:[%s7031_s4 + $0x78] sm:$0xff]  ;;  %v3889_v10 = vpop.permute.xlu0 %3888 }
0x126a   :  { %v3847_v50 = vmax.f32 %v3814_v38, %v3831_v29 }
0x126c   :  { %3946 = vmatprep.subr.mxu0 %v3847_v50  ;;  %v3894_v50 = vpop.permute.xlu1 %3893  ;;  %v3879_v4 = vpop.permute.xlu0 %3878 }
0x126d   :  { %3947 = vmatpush1.msra.mxu0 %v3846_v59 }
0x126e   :  { %3948 = vmatprep.subr.mxu0 %v3845_v46 }
0x126f   :  { %3949 = vmatpush1.msra.mxu0 %v3844_v24 }
0x1270   :  { %3950 = vmatprep.subr.mxu0 %v3843_v61  ;;  %v3884_v24 = vpop.permute.xlu1 %3883 }
0x1271   :  { %3951 = vmatpush1.msra.mxu0 %v3842_v12 }
0x1272   :  { %3952 = vmatprep.subr.mxu0 %v3841_v53 }
0x1273   :  { %3953 = vmatpush1.msra.mxu0 %v3840_v30 }
0x1274   :  { %3954 = vmatprep.subr.mxu0 %v3839_v14  ;;  %v3874_v2 = vpop.permute.xlu1 %3873 }
0x1275   :  { %3955 = vmatpush1.msra.mxu0 %v3838_v18 }
0x1276   :  { %3956 = vmatprep.subr.mxu0 %v3837_v48 }
0x1277   :  { %3957 = vmatpush1.msra.mxu0 %v3836_v62 }
0x1278   :  { %3958 = vmatprep.subr.mxu0 %v3835_v26 }
0x1279   :  { %3959 = vmatpush1.msra.mxu0 %v3834_v8 }
0x127a   :  { %3960 = vmatprep.subr.mxu0 %v3833_v42 }
0x127b   :  { %3961 = vmatpush1.msra.mxu0 %v3832_v3  ;;  %v3869_v3 = vpop.permute.xlu0 %3868 }
0x127c   :  { %5274 = vmatmul.mubr.msk.f32.vlgmr.msra.gmra.mxu0 %vm329_vm9, %v5258_v9 }
0x127d   :  { %4000 = vmatprep.mubr.f32.mxu0 %v7097_v54 }
0x1280   :  { %5275 = vmatmul.mubr.msk.f32.gmra.mxu0 %vm329_vm9, %v5259_v37 }
0x1281   :  { %4006 = vmatprep.mubr.f32.mxu0 %v7097_v54 }
0x1284   :  { %5276 = vmatmul.mubr.msk.f32.gmra.mxu0 %vm329_vm9, %v5260_v56 }
0x1285   :  { %4012 = vmatprep.mubr.f32.mxu0 %v7097_v54 }
0x1288   :  { %5277 = vmatmul.mubr.msk.f32.gmra.mxu0 %vm329_vm9, %v5261_v47 }
0x1289   :  { %4018 = vmatprep.mubr.f32.mxu0 %v7097_v54 }
0x128c   :  { %5278 = vmatmul.mubr.msk.f32.gmra.mxu0 %vm329_vm9, %v5262_v35 }
0x128d   :  { %4024 = vmatprep.mubr.f32.mxu0 %v7097_v54 }
0x1290   :  { %5279 = vmatmul.mubr.msk.f32.gmra.mxu0 %vm329_vm9, %v5263_v20 }
0x1291   :  { %4030 = vmatprep.mubr.f32.mxu0 %v7097_v54 }
0x1294   :  { %5280 = vmatmul.mubr.msk.f32.gmra.mxu0 %vm329_vm9, %v5264_v40 }
0x1295   :  { %4036 = vmatprep.mubr.f32.mxu0 %v7097_v54 }
0x1298   :  { %5281 = vmatmul.mubr.msk.f32.gmra.mxu0 %vm329_vm9, %v5265_v33 }
0x1299   :  { %4585 = vmatprep.mubr.f32.mxu0 %v7097_v54 }
0x133c   :  { %v3996_v52 = vpop.f32.mrf.mxu0 }
0x133d   :  { %v3997_v40 = vadd.f32 %v3996_v52, %v3869_v3 }
0x133e   :  { %v3998_v34 = vpop.f32.mrf.mxu0 }
0x133f   :  { %v3999_v47 = vadd.f32 %v3998_v34, %v3869_v3 }
0x1340   :  { %v4002_v55 = vpop.f32.mrf.mxu0 }
0x1341   :  { %v4003_v9 = vadd.f32 %v4002_v55, %v3874_v2  ;;  %v4043_v55 = vmul.f32 0.01, %v3997_v40 }
0x1342   :  { %v4004_v38 = vpop.f32.mrf.mxu0 }
0x1343   :  { %v4005_v26 = vadd.f32 %v4004_v38, %v3874_v2  ;;  %v4045_v38 = vmul.f32 0.01, %v4003_v9 }
0x1344   :  { %v4008_v7 = vpop.f32.mrf.mxu0 }
0x1345   :  { %v4009_v48 = vadd.f32 %v4008_v7, %v3879_v4  ;;  %v4046_v7 = vmul.f32 0.01, %v4005_v26 }
0x1346   :  { %v4010_v43 = vpop.f32.mrf.mxu0 }
0x1347   :  { %v4011_v14 = vadd.f32 %v4010_v43, %v3879_v4  ;;  %v4047_v33 = vmul.f32 0.01, %v4009_v48  ;;  %v4062_v34 = vmax.f32 %v4005_v26, %v4046_v7  ;;  %v4221_v7 = vld [vmem:[%s7029_s2 + $0x28] sm:$0xff] }
0x1348   :  { %v4014_v32 = vpop.f32.mrf.mxu0 }
0x1349   :  { %v4015_v16 = vadd.f32 %v4014_v32, %v3884_v24  ;;  %v4048_v35 = vmul.f32 0.01, %v4011_v14 }
0x134a   :  { %v4016_v1 = vpop.f32.mrf.mxu0 }
0x134b   :  { %v4017_v51 = vadd.f32 %v4016_v1, %v3884_v24  ;;  %v4049_v37 = vmul.f32 0.01, %v4015_v16 }
0x134c   :  { %v4020_v28 = vpop.f32.mrf.mxu0 }
0x134d   :  { %v4021_v12 = vadd.f32 %v4020_v28, %v3889_v10  ;;  %v4050_v8 = vmul.f32 0.01, %v4017_v51  ;;  %v4065_v1 = vmax.f32 %v4015_v16, %v4049_v37  ;;  %v4044_v28 = vmul.f32 0.01, %v3999_v47 }
0x134e   :  { %v4022_v29 = vpop.f32.mrf.mxu0 }
0x134f   :  { %v4023_v61 = vadd.f32 %v4022_v29, %v3889_v10  ;;  %v4051_v23 = vmul.f32 0.01, %v4021_v12  ;;  %v4066_v32 = vmax.f32 %v4017_v51, %v4050_v8  ;;  %v4064_v29 = vmax.f32 %v4011_v14, %v4048_v35 }
0x1350   :  { %v4026_v39 = vpop.f32.mrf.mxu0  ;;  %v4060_v52 = vmax.f32 %v3999_v47, %v4044_v28 }
0x1351   :  { %v4027_v60 = vadd.f32 %v4026_v39, %v3894_v50  ;;  %v4052_v19 = vmul.f32 0.01, %v4023_v61  ;;  %v4067_v43 = vmax.f32 %v4021_v12, %v4051_v23  ;;  %v4061_v39 = vmax.f32 %v4003_v9, %v4045_v38  ;;  %v4223_v38 = vld [vmem:[%s7029_s2 + $0x38] sm:$0xff] }
0x1352   :  { %v4028_v58 = vpop.f32.mrf.mxu0 }
0x1353   :  { %v4029_v15 = vadd.f32 %v4028_v58, %v3894_v50  ;;  %v4053_v30 = vmul.f32 0.01, %v4027_v60  ;;  %v4068_v20 = vmax.f32 %v4023_v61, %v4052_v19  ;;  %v5282_v58 = vld [vmem:[%s7033_s6 + $0x10] sm:$0xff]  ;;  %v4084_v50 = vpop.permute.xlu1 %4083 }
0x1354   :  { %v4032_v21 = vpop.f32.mrf.mxu0 }
0x1355   :  { %v4033_v46 = vadd.f32 %v4032_v21, %v3899_v57  ;;  %v4054_v53 = vmul.f32 0.01, %v4029_v15  ;;  %v4069_v56 = vmax.f32 %v4027_v60, %v4053_v30  ;;  %v5283_v21 = vld [vmem:[%s7033_s6 + $0x18] sm:$0xff]  ;;  %v4089_v30 = vpop.permute.xlu0 %4088 }
0x1356   :  { %v4034_v22 = vpop.f32.mrf.mxu0 }
0x1357   :  { %v4035_v63 = vadd.f32 %v4034_v22, %v3899_v57  ;;  %v4055_v44 = vmul.f32 0.01, %v4033_v46  ;;  %v4070_v42 = vmax.f32 %v4029_v15, %v4054_v53  ;;  %v4059_v57 = vmax.f32 %v3997_v40, %v4043_v55  ;;  %v4189_v26 = vpop.permute.xlu1 %4188  ;;  %v4216_v40 = vld [vmem:[%s7029_s2] sm:$0xff] }
0x1358   :  { %v4038_v59 = vpop.f32.mrf.mxu0  ;;  %vm4190_vm0 = vcmp.eq.s32.totalorder %v4189_v26, 1 }
0x1359   :  { %v4039_v5 = vadd.f32 %v4038_v59, %v3904_v31  ;;  %v4056_v0 = vmul.f32 0.01, %v4035_v63  ;;  %v4071_v62 = vmax.f32 %v4033_v46, %v4055_v44 }
0x135a   :  { %v4040_v27 = vpop.f32.mrf.mxu0 }
0x135b   :  { %v4041_v49 = vadd.f32 %v4040_v27, %v3904_v31  ;;  %v4057_v13 = vmul.f32 0.01, %v4039_v5  ;;  %v4072_v18 = vmax.f32 %v4035_v63, %v4056_v0  ;;  %v4063_v31 = vmax.f32 %v4009_v48, %v4047_v33  ;;  %v4219_v33 = vld [vmem:[%s7029_s2 + $0x18] sm:$0xff] }
0x135d   :  { %v4058_v41 = vmul.f32 0.01, %v4041_v49  ;;  %v4073_v45 = vmax.f32 %v4039_v5, %v4057_v13 }
0x135f   :  { %v4074_v17 = vmax.f32 %v4041_v49, %v4058_v41 }
0x1361   :  { %4113 = vmatprep.subr.mxu1 %v4074_v17 }
0x1362   :  { %4114 = vmatpush1.msra.mxu1 %v4073_v45 }
0x1363   :  { %4115 = vmatprep.subr.mxu1 %v4072_v18 }
0x1364   :  { %4116 = vmatpush1.msra.mxu1 %v4071_v62 }
0x1365   :  { %4117 = vmatprep.subr.mxu1 %v4070_v42 }
0x1366   :  { %4118 = vmatpush1.msra.mxu1 %v4069_v56  ;;  %v4212_v56 = vpop.permute.xlu0 %4211 }
0x1367   :  { %4119 = vmatprep.subr.mxu1 %v4068_v20 }
0x1368   :  { %4120 = vmatpush1.msra.mxu1 %v4067_v43  ;;  %v4220_v43 = vld [vmem:[%s7029_s2 + $0x20] sm:$0xff] }
0x1369   :  { %4121 = vmatprep.subr.mxu1 %v4066_v32  ;;  %v4222_v32 = vld [vmem:[%s7029_s2 + $0x30] sm:$0xff] }
0x136a   :  { %4122 = vmatpush1.msra.mxu1 %v4065_v1 }
0x136b   :  { %4123 = vmatprep.subr.mxu1 %v4064_v29 }
0x136c   :  { %4124 = vmatpush1.msra.mxu1 %v4063_v31 }
0x136d   :  { %4125 = vmatprep.subr.mxu1 %v4062_v34 }
0x136e   :  { %4126 = vmatpush1.msra.mxu1 %v4061_v39 }
0x136f   :  { %4127 = vmatprep.subr.mxu1 %v4060_v52 }
0x1370   :  { %4128 = vmatpush1.msra.mxu1 %v4059_v57 }
0x1371   :  { %5286 = vmatmul.mubr.msk.f32.vlgmr.msra.gmra.mxu1 %vm329_vm9, %v5282_v58 }
0x1372   :  { %4167 = vmatprep.mubr.f32.mxu1 %v7097_v54 }
0x1375   :  { %5287 = vmatmul.mubr.msk.f32.gmra.mxu1 %vm329_vm9, %v5283_v21  ;;  %v4270_v21 = vpop.permute.xlu1 %4269 }
0x1376   :  { %4360 = vmatprep.mubr.f32.mxu1 %v7097_v54 }
0x1431   :  { %v4163_v22 = vpop.f32.mrf.mxu1 }
0x1432   :  { %v4164_v10 = vadd.f32 %v4163_v22, %v4084_v50  ;;  %v4265_v22 = vpop.permute.xlu0 %4264 }
0x1433   :  { %v4165_v59 = vpop.f32.mrf.mxu1 }
0x1434   :  { %5375 = vtanh.f32 %v4164_v10  ;;  %v4166_v63 = vadd.f32 %v4165_v59, %v4084_v50 }
0x1435   :  { %v4169_v44 = vpop.f32.mrf.mxu1 }
0x1436   :  { %5377 = vtanh.f32 %v4166_v63  ;;  %v4170_v14 = vadd.f32 %v4169_v44, %v4089_v30  ;;  %v4260_v63 = vpop.permute.xlu1 %4259 }
0x1437   :  { %v4171_v45 = vpop.f32.mrf.mxu1 }
0x1438   :  { %v4172_v2 = vadd.f32 %v4171_v45, %v4089_v30  ;;  %v4176_v23 = vsub.f32 %v6810_v6, %v4170_v14 }
0x143a   :  { %v4177_v42 = vsub.f32 %v6813_v11, %v4172_v2 }
0x1441   :  { %v5376_v5 = vpop.eup %5375 }
0x1442   :  { %v4193_v46 = vrot.slane %v5376_v5, 4  ;;  %v4178_v27 = vsub.f32 0.0, %v5376_v5 }
0x1443   :  { %v5378_v15 = vpop.eup %5377 }
0x1444   :  { %v4194_v49 = vadd.f32 %v5376_v5, %v4193_v46  ;;  %v4180_v24 = vmul.f32 1.442695, %v4178_v27  ;;  %v4179_v60 = vsub.f32 0.0, %v5378_v15  ;;  %v4199_v13 = vrot.slane %v5378_v15, 4  ;;  %v4255_v46 = vpop.permute.xlu0 %4254 }
0x1446   :  { %5379 = vpow2.f32 %v4180_v24  ;;  %v4182_v61 = vmul.f32 1.442695, %v4179_v60  ;;  %v4195_v0 = vrot.slane %v4194_v49, 2  ;;  %v4200_v41 = vadd.f32 %v5378_v15, %v4199_v13 }
0x1448   :  { %5381 = vpow2.f32 %v4182_v61  ;;  %v4196_v4 = vadd.f32 %v4195_v0, %v4194_v49  ;;  %v4201_v12 = vrot.slane %v4200_v41, 2  ;;  %v4250_v0 = vpop.permute.xlu1 %4249 }
0x144a   :  { %v4197_v51 = vrot.slane %v4196_v4, 1  ;;  %v4202_v53 = vadd.f32 %v4201_v12, %v4200_v41 }
0x144c   :  { %v6907_v17 = vadd.f32 %v4197_v51, %v4196_v4  ;;  %v4203_v16 = vrot.slane %v4202_v53, 1 }
0x144e   :  { %v6909_v19 = vadd.f32 %v4203_v16, %v4202_v53  ;;  %v4205_v18 = vsub.f32 %v6800_v36, %v6907_v17  ;;  %v4245_v53 = vpop.permute.xlu0 %4244 }
0x1450   :  { %v4206_v48 = vsub.f32 %v6805_v25, %v6909_v19 }
0x1453   :  { %v5380_v62 = vpop.eup %5379 }
0x1454   :  { %v4184_v8 = vmul.f32 %v5380_v62, %v4176_v23 }
0x1455   :  { %v5382_v3 = vpop.eup %5381 }
0x1456   :  { %v4185_v9 = vmul.f32 %v5382_v3, %v4177_v42  ;;  %v6918_v37 = vsel %vm4190_vm0, %v6810_v6, %v4184_v8  ;;  %v4217_v6 = vld [vmem:[%s7029_s2 + $0x8] sm:$0xff] }
0x1457   :  { %v4214_v20 = vmul.f32 %v4212_v56, %v6918_v37 }
0x1458   :  { %v4192_v47 = vsel %vm4190_vm0, %v6813_v11, %v4185_v9  ;;  %v4218_v11 = vld [vmem:[%s7029_s2 + $0x10] sm:$0xff]  ;;  %v4240_v9 = vpop.permute.xlu1 %4239 }
0x1459   :  { %v4215_v35 = vmul.f32 %v4212_v56, %v4192_v47 }
0x145b   :  { %4326 = vmatprep.subr.mxu1 %v4215_v35 }
0x145c   :  { %4327 = vmatpush1.msra.mxu1 %v4214_v20 }
0x145d   :  { %5288 = vmatmul.mubr.msk.f32.vlgmr.msra.gmra.mxu1 %vm101_vm3, %v4216_v40 }
0x145e   :  { %4366 = vmatprep.mubr.f32.mxu1 %v7097_v54 }
0x1461   :  { %5289 = vmatmul.mubr.msk.f32.gmra.mxu1 %vm101_vm3, %v4217_v6 }
0x1462   :  { %4372 = vmatprep.mubr.f32.mxu1 %v7097_v54 }
0x1465   :  { %5290 = vmatmul.mubr.msk.f32.gmra.mxu1 %vm101_vm3, %v4218_v11  ;;  %v4235_v11 = vpop.permute.xlu0 %4234 }
0x1466   :  { %4378 = vmatprep.mubr.f32.mxu1 %v7097_v54 }
0x1469   :  { %5291 = vmatmul.mubr.msk.f32.gmra.mxu1 %vm101_vm3, %v4219_v33 }
0x146a   :  { %4384 = vmatprep.mubr.f32.mxu1 %v7097_v54 }
0x146d   :  { %5292 = vmatmul.mubr.msk.f32.gmra.mxu1 %vm101_vm3, %v4220_v43 }
0x146e   :  { %4390 = vmatprep.mubr.f32.mxu1 %v7097_v54 }
0x1471   :  { %5293 = vmatmul.mubr.msk.f32.gmra.mxu1 %vm101_vm3, %v4221_v7 }
0x1472   :  { %4396 = vmatprep.mubr.f32.mxu1 %v7097_v54 }
0x1475   :  { %5294 = vmatmul.mubr.msk.f32.gmra.mxu1 %vm101_vm3, %v4222_v32 }
0x1476   :  { %4402 = vmatprep.mubr.f32.mxu1 %v7097_v54 }
0x1479   :  { %5295 = vmatmul.mubr.msk.f32.gmra.mxu1 %vm101_vm3, %v4223_v38 }
0x147a   :  { %4756 = vmatprep.mubr.f32.mxu1 %v7097_v54 }
0x151d   :  { %v4362_v1 = vpop.f32.mrf.mxu1 }
0x151f   :  { %v4364_v28 = vpop.f32.mrf.mxu1 }
0x1520   :  { %v4365_v32 = vadd.f32 %v4364_v28, %v4235_v11 }
0x1521   :  { %v4368_v29 = vpop.f32.mrf.mxu1 }
0x1522   :  { %v4369_v33 = vadd.f32 %v4368_v29, %v4240_v9 }
0x1523   :  { %v4370_v55 = vpop.f32.mrf.mxu1 }
0x1524   :  { %v4371_v20 = vadd.f32 %v4370_v55, %v4240_v9  ;;  %v4411_v55 = vmul.f32 0.01, %v4369_v33 }
0x1525   :  { %v4374_v31 = vpop.f32.mrf.mxu1 }
0x1526   :  { %v4375_v56 = vadd.f32 %v4374_v31, %v4245_v53  ;;  %v4412_v31 = vmul.f32 0.01, %v4371_v20 }
0x1527   :  { %v4376_v34 = vpop.f32.mrf.mxu1 }
0x1528   :  { %v4377_v8 = vadd.f32 %v4376_v34, %v4245_v53  ;;  %v4428_v28 = vmax.f32 %v4371_v20, %v4412_v31 }
0x1529   :  { %v4380_v39 = vpop.f32.mrf.mxu1 }
0x152a   :  { %v4381_v23 = vadd.f32 %v4380_v39, %v4250_v0  ;;  %v4414_v38 = vmul.f32 0.01, %v4377_v8  ;;  %v4363_v39 = vadd.f32 %v4362_v1, %v4235_v11 }
0x152b   :  { %v4382_v52 = vpop.f32.mrf.mxu1 }
0x152c   :  { %v4383_v45 = vadd.f32 %v4382_v52, %v4250_v0  ;;  %v4415_v43 = vmul.f32 0.01, %v4381_v23  ;;  %v4413_v52 = vmul.f32 0.01, %v4375_v56  ;;  %v4409_v29 = vmul.f32 0.01, %v4363_v39 }
0x152d   :  { %v4386_v57 = vpop.f32.mrf.mxu1 }
0x152e   :  { %v4387_v16 = vadd.f32 %v4386_v57, %v4255_v46  ;;  %v4416_v40 = vmul.f32 0.01, %v4383_v45 }
0x152f   :  { %v4388_v58 = vpop.f32.mrf.mxu1 }
0x1530   :  { %v4389_v12 = vadd.f32 %v4388_v58, %v4255_v46  ;;  %v4417_v47 = vmul.f32 0.01, %v4387_v16  ;;  %v4432_v58 = vmax.f32 %v4383_v45, %v4416_v40  ;;  %v4442_v46 = vld [vmem:[%s7031_s4 + $0x8] sm:$0xff]  ;;  %v4495_v45 = vpop.permute.xlu1 %4494 }
0x1531   :  { %v4392_v50 = vpop.f32.mrf.mxu1 }
0x1532   :  { %v4393_v41 = vadd.f32 %v4392_v50, %v4260_v63  ;;  %v4418_v42 = vmul.f32 0.01, %v4389_v12  ;;  %v4433_v57 = vmax.f32 %v4387_v16, %v4417_v47  ;;  %v4410_v50 = vmul.f32 0.01, %v4365_v32 }
0x1533   :  { %v4394_v10 = vpop.f32.mrf.mxu1 }
0x1534   :  { %v4395_v13 = vadd.f32 %v4394_v10, %v4260_v63  ;;  %v4419_v62 = vmul.f32 0.01, %v4393_v41  ;;  %v4434_v34 = vmax.f32 %v4389_v12, %v4418_v42  ;;  %v4429_v10 = vmax.f32 %v4375_v56, %v4413_v52 }
0x1535   :  { %v4398_v59 = vpop.f32.mrf.mxu1  ;;  %v4426_v1 = vmax.f32 %v4365_v32, %v4410_v50  ;;  %v4425_v63 = vmax.f32 %v4363_v39, %v4409_v29 }
0x1536   :  { %v4399_v24 = vadd.f32 %v4398_v59, %v4265_v22  ;;  %v4420_v14 = vmul.f32 0.01, %v4395_v13  ;;  %v4435_v7 = vmax.f32 %v4393_v41, %v4419_v62  ;;  %v4427_v59 = vmax.f32 %v4369_v33, %v4411_v55 }
0x1537   :  { %v4400_v5 = vpop.f32.mrf.mxu1 }
0x1538   :  { %v4401_v15 = vadd.f32 %v4400_v5, %v4265_v22  ;;  %v4421_v30 = vmul.f32 0.01, %v4399_v24  ;;  %v4436_v6 = vmax.f32 %v4395_v13, %v4420_v14  ;;  %v4430_v22 = vmax.f32 %v4377_v8, %v4414_v38  ;;  %v4441_v5 = vld [vmem:[%s7031_s4] sm:$0xff]  ;;  %v4448_v13 = vld [vmem:[%s7031_s4 + $0x38] sm:$0xff] }
0x1539   :  { %v4404_v27 = vpop.f32.mrf.mxu1 }
0x153a   :  { %v4405_v49 = vadd.f32 %v4404_v27, %v4270_v21  ;;  %v4422_v44 = vmul.f32 0.01, %v4401_v15  ;;  %v4437_v35 = vmax.f32 %v4399_v24, %v4421_v30  ;;  %v4443_v27 = vld [vmem:[%s7031_s4 + $0x10] sm:$0xff]  ;;  %v4446_v24 = vld [vmem:[%s7031_s4 + $0x28] sm:$0xff] }
0x153b   :  { %v4406_v60 = vpop.f32.mrf.mxu1 }
0x153c   :  { %v4407_v61 = vadd.f32 %v4406_v60, %v4270_v21  ;;  %v4423_v4 = vmul.f32 0.01, %v4405_v49  ;;  %v4438_v3 = vmax.f32 %v4401_v15, %v4422_v44  ;;  %v4431_v21 = vmax.f32 %v4381_v23, %v4415_v43  ;;  %v4444_v15 = vld [vmem:[%s7031_s4 + $0x18] sm:$0xff]  ;;  %v4447_v60 = vld [vmem:[%s7031_s4 + $0x30] sm:$0xff] }
0x153e   :  { %v4424_v51 = vmul.f32 0.01, %v4407_v61  ;;  %v4439_v26 = vmax.f32 %v4405_v49, %v4423_v4  ;;  %v4445_v49 = vld [vmem:[%s7031_s4 + $0x20] sm:$0xff] }
0x1540   :  { %v4440_v2 = vmax.f32 %v4407_v61, %v4424_v51 }
0x1542   :  { %4537 = vmatprep.subr.mxu0 %v4440_v2  ;;  %v4490_v2 = vpop.permute.xlu0 %4489 }
0x1543   :  { %4538 = vmatpush1.msra.mxu0 %v4439_v26  ;;  %v4485_v26 = vpop.permute.xlu1 %4484 }
0x1544   :  { %4539 = vmatprep.subr.mxu0 %v4438_v3 }
0x1545   :  { %4540 = vmatpush1.msra.mxu0 %v4437_v35 }
0x1546   :  { %4541 = vmatprep.subr.mxu0 %v4436_v6  ;;  %v4480_v42 = vpop.permute.xlu0 %4479 }
0x1547   :  { %4542 = vmatpush1.msra.mxu0 %v4435_v7  ;;  %v4475_v40 = vpop.permute.xlu1 %4474 }
0x1548   :  { %4543 = vmatprep.subr.mxu0 %v4434_v34 }
0x1549   :  { %4544 = vmatpush1.msra.mxu0 %v4433_v57 }
0x154a   :  { %4545 = vmatprep.subr.mxu0 %v4432_v58  ;;  %v4470_v32 = vpop.permute.xlu0 %4469 }
0x154b   :  { %4546 = vmatpush1.msra.mxu0 %v4431_v21  ;;  %v4465_v29 = vpop.permute.xlu1 %4464 }
0x154c   :  { %4547 = vmatprep.subr.mxu0 %v4430_v22 }
0x154d   :  { %4548 = vmatpush1.msra.mxu0 %v4429_v10 }
0x154e   :  { %4549 = vmatprep.subr.mxu0 %v4428_v28 }
0x154f   :  { %4550 = vmatpush1.msra.mxu0 %v4427_v59 }
0x1550   :  { %4551 = vmatprep.subr.mxu0 %v4426_v1 }
0x1551   :  { %4552 = vmatpush1.msra.mxu0 %v4425_v63 }
0x1552   :  { %5296 = vmatmul.mubr.msk.f32.vlgmr.msra.gmra.mxu0 %vm329_vm9, %v4441_v5 }
0x1553   :  { %4591 = vmatprep.mubr.f32.mxu0 %v7097_v54 }
0x1556   :  { %5297 = vmatmul.mubr.msk.f32.gmra.mxu0 %vm329_vm9, %v4442_v46  ;;  %v4460_v46 = vpop.permute.xlu0 %4459 }
0x1557   :  { %4597 = vmatprep.mubr.f32.mxu0 %v7097_v54 }
0x155a   :  { %5298 = vmatmul.mubr.msk.f32.gmra.mxu0 %vm329_vm9, %v4443_v27 }
0x155b   :  { %4603 = vmatprep.mubr.f32.mxu0 %v7097_v54 }
0x155e   :  { %5299 = vmatmul.mubr.msk.f32.gmra.mxu0 %vm329_vm9, %v4444_v15 }
0x155f   :  { %4609 = vmatprep.mubr.f32.mxu0 %v7097_v54 }
0x1562   :  { %5300 = vmatmul.mubr.msk.f32.gmra.mxu0 %vm329_vm9, %v4445_v49 }
0x1563   :  { %4615 = vmatprep.mubr.f32.mxu0 %v7097_v54 }
0x1566   :  { %5301 = vmatmul.mubr.msk.f32.gmra.mxu0 %vm329_vm9, %v4446_v24 }
0x1567   :  { %4621 = vmatprep.mubr.f32.mxu0 %v7097_v54 }
0x156a   :  { %5302 = vmatmul.mubr.msk.f32.gmra.mxu0 %vm329_vm9, %v4447_v60 }
0x156b   :  { %4627 = vmatprep.mubr.f32.mxu0 %v7097_v54 }
0x156e   :  { %5303 = vmatmul.mubr.msk.f32.gmra.mxu0 %vm329_vm9, %v4448_v13 }
0x156f   :  { %4750 = vmatprep.mubr.f32.mxu0 %v7097_v54 }
0x1612   :  { %v7002_v61 = vpop.f32.mrf.mxu0 }
0x1614   :  { %v4589_v0 = vpop.f32.mrf.mxu0 }
0x1615   :  { %v4590_v24 = vadd.f32 %v4589_v0, %v4460_v46 }
0x1616   :  { %v4593_v41 = vpop.f32.mrf.mxu0 }
0x1617   :  { %v4594_v27 = vadd.f32 %v4593_v41, %v4465_v29 }
0x1618   :  { %v4595_v4 = vpop.f32.mrf.mxu0 }
0x1619   :  { %v4596_v1 = vadd.f32 %v4595_v4, %v4465_v29  ;;  %v4636_v41 = vmul.f32 0.01, %v4594_v27 }
0x161a   :  { %v4599_v12 = vpop.f32.mrf.mxu0 }
0x161b   :  { %v4600_v10 = vadd.f32 %v4599_v12, %v4470_v32  ;;  %v4588_v12 = vadd.f32 %v7002_v61, %v4460_v46  ;;  %v4637_v4 = vmul.f32 0.01, %v4596_v1 }
0x161c   :  { %v4601_v44 = vpop.f32.mrf.mxu0 }
0x161d   :  { %v4602_v21 = vadd.f32 %v4601_v44, %v4470_v32  ;;  %v4638_v44 = vmul.f32 0.01, %v4600_v10  ;;  %v4653_v61 = vmax.f32 %v4596_v1, %v4637_v4 }
0x161e   :  { %v4605_v51 = vpop.f32.mrf.mxu0 }
0x161f   :  { %v4606_v31 = vadd.f32 %v4605_v51, %v4475_v40  ;;  %v4639_v60 = vmul.f32 0.01, %v4602_v21 }
0x1620   :  { %v4607_v53 = vpop.f32.mrf.mxu0 }
0x1621   :  { %v4608_v39 = vadd.f32 %v4607_v53, %v4475_v40  ;;  %v4640_v15 = vmul.f32 0.01, %v4606_v31  ;;  %v4655_v0 = vmax.f32 %v4602_v21, %v4639_v60 }
0x1622   :  { %v4611_v16 = vpop.f32.mrf.mxu0 }
0x1623   :  { %v4612_v38 = vadd.f32 %v4611_v16, %v4480_v42  ;;  %v4641_v63 = vmul.f32 0.01, %v4608_v39  ;;  %v4656_v16 = vmax.f32 %v4606_v31, %v4640_v15  ;;  %v4804_v31 = vlaneseq }
0x1624   :  { %v4613_v30 = vpop.f32.mrf.mxu0 }
0x1625   :  { %v4614_v33 = vadd.f32 %v4613_v30, %v4480_v42  ;;  %v4642_v28 = vmul.f32 0.01, %v4612_v38  ;;  %v4657_v53 = vmax.f32 %v4608_v39, %v4641_v63  ;;  %v4635_v30 = vmul.f32 0.01, %v4590_v24  ;;  %v4673_v42 = vpop.permute.xlu1 %4672 }
0x1626   :  { %v4617_v14 = vpop.f32.mrf.mxu0  ;;  %v4805_v29 = vshrl.u32 %v4804_v31, 7  ;;  %vm4818_vm2 = vcmp.lt.s32.totalorder %v4804_v31, 256 }
0x1627   :  { %v4618_v6 = vadd.f32 %v4617_v14, %v4485_v26  ;;  %v4643_v50 = vmul.f32 0.01, %v4614_v33  ;;  %v4658_v51 = vmax.f32 %v4612_v38, %v4642_v28  ;;  %v4654_v14 = vmax.f32 %v4600_v10, %v4638_v44  ;;  %v4678_v10 = vpop.permute.xlu0 %4677 }
0x1628   :  { %v4619_v23 = vpop.f32.mrf.mxu0 }
0x1629   :  { %v4620_v35 = vadd.f32 %v4619_v23, %v4485_v26  ;;  %v4644_v58 = vmul.f32 0.01, %v4618_v6  ;;  %v4659_v13 = vmax.f32 %v4614_v33, %v4643_v50  ;;  %v4651_v23 = vmax.f32 %v4590_v24, %v4635_v30  ;;  %v4666_v26 = vld [vmem:[%s7033_s6] sm:$0xff]  ;;  %v4778_v46 = vpop.permute.xlu1 %4777 }
0x162a   :  { %v4623_v62 = vpop.f32.mrf.mxu0  ;;  %vm4779_vm1 = vcmp.eq.s32.totalorder %v4778_v46, 1 }
0x162b   :  { %v4624_v56 = vadd.f32 %v4623_v62, %v4490_v2  ;;  %v4645_v52 = vmul.f32 0.01, %v4620_v35  ;;  %v4660_v49 = vmax.f32 %v4618_v6, %v4644_v58 }
0x162c   :  { %v4625_v8 = vpop.f32.mrf.mxu0 }
0x162d   :  { %v4626_v3 = vadd.f32 %v4625_v8, %v4490_v2  ;;  %v4646_v34 = vmul.f32 0.01, %v4624_v56  ;;  %v4661_v5 = vmax.f32 %v4620_v35, %v4645_v52  ;;  %v4652_v2 = vmax.f32 %v4594_v27, %v4636_v41  ;;  %v4667_v8 = vld [vmem:[%s7033_s6 + $0x8] sm:$0xff] }
0x162e   :  { %v4629_v54 = vpop.f32.mrf.mxu0  ;;  %v5391_v52 = vmov 1966171168  }
0x162f   :  { %v4630_v9 = vadd.f32 %v4629_v54, %v4495_v45  ;;  %v4647_v43 = vmul.f32 0.01, %v4626_v3  ;;  %v4662_v59 = vmax.f32 %v4624_v56, %v4646_v34 }
0x1630   :  { %v4631_v47 = vpop.f32.mrf.mxu0 }
0x1631   :  { %v4632_v20 = vadd.f32 %v4631_v47, %v4495_v45  ;;  %v4648_v11 = vmul.f32 0.01, %v4630_v9  ;;  %v4663_v22 = vmax.f32 %v4626_v3, %v4647_v43  ;;  %v4634_v45 = vmul.f32 0.01, %v4588_v12 }
0x1633   :  { %v4649_v7 = vmul.f32 0.01, %v4632_v20  ;;  %v4664_v55 = vmax.f32 %v4630_v9, %v4648_v11  ;;  %v4650_v62 = vmax.f32 %v4588_v12, %v4634_v45 }
0x1635   :  { %v4665_v57 = vmax.f32 %v4632_v20, %v4649_v7 }
0x1637   :  { %4702 = vmatprep.subr.mxu0 %v4665_v57  ;;  %5306 = vmatprep.subr.mxu1 %v4665_v57  ;;  %v4802_v57 = vunpack.c.l.s4 %v5391_v52 }
0x1638   :  { %4703 = vmatpush1.msra.mxu0 %v4664_v55  ;;  %5314 = vmatpush1.msra.mxu1 %v4664_v55 }
0x1639   :  { %4704 = vmatprep.subr.mxu0 %v4663_v22  ;;  %5307 = vmatprep.subr.mxu1 %v4663_v22  ;;  %v4803_v22 = vunpack.c.0.s8 %v4802_v57 }
0x163a   :  { %4705 = vmatpush1.msra.mxu0 %v4662_v59  ;;  %5315 = vmatpush1.msra.mxu1 %v4662_v59 }
0x163b   :  { %4706 = vmatprep.subr.mxu0 %v4661_v5  ;;  %5308 = vmatprep.subr.mxu1 %v4661_v5  ;;  %v4806_v5 = vsub.s32 %v4803_v22, %v4805_v29 }
0x163c   :  { %4707 = vmatpush1.msra.mxu0 %v4660_v49  ;;  %5316 = vmatpush1.msra.mxu1 %v4660_v49 }
0x163d   :  { %4708 = vmatprep.subr.mxu0 %v4659_v13  ;;  %5309 = vmatprep.subr.mxu1 %v4659_v13 }
0x163e   :  { %4709 = vmatpush1.msra.mxu0 %v4658_v51  ;;  %5317 = vmatpush1.msra.mxu1 %v4658_v51 }
0x163f   :  { %4710 = vmatprep.subr.mxu0 %v4657_v53  ;;  %5310 = vmatprep.subr.mxu1 %v4657_v53 }
0x1640   :  { %4711 = vmatpush1.msra.mxu0 %v4656_v16  ;;  %5318 = vmatpush1.msra.mxu1 %v4656_v16 }
0x1641   :  { %4712 = vmatprep.subr.mxu0 %v4655_v0  ;;  %5311 = vmatprep.subr.mxu1 %v4655_v0 }
0x1642   :  { %4713 = vmatpush1.msra.mxu0 %v4654_v14  ;;  %5319 = vmatpush1.msra.mxu1 %v4654_v14 }
0x1643   :  { %4714 = vmatprep.subr.mxu0 %v4653_v61  ;;  %5312 = vmatprep.subr.mxu1 %v4653_v61 }
0x1644   :  { %4715 = vmatpush1.msra.mxu0 %v4652_v2  ;;  %5320 = vmatpush1.msra.mxu1 %v4652_v2 }
0x1645   :  { %4716 = vmatprep.subr.mxu0 %v4651_v23  ;;  %5313 = vmatprep.subr.mxu1 %v4651_v23 }
0x1646   :  { %4717 = vmatpush1.msra.mxu0 %v4650_v62  ;;  %5321 = vmatpush1.msra.mxu1 %v4650_v62 }
0x1647   :  { %5304 = vmatmul.mubr.msk.f32.vlgmr.msra.gmra.mxu0 %vm329_vm9, %v4666_v26  ;;  %5305 = vmatmul.mubr.msk.f32.vlgmr.msra.gmra.mxu1 %vm329_vm9, %v4667_v8 }
0x1707   :  { %v4752_v54 = vpop.f32.mrf.mxu0  ;;  %v4758_v3 = vpop.f32.mrf.mxu1 }
0x1708   :  { %v4753_v9 = vadd.f32 %v4752_v54, %v4673_v42  ;;  %v4759_v28 = vadd.f32 %v4758_v3, %v4678_v10 }
0x1709   :  { %v4754_v56 = vpop.f32.mrf.mxu0  ;;  %v4760_v47 = vpop.f32.mrf.mxu1 }
0x170a   :  { %5383 = vtanh.f32 %v4753_v9  ;;  %v4755_v35 = vadd.f32 %v4754_v56, %v4673_v42  ;;  %v4765_v27 = vsub.f32 %v6918_v37, %v4759_v28 }
0x170c   :  { %5385 = vtanh.f32 %v4755_v35 }
0x1717   :  { %v5384_v20 = vpop.eup %5383 }
0x1718   :  { %v4782_v40 = vrot.slane %v5384_v20, 4  ;;  %v4767_v6 = vsub.f32 0.0, %v5384_v20 }
0x1719   :  { %v5386_v11 = vpop.eup %5385 }
0x171a   :  { %v4769_v33 = vmul.f32 1.442695, %v4767_v6  ;;  %v4783_v43 = vadd.f32 %v5384_v20, %v4782_v40  ;;  %v4788_v7 = vrot.slane %v5386_v11, 4 }
0x171c   :  { %5387 = vpow2.f32 %v4769_v33  ;;  %v4784_v32 = vrot.slane %v4783_v43, 2  ;;  %v4789_v38 = vadd.f32 %v5386_v11, %v4788_v7 }
0x171e   :  { %v4785_v34 = vadd.f32 %v4784_v32, %v4783_v43  ;;  %v4790_v39 = vrot.slane %v4789_v38, 2 }
0x1720   :  { %v4786_v58 = vrot.slane %v4785_v34, 1  ;;  %v4791_v55 = vadd.f32 %v4790_v39, %v4789_v38 }
0x1722   :  { %v4787_v21 = vadd.f32 %v4786_v58, %v4785_v34  ;;  %v4792_v50 = vrot.slane %v4791_v55, 1 }
0x1724   :  { %v4793_v59 = vadd.f32 %v4792_v50, %v4791_v55  ;;  %v4794_v1 = vsub.f32 %v4205_v18, %v4787_v21 }
0x1726   :  { %v4795_v63 = vsub.f32 %v4206_v48, %v4793_v59 }
0x1728   :  { %v4800_v15 = vcombine.low %v4794_v1, %v4795_v63 }
0x1729   :  { %v5388_v49 = vpop.eup %5387 }
0x172a   :  { %v4773_v24 = vmul.f32 %v5388_v49, %v4765_v27  ;;  %v4807_v60 = vrot.slane %v4800_v15, %v4806_v5 }
0x172c   :  { %v4780_v13 = vsel %vm4779_vm1, %v6918_v37, %v4773_v24  ;;  %v4814_v12 = vrot.slane %v4807_v60, %v4806_v5 }
0x172d   :  { %4852 = vst [vmem:[%s7035_s8] sm:$0xff] %v4780_v13 }
0x172e   :  { %4820 = vst.msk [vmem:[#allocation3] sm:$0x3] %vm4818_vm2, %v4814_v12 }
0x1735   :  { %v4874_v36 = vld [vmem:[#allocation3] sm:$0x1] }
0x1736   :  { %4875 = vst [vmem:[%s7036_s9] sm:$0x1] %v4874_v36 }

</bundles_post_ra>
